<compile_context>
chip_gen: v5e
topology: v5e:2x2
jax: 0.10.0
libtpu: 0.0.40
codegen_flags: <defaults>
</compile_context>

<pallas_src>
import functools
import math

import jax
import jax.numpy as jnp
from jax import lax
from jax.experimental import pallas as pl
from jax.experimental.pallas import tpu as pltpu


# ---------------------------------------------------------------------------
# Pallas kernel: one grid step = one batch element, whole decoder stack.
#   x_ref      : (1, T, D)     target-side activations
#   mem_ref    : (1, S, D)     encoder memory
#   srcm_ref   : (1, 1, S)     source mask (0/1 float)
#   trgm_ref   : (1, T, T)     target (causal/padding) mask (0/1 float)
#   attn_w_ref : (N, 8, D, D)  [layer, (self q,k,v,o | src q,k,v,o), in, out]
#   attn_b_ref : (N, 8, 1, D)
#   ffn_w1_ref : (N, D, Dff)   ffn_b1_ref: (N, 1, Dff)
#   ffn_w2_ref : (N, Dff, D)   ffn_b2_ref: (N, 1, D)
#   ln_g_ref   : (3N+1, 1, D)  per-sublayer LayerNorm gammas, last row = final
#   ln_b_ref   : (3N+1, 1, D)  betas
#   o_ref      : (1, T, D)
# ---------------------------------------------------------------------------
def _decoder_kernel(x_ref, mem_ref, srcm_ref, trgm_ref,
                    attn_w_ref, attn_b_ref,
                    ffn_w1_ref, ffn_b1_ref, ffn_w2_ref, ffn_b2_ref,
                    ln_g_ref, ln_b_ref, o_ref,
                    *, n_layers, n_heads, eps):
    x = x_ref[0].astype(jnp.float32)        # (T, D)
    mem = mem_ref[0].astype(jnp.float32)    # (S, D)
    T, D = x.shape
    S = mem.shape[0]
    dk = D // n_heads
    scale = 1.0 / math.sqrt(dk)
    neg_inf = jnp.float32(-1e9)

    # Boolean masks, broadcast once (hoisted out of all head loops).
    trg_mask = trgm_ref[0] > 0.0                                   # (T, T)
    src_mask = jnp.broadcast_to(srcm_ref[0], (T, S)) > 0.0         # (T, S)

    def layer_norm(z, g, b):
        mu = jnp.mean(z, axis=-1, keepdims=True)
        var = jnp.mean((z - mu) ** 2, axis=-1, keepdims=True)
        return (z - mu) * lax.rsqrt(var + eps) * g + b

    def mha(q_in, kv_in, mask, wq, bq, wk, bk, wv, bv, wo, bo):
        q = jnp.dot(q_in, wq, preferred_element_type=jnp.float32) + bq
        k = jnp.dot(kv_in, wk, preferred_element_type=jnp.float32) + bk
        v = jnp.dot(kv_in, wv, preferred_element_type=jnp.float32) + bv
        acc = None
        for h in range(n_heads):            # static unroll over heads
            sl = slice(h * dk, (h + 1) * dk)
            # scores = q_h @ k_h^T : contract the dk axis directly (no transpose op)
            s = lax.dot_general(q[:, sl], k[:, sl],
                                (((1,), (1,)), ((), ())),
                                preferred_element_type=jnp.float32) * scale
            s = jnp.where(mask, s, neg_inf)
            s = s - jnp.max(s, axis=-1, keepdims=True)
            e = jnp.exp(s)
            p = e / jnp.sum(e, axis=-1, keepdims=True)
            oh = jnp.dot(p, v[:, sl], preferred_element_type=jnp.float32)   # (Tq, dk)
            # concat(o_h) @ Wo == sum_h o_h @ Wo[h*dk:(h+1)*dk, :]
            # (folds the output projection per head, avoids an in-kernel concat)
            contrib = jnp.dot(oh, wo[sl, :], preferred_element_type=jnp.float32)
            acc = contrib if acc is None else acc + contrib
        return acc + bo

    for l in range(n_layers):               # static unroll: n_layers is compile-time
        # --- sublayer 0: masked multi-head self-attention --------------------
        h0 = layer_norm(x, ln_g_ref[3 * l], ln_b_ref[3 * l])
        x = x + mha(h0, h0, trg_mask,
                    attn_w_ref[l, 0], attn_b_ref[l, 0],
                    attn_w_ref[l, 1], attn_b_ref[l, 1],
                    attn_w_ref[l, 2], attn_b_ref[l, 2],
                    attn_w_ref[l, 3], attn_b_ref[l, 3])
        # --- sublayer 1: multi-head cross-attention over encoder memory ------
        h1 = layer_norm(x, ln_g_ref[3 * l + 1], ln_b_ref[3 * l + 1])
        x = x + mha(h1, mem, src_mask,
                    attn_w_ref[l, 4], attn_b_ref[l, 4],
                    attn_w_ref[l, 5], attn_b_ref[l, 5],
                    attn_w_ref[l, 6], attn_b_ref[l, 6],
                    attn_w_ref[l, 7], attn_b_ref[l, 7])
        # --- sublayer 2: position-wise feed-forward ---------------------------
        h2 = layer_norm(x, ln_g_ref[3 * l + 2], ln_b_ref[3 * l + 2])
        ff = jnp.maximum(
            jnp.dot(h2, ffn_w1_ref[l], preferred_element_type=jnp.float32)
            + ffn_b1_ref[l], 0.0)
        x = x + (jnp.dot(ff, ffn_w2_ref[l], preferred_element_type=jnp.float32)
                 + ffn_b2_ref[l])

    # The Decoder module's own final LayerNorm.
    o_ref[0] = layer_norm(x, ln_g_ref[3 * n_layers],
                          ln_b_ref[3 * n_layers]).astype(o_ref.dtype)


# ---------------------------------------------------------------------------
# Wrapper: BlockSpec plumbing. One grid step per batch element.
# ---------------------------------------------------------------------------
def decoder_pallas(x, memory, src_mask, trg_mask, params, *, n_heads, eps=1e-5):
    attn_w, attn_b, ffn_w1, ffn_b1, ffn_w2, ffn_b2, ln_g, ln_b = params
    B, T, D = x.shape
    S = memory.shape[1]
    n_layers = attn_w.shape[0]

    kernel = functools.partial(_decoder_kernel, n_layers=n_layers,
                               n_heads=n_heads, eps=eps)

    def full(a):  # whole-array block, resident across grid steps
        return pl.BlockSpec(a.shape, lambda b, _nd=a.ndim: (0,) * _nd)

    return pl.pallas_call(
        kernel,
        out_shape=jax.ShapeDtypeStruct((B, T, D), x.dtype),
        grid_spec=pltpu.PrefetchScalarGridSpec(
            num_scalar_prefetch=0,
            grid=(B,),
            in_specs=[
                pl.BlockSpec((1, T, D), lambda b: (b, 0, 0)),   # x
                pl.BlockSpec((1, S, D), lambda b: (b, 0, 0)),   # memory
                pl.BlockSpec((1, 1, S), lambda b: (b, 0, 0)),   # src_mask
                pl.BlockSpec((1, T, T), lambda b: (b, 0, 0)),   # trg_mask
                full(attn_w), full(attn_b),
                full(ffn_w1), full(ffn_b1), full(ffn_w2), full(ffn_b2),
                full(ln_g), full(ln_b),
            ],
            out_specs=pl.BlockSpec((1, T, D), lambda b: (b, 0, 0)),
        ),
        compiler_params=pltpu.CompilerParams(
            dimension_semantics=("parallel",)),
    )(x, memory, src_mask, trg_mask,
      attn_w, attn_b, ffn_w1, ffn_b1, ffn_w2, ffn_b2, ln_g, ln_b)


# ---------------------------------------------------------------------------
# Pure-JAX reference (mirrors the PyTorch Decoder / Annotated-Transformer
# DecoderLayer exactly, dropout = identity).
# ---------------------------------------------------------------------------
def decoder_ref(x, memory, src_mask, trg_mask, params, *, n_heads, eps=1e-5):
    attn_w, attn_b, ffn_w1, ffn_b1, ffn_w2, ffn_b2, ln_g, ln_b = params
    n_layers = attn_w.shape[0]
    d = x.shape[-1]
    dk = d // n_heads

    def ln(z, g, b):
        mu = jnp.mean(z, axis=-1, keepdims=True)
        var = jnp.mean((z - mu) ** 2, axis=-1, keepdims=True)
        return (z - mu) / jnp.sqrt(var + eps) * g + b

    def mha(q_in, kv_in, mask, w, bias):
        q = q_in @ w[0] + bias[0]
        k = kv_in @ w[1] + bias[1]
        v = kv_in @ w[2] + bias[2]
        B_, tq, _ = q.shape
        tk = k.shape[1]
        qh = q.reshape(B_, tq, n_heads, dk).transpose(0, 2, 1, 3)
        kh = k.reshape(B_, tk, n_heads, dk).transpose(0, 2, 1, 3)
        vh = v.reshape(B_, tk, n_heads, dk).transpose(0, 2, 1, 3)
        s = jnp.einsum("bhqe,bhke->bhqk", qh, kh) / math.sqrt(dk)
        s = jnp.where(mask, s, -1e9)
        p = jax.nn.softmax(s, axis=-1)
        o = jnp.einsum("bhqk,bhke->bhqe", p, vh)
        o = o.transpose(0, 2, 1, 3).reshape(B_, tq, d)
        return o @ w[3] + bias[3]

    tm = (trg_mask > 0)[:, None, :, :]      # (B,1,T,T)
    sm = (src_mask > 0)[:, None, :, :]      # (B,1,1,S)
    for l in range(n_layers):
        h = ln(x, ln_g[3 * l], ln_b[3 * l])
        x = x + mha(h, h, tm, attn_w[l, :4], attn_b[l, :4])
        h = ln(x, ln_g[3 * l + 1], ln_b[3 * l + 1])
        x = x + mha(h, memory, sm, attn_w[l, 4:], attn_b[l, 4:])
        h = ln(x, ln_g[3 * l + 2], ln_b[3 * l + 2])
        x = x + jnp.maximum(h @ ffn_w1[l] + ffn_b1[l], 0.0) @ ffn_w2[l] + ffn_b2[l]
    return ln(x, ln_g[3 * n_layers], ln_b[3 * n_layers])


# ---------------------------------------------------------------------------
if __name__ == "__main__":
    B, T, S = 2, 8, 16
    D_MODEL, N_HEADS, D_FF, N_LAYERS = 32, 4, 64, 2

    key = jax.random.PRNGKey(0)
    ks = list(jax.random.split(key, 12))

    attn_w = 0.10 * jax.random.normal(ks[0], (N_LAYERS, 8, D_MODEL, D_MODEL), jnp.float32)
    attn_b = 0.05 * jax.random.normal(ks[1], (N_LAYERS, 8, 1, D_MODEL), jnp.float32)
    ffn_w1 = 0.10 * jax.random.normal(ks[2], (N_LAYERS, D_MODEL, D_FF), jnp.float32)
    ffn_b1 = 0.05 * jax.random.normal(ks[3], (N_LAYERS, 1, D_FF), jnp.float32)
    ffn_w2 = 0.10 * jax.random.normal(ks[4], (N_LAYERS, D_FF, D_MODEL), jnp.float32)
    ffn_b2 = 0.05 * jax.random.normal(ks[5], (N_LAYERS, 1, D_MODEL), jnp.float32)
    ln_g = 1.0 + 0.05 * jax.random.normal(ks[6], (3 * N_LAYERS + 1, 1, D_MODEL), jnp.float32)
    ln_b = 0.05 * jax.random.normal(ks[7], (3 * N_LAYERS + 1, 1, D_MODEL), jnp.float32)
    params = (attn_w, attn_b, ffn_w1, ffn_b1, ffn_w2, ffn_b2, ln_g, ln_b)

    x = jax.random.normal(ks[8], (B, T, D_MODEL), jnp.float32)
    memory = jax.random.normal(ks[9], (B, S, D_MODEL), jnp.float32)

    # Causal target mask (B, T, T) and a source padding mask (B, 1, S).
    trg_mask = jnp.broadcast_to(jnp.tril(jnp.ones((T, T), jnp.float32)), (B, T, T))
    src_len = jnp.array([S, S - 5])
    src_mask = (jnp.arange(S)[None, :] < src_len[:, None]).astype(jnp.float32)[:, None, :]

    out = jax.block_until_ready(
        decoder_pallas(x, memory, src_mask, trg_mask, params, n_heads=N_HEADS))
    ref = jax.block_until_ready(
        decoder_ref(x, memory, src_mask, trg_mask, params, n_heads=N_HEADS))

    assert out.shape == (B, T, D_MODEL), out.shape
    max_err = float(jnp.max(jnp.abs(out - ref)))
    assert max_err < 1e-3, f"max abs error {max_err}"

    print("KERNEL_OK")
</pallas_src>

<mosaic_0001>
module attributes {stable_mosaic.version = 11 : i64} {
  func.func @_decoder_kernel(%arg0: i32, %arg1: memref<1x8x32xf32, #tpu.memory_space<vmem>>, %arg2: memref<1x16x32xf32, #tpu.memory_space<vmem>>, %arg3: memref<1x1x16xf32, #tpu.memory_space<vmem>>, %arg4: memref<1x8x8xf32, #tpu.memory_space<vmem>>, %arg5: memref<2x8x32x32xf32, #tpu.memory_space<vmem>>, %arg6: memref<2x8x1x32xf32, #tpu.memory_space<vmem>>, %arg7: memref<2x32x64xf32, #tpu.memory_space<vmem>>, %arg8: memref<2x1x64xf32, #tpu.memory_space<vmem>>, %arg9: memref<2x64x32xf32, #tpu.memory_space<vmem>>, %arg10: memref<2x1x32xf32, #tpu.memory_space<vmem>>, %arg11: memref<7x1x32xf32, #tpu.memory_space<vmem>>, %arg12: memref<7x1x32xf32, #tpu.memory_space<vmem>>, %arg13: memref<1x8x32xf32, #tpu.memory_space<vmem>>) attributes {dimension_semantics = [#tpu.dimension_semantics<parallel>], iteration_bounds = array<i64: 2>, scalar_prefetch = 0 : i64, scratch_operands = 0 : i64, tpu.core_type = #tpu.core_type<tc>, window_params = [{transform_indices = @transform_0, window_bounds = array<i64: 1, 8, 32>}, {transform_indices = @transform_1, window_bounds = array<i64: 1, 16, 32>}, {transform_indices = @transform_2, window_bounds = array<i64: 1, 1, 16>}, {transform_indices = @transform_3, window_bounds = array<i64: 1, 8, 8>}, {pipeline_mode = #tpu.pipeline_mode<synchronous>, transform_indices = @transform_4, window_bounds = array<i64: 2, 8, 32, 32>}, {pipeline_mode = #tpu.pipeline_mode<synchronous>, transform_indices = @transform_5, window_bounds = array<i64: 2, 8, 1, 32>}, {pipeline_mode = #tpu.pipeline_mode<synchronous>, transform_indices = @transform_6, window_bounds = array<i64: 2, 32, 64>}, {pipeline_mode = #tpu.pipeline_mode<synchronous>, transform_indices = @transform_7, window_bounds = array<i64: 2, 1, 64>}, {pipeline_mode = #tpu.pipeline_mode<synchronous>, transform_indices = @transform_8, window_bounds = array<i64: 2, 64, 32>}, {pipeline_mode = #tpu.pipeline_mode<synchronous>, transform_indices = @transform_9, window_bounds = array<i64: 2, 1, 32>}, {pipeline_mode = #tpu.pipeline_mode<synchronous>, transform_indices = @transform_10, window_bounds = array<i64: 7, 1, 32>}, {pipeline_mode = #tpu.pipeline_mode<synchronous>, transform_indices = @transform_11, window_bounds = array<i64: 7, 1, 32>}, {transform_indices = @transform_12, window_bounds = array<i64: 1, 8, 32>}]} {
    %c0 = arith.constant 0 : index
    %c0_0 = arith.constant 0 : index
    %c0_1 = arith.constant 0 : index
    %0 = vector.load %arg1[%c0, %c0_0, %c0_1] : memref<1x8x32xf32, #tpu.memory_space<vmem>>, vector<1x8x32xf32>
    %1 = vector.shape_cast %0 : vector<1x8x32xf32> to vector<8x32xf32>
    %c0_2 = arith.constant 0 : index
    %c0_3 = arith.constant 0 : index
    %c0_4 = arith.constant 0 : index
    %2 = vector.load %arg2[%c0_2, %c0_3, %c0_4] : memref<1x16x32xf32, #tpu.memory_space<vmem>>, vector<1x16x32xf32>
    %3 = vector.shape_cast %2 : vector<1x16x32xf32> to vector<16x32xf32>
    %c0_5 = arith.constant 0 : index
    %c0_6 = arith.constant 0 : index
    %c0_7 = arith.constant 0 : index
    %4 = vector.load %arg4[%c0_5, %c0_6, %c0_7] : memref<1x8x8xf32, #tpu.memory_space<vmem>>, vector<1x8x8xf32>
    %5 = vector.shape_cast %4 : vector<1x8x8xf32> to vector<8x8xf32>
    %cst = arith.constant 0.000000e+00 : f32
    %6 = vector.broadcast %cst : f32 to vector<8x8xf32>
    %7 = arith.cmpf ogt, %5, %6 : vector<8x8xf32>
    %c0_8 = arith.constant 0 : index
    %c0_9 = arith.constant 0 : index
    %c0_10 = arith.constant 0 : index
    %8 = vector.load %arg3[%c0_8, %c0_9, %c0_10] : memref<1x1x16xf32, #tpu.memory_space<vmem>>, vector<1x1x16xf32>
    %9 = vector.shape_cast %8 : vector<1x1x16xf32> to vector<1x16xf32>
    %10 = vector.shape_cast %9 : vector<1x16xf32> to vector<1x16xf32>
    %11 = vector.broadcast %10 : vector<1x16xf32> to vector<8x16xf32>
    %cst_11 = arith.constant 0.000000e+00 : f32
    %12 = vector.broadcast %cst_11 : f32 to vector<8x16xf32>
    %13 = arith.cmpf ogt, %11, %12 : vector<8x16xf32>
    %c0_12 = arith.constant 0 : index
    %c0_13 = arith.constant 0 : index
    %c0_14 = arith.constant 0 : index
    %14 = vector.load %arg11[%c0_12, %c0_13, %c0_14] : memref<7x1x32xf32, #tpu.memory_space<vmem>>, vector<1x1x32xf32>
    %15 = vector.shape_cast %14 : vector<1x1x32xf32> to vector<1x32xf32>
    %c0_15 = arith.constant 0 : index
    %c0_16 = arith.constant 0 : index
    %c0_17 = arith.constant 0 : index
    %16 = vector.load %arg12[%c0_15, %c0_16, %c0_17] : memref<7x1x32xf32, #tpu.memory_space<vmem>>, vector<1x1x32xf32>
    %17 = vector.shape_cast %16 : vector<1x1x32xf32> to vector<1x32xf32>
    %cst_18 = arith.constant dense<0.000000e+00> : vector<8xf32>
    %18 = vector.multi_reduction <add>, %1, %cst_18 [1] : vector<8x32xf32> to vector<8xf32>
    %19 = vector.shape_cast %18 : vector<8xf32> to vector<8x1xf32>
    %cst_19 = arith.constant 3.200000e+01 : f32
    %20 = vector.broadcast %cst_19 : f32 to vector<8x1xf32>
    %21 = arith.divf %19, %20 : vector<8x1xf32>
    %22 = vector.broadcast %21 : vector<8x1xf32> to vector<8x32xf32>
    %23 = arith.subf %1, %22 : vector<8x32xf32>
    %24 = arith.mulf %23, %23 : vector<8x32xf32>
    %cst_20 = arith.constant dense<0.000000e+00> : vector<8xf32>
    %25 = vector.multi_reduction <add>, %24, %cst_20 [1] : vector<8x32xf32> to vector<8xf32>
    %26 = vector.shape_cast %25 : vector<8xf32> to vector<8x1xf32>
    %cst_21 = arith.constant 3.200000e+01 : f32
    %27 = vector.broadcast %cst_21 : f32 to vector<8x1xf32>
    %28 = arith.divf %26, %27 : vector<8x1xf32>
    %29 = vector.broadcast %21 : vector<8x1xf32> to vector<8x32xf32>
    %30 = arith.subf %1, %29 : vector<8x32xf32>
    %cst_22 = arith.constant 9.99999974E-6 : f32
    %31 = vector.broadcast %cst_22 : f32 to vector<8x1xf32>
    %32 = arith.addf %28, %31 : vector<8x1xf32>
    %33 = math.rsqrt %32 : vector<8x1xf32>
    %34 = vector.broadcast %33 : vector<8x1xf32> to vector<8x32xf32>
    %35 = arith.mulf %30, %34 : vector<8x32xf32>
    %36 = vector.broadcast %15 : vector<1x32xf32> to vector<8x32xf32>
    %37 = arith.mulf %35, %36 : vector<8x32xf32>
    %38 = vector.broadcast %17 : vector<1x32xf32> to vector<8x32xf32>
    %39 = arith.addf %37, %38 : vector<8x32xf32>
    %c0_23 = arith.constant 0 : index
    %c0_24 = arith.constant 0 : index
    %c0_25 = arith.constant 0 : index
    %c0_26 = arith.constant 0 : index
    %40 = vector.load %arg5[%c0_23, %c0_24, %c0_25, %c0_26] : memref<2x8x32x32xf32, #tpu.memory_space<vmem>>, vector<1x1x32x32xf32>
    %41 = vector.shape_cast %40 : vector<1x1x32x32xf32> to vector<32x32xf32>
    %c0_27 = arith.constant 0 : index
    %c0_28 = arith.constant 0 : index
    %c0_29 = arith.constant 0 : index
    %c0_30 = arith.constant 0 : index
    %42 = vector.load %arg6[%c0_27, %c0_28, %c0_29, %c0_30] : memref<2x8x1x32xf32, #tpu.memory_space<vmem>>, vector<1x1x1x32xf32>
    %43 = vector.shape_cast %42 : vector<1x1x1x32xf32> to vector<1x32xf32>
    %c0_31 = arith.constant 0 : index
    %c1 = arith.constant 1 : index
    %c0_32 = arith.constant 0 : index
    %c0_33 = arith.constant 0 : index
    %44 = vector.load %arg5[%c0_31, %c1, %c0_32, %c0_33] : memref<2x8x32x32xf32, #tpu.memory_space<vmem>>, vector<1x1x32x32xf32>
    %45 = vector.shape_cast %44 : vector<1x1x32x32xf32> to vector<32x32xf32>
    %c0_34 = arith.constant 0 : index
    %c1_35 = arith.constant 1 : index
    %c0_36 = arith.constant 0 : index
    %c0_37 = arith.constant 0 : index
    %46 = vector.load %arg6[%c0_34, %c1_35, %c0_36, %c0_37] : memref<2x8x1x32xf32, #tpu.memory_space<vmem>>, vector<1x1x1x32xf32>
    %47 = vector.shape_cast %46 : vector<1x1x1x32xf32> to vector<1x32xf32>
    %c0_38 = arith.constant 0 : index
    %c2 = arith.constant 2 : index
    %c0_39 = arith.constant 0 : index
    %c0_40 = arith.constant 0 : index
    %48 = vector.load %arg5[%c0_38, %c2, %c0_39, %c0_40] : memref<2x8x32x32xf32, #tpu.memory_space<vmem>>, vector<1x1x32x32xf32>
    %49 = vector.shape_cast %48 : vector<1x1x32x32xf32> to vector<32x32xf32>
    %c0_41 = arith.constant 0 : index
    %c2_42 = arith.constant 2 : index
    %c0_43 = arith.constant 0 : index
    %c0_44 = arith.constant 0 : index
    %50 = vector.load %arg6[%c0_41, %c2_42, %c0_43, %c0_44] : memref<2x8x1x32xf32, #tpu.memory_space<vmem>>, vector<1x1x1x32xf32>
    %51 = vector.shape_cast %50 : vector<1x1x1x32xf32> to vector<1x32xf32>
    %c0_45 = arith.constant 0 : index
    %c3 = arith.constant 3 : index
    %c0_46 = arith.constant 0 : index
    %c0_47 = arith.constant 0 : index
    %52 = vector.load %arg5[%c0_45, %c3, %c0_46, %c0_47] : memref<2x8x32x32xf32, #tpu.memory_space<vmem>>, vector<1x1x32x32xf32>
    %53 = vector.shape_cast %52 : vector<1x1x32x32xf32> to vector<32x32xf32>
    %c0_48 = arith.constant 0 : index
    %c3_49 = arith.constant 3 : index
    %c0_50 = arith.constant 0 : index
    %c0_51 = arith.constant 0 : index
    %54 = vector.load %arg6[%c0_48, %c3_49, %c0_50, %c0_51] : memref<2x8x1x32xf32, #tpu.memory_space<vmem>>, vector<1x1x1x32xf32>
    %55 = vector.shape_cast %54 : vector<1x1x1x32xf32> to vector<1x32xf32>
    %cst_52 = arith.constant dense<0.000000e+00> : vector<8x32xf32>
    %56 = tpu.matmul %39, %41, %cst_52 {dimension_numbers = #tpu.dot_dimension_numbers<[1], [0], [0], [1], [0, 0, 1, 1], [], []>} : vector<8x32xf32>, vector<32x32xf32>, vector<8x32xf32> -> vector<8x32xf32>
    %57 = vector.broadcast %43 : vector<1x32xf32> to vector<8x32xf32>
    %58 = arith.addf %56, %57 : vector<8x32xf32>
    %cst_53 = arith.constant dense<0.000000e+00> : vector<8x32xf32>
    %59 = tpu.matmul %39, %45, %cst_53 {dimension_numbers = #tpu.dot_dimension_numbers<[1], [0], [0], [1], [0, 0, 1, 1], [], []>} : vector<8x32xf32>, vector<32x32xf32>, vector<8x32xf32> -> vector<8x32xf32>
    %60 = vector.broadcast %47 : vector<1x32xf32> to vector<8x32xf32>
    %61 = arith.addf %59, %60 : vector<8x32xf32>
    %cst_54 = arith.constant dense<0.000000e+00> : vector<8x32xf32>
    %62 = tpu.matmul %39, %49, %cst_54 {dimension_numbers = #tpu.dot_dimension_numbers<[1], [0], [0], [1], [0, 0, 1, 1], [], []>} : vector<8x32xf32>, vector<32x32xf32>, vector<8x32xf32> -> vector<8x32xf32>
    %63 = vector.broadcast %51 : vector<1x32xf32> to vector<8x32xf32>
    %64 = arith.addf %62, %63 : vector<8x32xf32>
    %65 = vector.extract_strided_slice %58 {offsets = [0, 0], sizes = [8, 8], strides = [1, 1]} : vector<8x32xf32> to vector<8x8xf32>
    %66 = vector.extract_strided_slice %61 {offsets = [0, 0], sizes = [8, 8], strides = [1, 1]} : vector<8x32xf32> to vector<8x8xf32>
    %cst_55 = arith.constant dense<0.000000e+00> : vector<8x8xf32>
    %67 = tpu.matmul %65, %66, %cst_55 {dimension_numbers = #tpu.dot_dimension_numbers<[1], [1], [0], [0], [0, 0, 1, 0], [], []>} : vector<8x8xf32>, vector<8x8xf32>, vector<8x8xf32> -> vector<8x8xf32>
    %cst_56 = arith.constant 0.353553385 : f32
    %68 = vector.broadcast %cst_56 : f32 to vector<8x8xf32>
    %69 = arith.mulf %67, %68 : vector<8x8xf32>
    %cst_57 = arith.constant -1.000000e+09 : f32
    %70 = vector.broadcast %cst_57 : f32 to vector<8x8xf32>
    %71 = arith.select %7, %69, %70 : vector<8x8xi1>, vector<8x8xf32>
    %cst_58 = arith.constant dense<0xFF800000> : vector<8xf32>
    %72 = vector.multi_reduction <maximumf>, %71, %cst_58 [1] : vector<8x8xf32> to vector<8xf32>
    %73 = vector.shape_cast %72 : vector<8xf32> to vector<8x1xf32>
    %74 = vector.broadcast %73 : vector<8x1xf32> to vector<8x8xf32>
    %75 = arith.subf %71, %74 : vector<8x8xf32>
    %76 = math.exp %75 : vector<8x8xf32>
    %cst_59 = arith.constant dense<0.000000e+00> : vector<8xf32>
    %77 = vector.multi_reduction <add>, %76, %cst_59 [1] : vector<8x8xf32> to vector<8xf32>
    %78 = vector.shape_cast %77 : vector<8xf32> to vector<8x1xf32>
    %79 = vector.broadcast %78 : vector<8x1xf32> to vector<8x8xf32>
    %80 = arith.divf %76, %79 : vector<8x8xf32>
    %81 = vector.extract_strided_slice %64 {offsets = [0, 0], sizes = [8, 8], strides = [1, 1]} : vector<8x32xf32> to vector<8x8xf32>
    %cst_60 = arith.constant dense<0.000000e+00> : vector<8x8xf32>
    %82 = tpu.matmul %80, %81, %cst_60 {dimension_numbers = #tpu.dot_dimension_numbers<[1], [0], [0], [1], [0, 0, 1, 1], [], []>} : vector<8x8xf32>, vector<8x8xf32>, vector<8x8xf32> -> vector<8x8xf32>
    %83 = vector.extract_strided_slice %53 {offsets = [0, 0], sizes = [8, 32], strides = [1, 1]} : vector<32x32xf32> to vector<8x32xf32>
    %cst_61 = arith.constant dense<0.000000e+00> : vector<8x32xf32>
    %84 = tpu.matmul %82, %83, %cst_61 {dimension_numbers = #tpu.dot_dimension_numbers<[1], [0], [0], [1], [0, 0, 1, 1], [], []>} : vector<8x8xf32>, vector<8x32xf32>, vector<8x32xf32> -> vector<8x32xf32>
    %85 = vector.extract_strided_slice %58 {offsets = [0, 8], sizes = [8, 8], strides = [1, 1]} : vector<8x32xf32> to vector<8x8xf32>
    %86 = vector.extract_strided_slice %61 {offsets = [0, 8], sizes = [8, 8], strides = [1, 1]} : vector<8x32xf32> to vector<8x8xf32>
    %cst_62 = arith.constant dense<0.000000e+00> : vector<8x8xf32>
    %87 = tpu.matmul %85, %86, %cst_62 {dimension_numbers = #tpu.dot_dimension_numbers<[1], [1], [0], [0], [0, 0, 1, 0], [], []>} : vector<8x8xf32>, vector<8x8xf32>, vector<8x8xf32> -> vector<8x8xf32>
    %cst_63 = arith.constant 0.353553385 : f32
    %88 = vector.broadcast %cst_63 : f32 to vector<8x8xf32>
    %89 = arith.mulf %87, %88 : vector<8x8xf32>
    %cst_64 = arith.constant -1.000000e+09 : f32
    %90 = vector.broadcast %cst_64 : f32 to vector<8x8xf32>
    %91 = arith.select %7, %89, %90 : vector<8x8xi1>, vector<8x8xf32>
    %cst_65 = arith.constant dense<0xFF800000> : vector<8xf32>
    %92 = vector.multi_reduction <maximumf>, %91, %cst_65 [1] : vector<8x8xf32> to vector<8xf32>
    %93 = vector.shape_cast %92 : vector<8xf32> to vector<8x1xf32>
    %94 = vector.broadcast %93 : vector<8x1xf32> to vector<8x8xf32>
    %95 = arith.subf %91, %94 : vector<8x8xf32>
    %96 = math.exp %95 : vector<8x8xf32>
    %cst_66 = arith.constant dense<0.000000e+00> : vector<8xf32>
    %97 = vector.multi_reduction <add>, %96, %cst_66 [1] : vector<8x8xf32> to vector<8xf32>
    %98 = vector.shape_cast %97 : vector<8xf32> to vector<8x1xf32>
    %99 = vector.broadcast %98 : vector<8x1xf32> to vector<8x8xf32>
    %100 = arith.divf %96, %99 : vector<8x8xf32>
    %101 = vector.extract_strided_slice %64 {offsets = [0, 8], sizes = [8, 8], strides = [1, 1]} : vector<8x32xf32> to vector<8x8xf32>
    %cst_67 = arith.constant dense<0.000000e+00> : vector<8x8xf32>
    %102 = tpu.matmul %100, %101, %cst_67 {dimension_numbers = #tpu.dot_dimension_numbers<[1], [0], [0], [1], [0, 0, 1, 1], [], []>} : vector<8x8xf32>, vector<8x8xf32>, vector<8x8xf32> -> vector<8x8xf32>
    %103 = vector.extract_strided_slice %53 {offsets = [8, 0], sizes = [8, 32], strides = [1, 1]} : vector<32x32xf32> to vector<8x32xf32>
    %cst_68 = arith.constant dense<0.000000e+00> : vector<8x32xf32>
    %104 = tpu.matmul %102, %103, %cst_68 {dimension_numbers = #tpu.dot_dimension_numbers<[1], [0], [0], [1], [0, 0, 1, 1], [], []>} : vector<8x8xf32>, vector<8x32xf32>, vector<8x32xf32> -> vector<8x32xf32>
    %105 = arith.addf %84, %104 : vector<8x32xf32>
    %106 = vector.extract_strided_slice %58 {offsets = [0, 16], sizes = [8, 8], strides = [1, 1]} : vector<8x32xf32> to vector<8x8xf32>
    %107 = vector.extract_strided_slice %61 {offsets = [0, 16], sizes = [8, 8], strides = [1, 1]} : vector<8x32xf32> to vector<8x8xf32>
    %cst_69 = arith.constant dense<0.000000e+00> : vector<8x8xf32>
    %108 = tpu.matmul %106, %107, %cst_69 {dimension_numbers = #tpu.dot_dimension_numbers<[1], [1], [0], [0], [0, 0, 1, 0], [], []>} : vector<8x8xf32>, vector<8x8xf32>, vector<8x8xf32> -> vector<8x8xf32>
    %cst_70 = arith.constant 0.353553385 : f32
    %109 = vector.broadcast %cst_70 : f32 to vector<8x8xf32>
    %110 = arith.mulf %108, %109 : vector<8x8xf32>
    %cst_71 = arith.constant -1.000000e+09 : f32
    %111 = vector.broadcast %cst_71 : f32 to vector<8x8xf32>
    %112 = arith.select %7, %110, %111 : vector<8x8xi1>, vector<8x8xf32>
    %cst_72 = arith.constant dense<0xFF800000> : vector<8xf32>
    %113 = vector.multi_reduction <maximumf>, %112, %cst_72 [1] : vector<8x8xf32> to vector<8xf32>
    %114 = vector.shape_cast %113 : vector<8xf32> to vector<8x1xf32>
    %115 = vector.broadcast %114 : vector<8x1xf32> to vector<8x8xf32>
    %116 = arith.subf %112, %115 : vector<8x8xf32>
    %117 = math.exp %116 : vector<8x8xf32>
    %cst_73 = arith.constant dense<0.000000e+00> : vector<8xf32>
    %118 = vector.multi_reduction <add>, %117, %cst_73 [1] : vector<8x8xf32> to vector<8xf32>
    %119 = vector.shape_cast %118 : vector<8xf32> to vector<8x1xf32>
    %120 = vector.broadcast %119 : vector<8x1xf32> to vector<8x8xf32>
    %121 = arith.divf %117, %120 : vector<8x8xf32>
    %122 = vector.extract_strided_slice %64 {offsets = [0, 16], sizes = [8, 8], strides = [1, 1]} : vector<8x32xf32> to vector<8x8xf32>
    %cst_74 = arith.constant dense<0.000000e+00> : vector<8x8xf32>
    %123 = tpu.matmul %121, %122, %cst_74 {dimension_numbers = #tpu.dot_dimension_numbers<[1], [0], [0], [1], [0, 0, 1, 1], [], []>} : vector<8x8xf32>, vector<8x8xf32>, vector<8x8xf32> -> vector<8x8xf32>
    %124 = vector.extract_strided_slice %53 {offsets = [16, 0], sizes = [8, 32], strides = [1, 1]} : vector<32x32xf32> to vector<8x32xf32>
    %cst_75 = arith.constant dense<0.000000e+00> : vector<8x32xf32>
    %125 = tpu.matmul %123, %124, %cst_75 {dimension_numbers = #tpu.dot_dimension_numbers<[1], [0], [0], [1], [0, 0, 1, 1], [], []>} : vector<8x8xf32>, vector<8x32xf32>, vector<8x32xf32> -> vector<8x32xf32>
    %126 = arith.addf %105, %125 : vector<8x32xf32>
    %127 = vector.extract_strided_slice %58 {offsets = [0, 24], sizes = [8, 8], strides = [1, 1]} : vector<8x32xf32> to vector<8x8xf32>
    %128 = vector.extract_strided_slice %61 {offsets = [0, 24], sizes = [8, 8], strides = [1, 1]} : vector<8x32xf32> to vector<8x8xf32>
    %cst_76 = arith.constant dense<0.000000e+00> : vector<8x8xf32>
    %129 = tpu.matmul %127, %128, %cst_76 {dimension_numbers = #tpu.dot_dimension_numbers<[1], [1], [0], [0], [0, 0, 1, 0], [], []>} : vector<8x8xf32>, vector<8x8xf32>, vector<8x8xf32> -> vector<8x8xf32>
    %cst_77 = arith.constant 0.353553385 : f32
    %130 = vector.broadcast %cst_77 : f32 to vector<8x8xf32>
    %131 = arith.mulf %129, %130 : vector<8x8xf32>
    %cst_78 = arith.constant -1.000000e+09 : f32
    %132 = vector.broadcast %cst_78 : f32 to vector<8x8xf32>
    %133 = arith.select %7, %131, %132 : vector<8x8xi1>, vector<8x8xf32>
    %cst_79 = arith.constant dense<0xFF800000> : vector<8xf32>
    %134 = vector.multi_reduction <maximumf>, %133, %cst_79 [1] : vector<8x8xf32> to vector<8xf32>
    %135 = vector.shape_cast %134 : vector<8xf32> to vector<8x1xf32>
    %136 = vector.broadcast %135 : vector<8x1xf32> to vector<8x8xf32>
    %137 = arith.subf %133, %136 : vector<8x8xf32>
    %138 = math.exp %137 : vector<8x8xf32>
    %cst_80 = arith.constant dense<0.000000e+00> : vector<8xf32>
    %139 = vector.multi_reduction <add>, %138, %cst_80 [1] : vector<8x8xf32> to vector<8xf32>
    %140 = vector.shape_cast %139 : vector<8xf32> to vector<8x1xf32>
    %141 = vector.broadcast %140 : vector<8x1xf32> to vector<8x8xf32>
    %142 = arith.divf %138, %141 : vector<8x8xf32>
    %143 = vector.extract_strided_slice %64 {offsets = [0, 24], sizes = [8, 8], strides = [1, 1]} : vector<8x32xf32> to vector<8x8xf32>
    %cst_81 = arith.constant dense<0.000000e+00> : vector<8x8xf32>
    %144 = tpu.matmul %142, %143, %cst_81 {dimension_numbers = #tpu.dot_dimension_numbers<[1], [0], [0], [1], [0, 0, 1, 1], [], []>} : vector<8x8xf32>, vector<8x8xf32>, vector<8x8xf32> -> vector<8x8xf32>
    %145 = vector.extract_strided_slice %53 {offsets = [24, 0], sizes = [8, 32], strides = [1, 1]} : vector<32x32xf32> to vector<8x32xf32>
    %cst_82 = arith.constant dense<0.000000e+00> : vector<8x32xf32>
    %146 = tpu.matmul %144, %145, %cst_82 {dimension_numbers = #tpu.dot_dimension_numbers<[1], [0], [0], [1], [0, 0, 1, 1], [], []>} : vector<8x8xf32>, vector<8x32xf32>, vector<8x32xf32> -> vector<8x32xf32>
    %147 = arith.addf %126, %146 : vector<8x32xf32>
    %148 = vector.broadcast %55 : vector<1x32xf32> to vector<8x32xf32>
    %149 = arith.addf %147, %148 : vector<8x32xf32>
    %150 = arith.addf %1, %149 : vector<8x32xf32>
    %c1_83 = arith.constant 1 : index
    %c0_84 = arith.constant 0 : index
    %c0_85 = arith.constant 0 : index
    %151 = vector.load %arg11[%c1_83, %c0_84, %c0_85] : memref<7x1x32xf32, #tpu.memory_space<vmem>>, vector<1x1x32xf32>
    %152 = vector.shape_cast %151 : vector<1x1x32xf32> to vector<1x32xf32>
    %c1_86 = arith.constant 1 : index
    %c0_87 = arith.constant 0 : index
    %c0_88 = arith.constant 0 : index
    %153 = vector.load %arg12[%c1_86, %c0_87, %c0_88] : memref<7x1x32xf32, #tpu.memory_space<vmem>>, vector<1x1x32xf32>
    %154 = vector.shape_cast %153 : vector<1x1x32xf32> to vector<1x32xf32>
    %cst_89 = arith.constant dense<0.000000e+00> : vector<8xf32>
    %155 = vector.multi_reduction <add>, %150, %cst_89 [1] : vector<8x32xf32> to vector<8xf32>
    %156 = vector.shape_cast %155 : vector<8xf32> to vector<8x1xf32>
    %cst_90 = arith.constant 3.200000e+01 : f32
    %157 = vector.broadcast %cst_90 : f32 to vector<8x1xf32>
    %158 = arith.divf %156, %157 : vector<8x1xf32>
    %159 = vector.broadcast %158 : vector<8x1xf32> to vector<8x32xf32>
    %160 = arith.subf %150, %159 : vector<8x32xf32>
    %161 = arith.mulf %160, %160 : vector<8x32xf32>
    %cst_91 = arith.constant dense<0.000000e+00> : vector<8xf32>
    %162 = vector.multi_reduction <add>, %161, %cst_91 [1] : vector<8x32xf32> to vector<8xf32>
    %163 = vector.shape_cast %162 : vector<8xf32> to vector<8x1xf32>
    %cst_92 = arith.constant 3.200000e+01 : f32
    %164 = vector.broadcast %cst_92 : f32 to vector<8x1xf32>
    %165 = arith.divf %163, %164 : vector<8x1xf32>
    %166 = vector.broadcast %158 : vector<8x1xf32> to vector<8x32xf32>
    %167 = arith.subf %150, %166 : vector<8x32xf32>
    %cst_93 = arith.constant 9.99999974E-6 : f32
    %168 = vector.broadcast %cst_93 : f32 to vector<8x1xf32>
    %169 = arith.addf %165, %168 : vector<8x1xf32>
    %170 = math.rsqrt %169 : vector<8x1xf32>
    %171 = vector.broadcast %170 : vector<8x1xf32> to vector<8x32xf32>
    %172 = arith.mulf %167, %171 : vector<8x32xf32>
    %173 = vector.broadcast %152 : vector<1x32xf32> to vector<8x32xf32>
    %174 = arith.mulf %172, %173 : vector<8x32xf32>
    %175 = vector.broadcast %154 : vector<1x32xf32> to vector<8x32xf32>
    %176 = arith.addf %174, %175 : vector<8x32xf32>
    %c0_94 = arith.constant 0 : index
    %c4 = arith.constant 4 : index
    %c0_95 = arith.constant 0 : index
    %c0_96 = arith.constant 0 : index
    %177 = vector.load %arg5[%c0_94, %c4, %c0_95, %c0_96] : memref<2x8x32x32xf32, #tpu.memory_space<vmem>>, vector<1x1x32x32xf32>
    %178 = vector.shape_cast %177 : vector<1x1x32x32xf32> to vector<32x32xf32>
    %c0_97 = arith.constant 0 : index
    %c4_98 = arith.constant 4 : index
    %c0_99 = arith.constant 0 : index
    %c0_100 = arith.constant 0 : index
    %179 = vector.load %arg6[%c0_97, %c4_98, %c0_99, %c0_100] : memref<2x8x1x32xf32, #tpu.memory_space<vmem>>, vector<1x1x1x32xf32>
    %180 = vector.shape_cast %179 : vector<1x1x1x32xf32> to vector<1x32xf32>
    %c0_101 = arith.constant 0 : index
    %c5 = arith.constant 5 : index
    %c0_102 = arith.constant 0 : index
    %c0_103 = arith.constant 0 : index
    %181 = vector.load %arg5[%c0_101, %c5, %c0_102, %c0_103] : memref<2x8x32x32xf32, #tpu.memory_space<vmem>>, vector<1x1x32x32xf32>
    %182 = vector.shape_cast %181 : vector<1x1x32x32xf32> to vector<32x32xf32>
    %c0_104 = arith.constant 0 : index
    %c5_105 = arith.constant 5 : index
    %c0_106 = arith.constant 0 : index
    %c0_107 = arith.constant 0 : index
    %183 = vector.load %arg6[%c0_104, %c5_105, %c0_106, %c0_107] : memref<2x8x1x32xf32, #tpu.memory_space<vmem>>, vector<1x1x1x32xf32>
    %184 = vector.shape_cast %183 : vector<1x1x1x32xf32> to vector<1x32xf32>
    %c0_108 = arith.constant 0 : index
    %c6 = arith.constant 6 : index
    %c0_109 = arith.constant 0 : index
    %c0_110 = arith.constant 0 : index
    %185 = vector.load %arg5[%c0_108, %c6, %c0_109, %c0_110] : memref<2x8x32x32xf32, #tpu.memory_space<vmem>>, vector<1x1x32x32xf32>
    %186 = vector.shape_cast %185 : vector<1x1x32x32xf32> to vector<32x32xf32>
    %c0_111 = arith.constant 0 : index
    %c6_112 = arith.constant 6 : index
    %c0_113 = arith.constant 0 : index
    %c0_114 = arith.constant 0 : index
    %187 = vector.load %arg6[%c0_111, %c6_112, %c0_113, %c0_114] : memref<2x8x1x32xf32, #tpu.memory_space<vmem>>, vector<1x1x1x32xf32>
    %188 = vector.shape_cast %187 : vector<1x1x1x32xf32> to vector<1x32xf32>
    %c0_115 = arith.constant 0 : index
    %c7 = arith.constant 7 : index
    %c0_116 = arith.constant 0 : index
    %c0_117 = arith.constant 0 : index
    %189 = vector.load %arg5[%c0_115, %c7, %c0_116, %c0_117] : memref<2x8x32x32xf32, #tpu.memory_space<vmem>>, vector<1x1x32x32xf32>
    %190 = vector.shape_cast %189 : vector<1x1x32x32xf32> to vector<32x32xf32>
    %c0_118 = arith.constant 0 : index
    %c7_119 = arith.constant 7 : index
    %c0_120 = arith.constant 0 : index
    %c0_121 = arith.constant 0 : index
    %191 = vector.load %arg6[%c0_118, %c7_119, %c0_120, %c0_121] : memref<2x8x1x32xf32, #tpu.memory_space<vmem>>, vector<1x1x1x32xf32>
    %192 = vector.shape_cast %191 : vector<1x1x1x32xf32> to vector<1x32xf32>
    %cst_122 = arith.constant dense<0.000000e+00> : vector<8x32xf32>
    %193 = tpu.matmul %176, %178, %cst_122 {dimension_numbers = #tpu.dot_dimension_numbers<[1], [0], [0], [1], [0, 0, 1, 1], [], []>} : vector<8x32xf32>, vector<32x32xf32>, vector<8x32xf32> -> vector<8x32xf32>
    %194 = vector.broadcast %180 : vector<1x32xf32> to vector<8x32xf32>
    %195 = arith.addf %193, %194 : vector<8x32xf32>
    %cst_123 = arith.constant dense<0.000000e+00> : vector<16x32xf32>
    %196 = tpu.matmul %3, %182, %cst_123 {dimension_numbers = #tpu.dot_dimension_numbers<[1], [0], [0], [1], [0, 0, 1, 1], [], []>} : vector<16x32xf32>, vector<32x32xf32>, vector<16x32xf32> -> vector<16x32xf32>
    %197 = vector.broadcast %184 : vector<1x32xf32> to vector<16x32xf32>
    %198 = arith.addf %196, %197 : vector<16x32xf32>
    %cst_124 = arith.constant dense<0.000000e+00> : vector<16x32xf32>
    %199 = tpu.matmul %3, %186, %cst_124 {dimension_numbers = #tpu.dot_dimension_numbers<[1], [0], [0], [1], [0, 0, 1, 1], [], []>} : vector<16x32xf32>, vector<32x32xf32>, vector<16x32xf32> -> vector<16x32xf32>
    %200 = vector.broadcast %188 : vector<1x32xf32> to vector<16x32xf32>
    %201 = arith.addf %199, %200 : vector<16x32xf32>
    %202 = vector.extract_strided_slice %195 {offsets = [0, 0], sizes = [8, 8], strides = [1, 1]} : vector<8x32xf32> to vector<8x8xf32>
    %203 = vector.extract_strided_slice %198 {offsets = [0, 0], sizes = [16, 8], strides = [1, 1]} : vector<16x32xf32> to vector<16x8xf32>
    %cst_125 = arith.constant dense<0.000000e+00> : vector<8x16xf32>
    %204 = tpu.matmul %202, %203, %cst_125 {dimension_numbers = #tpu.dot_dimension_numbers<[1], [1], [0], [0], [0, 0, 1, 0], [], []>} : vector<8x8xf32>, vector<16x8xf32>, vector<8x16xf32> -> vector<8x16xf32>
    %cst_126 = arith.constant 0.353553385 : f32
    %205 = vector.broadcast %cst_126 : f32 to vector<8x16xf32>
    %206 = arith.mulf %204, %205 : vector<8x16xf32>
    %cst_127 = arith.constant -1.000000e+09 : f32
    %207 = vector.broadcast %cst_127 : f32 to vector<8x16xf32>
    %208 = arith.select %13, %206, %207 : vector<8x16xi1>, vector<8x16xf32>
    %cst_128 = arith.constant dense<0xFF800000> : vector<8xf32>
    %209 = vector.multi_reduction <maximumf>, %208, %cst_128 [1] : vector<8x16xf32> to vector<8xf32>
    %210 = vector.shape_cast %209 : vector<8xf32> to vector<8x1xf32>
    %211 = vector.broadcast %210 : vector<8x1xf32> to vector<8x16xf32>
    %212 = arith.subf %208, %211 : vector<8x16xf32>
    %213 = math.exp %212 : vector<8x16xf32>
    %cst_129 = arith.constant dense<0.000000e+00> : vector<8xf32>
    %214 = vector.multi_reduction <add>, %213, %cst_129 [1] : vector<8x16xf32> to vector<8xf32>
    %215 = vector.shape_cast %214 : vector<8xf32> to vector<8x1xf32>
    %216 = vector.broadcast %215 : vector<8x1xf32> to vector<8x16xf32>
    %217 = arith.divf %213, %216 : vector<8x16xf32>
    %218 = vector.extract_strided_slice %201 {offsets = [0, 0], sizes = [16, 8], strides = [1, 1]} : vector<16x32xf32> to vector<16x8xf32>
    %cst_130 = arith.constant dense<0.000000e+00> : vector<8x8xf32>
    %219 = tpu.matmul %217, %218, %cst_130 {dimension_numbers = #tpu.dot_dimension_numbers<[1], [0], [0], [1], [0, 0, 1, 1], [], []>} : vector<8x16xf32>, vector<16x8xf32>, vector<8x8xf32> -> vector<8x8xf32>
    %220 = vector.extract_strided_slice %190 {offsets = [0, 0], sizes = [8, 32], strides = [1, 1]} : vector<32x32xf32> to vector<8x32xf32>
    %cst_131 = arith.constant dense<0.000000e+00> : vector<8x32xf32>
    %221 = tpu.matmul %219, %220, %cst_131 {dimension_numbers = #tpu.dot_dimension_numbers<[1], [0], [0], [1], [0, 0, 1, 1], [], []>} : vector<8x8xf32>, vector<8x32xf32>, vector<8x32xf32> -> vector<8x32xf32>
    %222 = vector.extract_strided_slice %195 {offsets = [0, 8], sizes = [8, 8], strides = [1, 1]} : vector<8x32xf32> to vector<8x8xf32>
    %223 = vector.extract_strided_slice %198 {offsets = [0, 8], sizes = [16, 8], strides = [1, 1]} : vector<16x32xf32> to vector<16x8xf32>
    %cst_132 = arith.constant dense<0.000000e+00> : vector<8x16xf32>
    %224 = tpu.matmul %222, %223, %cst_132 {dimension_numbers = #tpu.dot_dimension_numbers<[1], [1], [0], [0], [0, 0, 1, 0], [], []>} : vector<8x8xf32>, vector<16x8xf32>, vector<8x16xf32> -> vector<8x16xf32>
    %cst_133 = arith.constant 0.353553385 : f32
    %225 = vector.broadcast %cst_133 : f32 to vector<8x16xf32>
    %226 = arith.mulf %224, %225 : vector<8x16xf32>
    %cst_134 = arith.constant -1.000000e+09 : f32
    %227 = vector.broadcast %cst_134 : f32 to vector<8x16xf32>
    %228 = arith.select %13, %226, %227 : vector<8x16xi1>, vector<8x16xf32>
    %cst_135 = arith.constant dense<0xFF800000> : vector<8xf32>
    %229 = vector.multi_reduction <maximumf>, %228, %cst_135 [1] : vector<8x16xf32> to vector<8xf32>
    %230 = vector.shape_cast %229 : vector<8xf32> to vector<8x1xf32>
    %231 = vector.broadcast %230 : vector<8x1xf32> to vector<8x16xf32>
    %232 = arith.subf %228, %231 : vector<8x16xf32>
    %233 = math.exp %232 : vector<8x16xf32>
    %cst_136 = arith.constant dense<0.000000e+00> : vector<8xf32>
    %234 = vector.multi_reduction <add>, %233, %cst_136 [1] : vector<8x16xf32> to vector<8xf32>
    %235 = vector.shape_cast %234 : vector<8xf32> to vector<8x1xf32>
    %236 = vector.broadcast %235 : vector<8x1xf32> to vector<8x16xf32>
    %237 = arith.divf %233, %236 : vector<8x16xf32>
    %238 = vector.extract_strided_slice %201 {offsets = [0, 8], sizes = [16, 8], strides = [1, 1]} : vector<16x32xf32> to vector<16x8xf32>
    %cst_137 = arith.constant dense<0.000000e+00> : vector<8x8xf32>
    %239 = tpu.matmul %237, %238, %cst_137 {dimension_numbers = #tpu.dot_dimension_numbers<[1], [0], [0], [1], [0, 0, 1, 1], [], []>} : vector<8x16xf32>, vector<16x8xf32>, vector<8x8xf32> -> vector<8x8xf32>
    %240 = vector.extract_strided_slice %190 {offsets = [8, 0], sizes = [8, 32], strides = [1, 1]} : vector<32x32xf32> to vector<8x32xf32>
    %cst_138 = arith.constant dense<0.000000e+00> : vector<8x32xf32>
    %241 = tpu.matmul %239, %240, %cst_138 {dimension_numbers = #tpu.dot_dimension_numbers<[1], [0], [0], [1], [0, 0, 1, 1], [], []>} : vector<8x8xf32>, vector<8x32xf32>, vector<8x32xf32> -> vector<8x32xf32>
    %242 = arith.addf %221, %241 : vector<8x32xf32>
    %243 = vector.extract_strided_slice %195 {offsets = [0, 16], sizes = [8, 8], strides = [1, 1]} : vector<8x32xf32> to vector<8x8xf32>
    %244 = vector.extract_strided_slice %198 {offsets = [0, 16], sizes = [16, 8], strides = [1, 1]} : vector<16x32xf32> to vector<16x8xf32>
    %cst_139 = arith.constant dense<0.000000e+00> : vector<8x16xf32>
    %245 = tpu.matmul %243, %244, %cst_139 {dimension_numbers = #tpu.dot_dimension_numbers<[1], [1], [0], [0], [0, 0, 1, 0], [], []>} : vector<8x8xf32>, vector<16x8xf32>, vector<8x16xf32> -> vector<8x16xf32>
    %cst_140 = arith.constant 0.353553385 : f32
    %246 = vector.broadcast %cst_140 : f32 to vector<8x16xf32>
    %247 = arith.mulf %245, %246 : vector<8x16xf32>
    %cst_141 = arith.constant -1.000000e+09 : f32
    %248 = vector.broadcast %cst_141 : f32 to vector<8x16xf32>
    %249 = arith.select %13, %247, %248 : vector<8x16xi1>, vector<8x16xf32>
    %cst_142 = arith.constant dense<0xFF800000> : vector<8xf32>
    %250 = vector.multi_reduction <maximumf>, %249, %cst_142 [1] : vector<8x16xf32> to vector<8xf32>
    %251 = vector.shape_cast %250 : vector<8xf32> to vector<8x1xf32>
    %252 = vector.broadcast %251 : vector<8x1xf32> to vector<8x16xf32>
    %253 = arith.subf %249, %252 : vector<8x16xf32>
    %254 = math.exp %253 : vector<8x16xf32>
    %cst_143 = arith.constant dense<0.000000e+00> : vector<8xf32>
    %255 = vector.multi_reduction <add>, %254, %cst_143 [1] : vector<8x16xf32> to vector<8xf32>
    %256 = vector.shape_cast %255 : vector<8xf32> to vector<8x1xf32>
    %257 = vector.broadcast %256 : vector<8x1xf32> to vector<8x16xf32>
    %258 = arith.divf %254, %257 : vector<8x16xf32>
    %259 = vector.extract_strided_slice %201 {offsets = [0, 16], sizes = [16, 8], strides = [1, 1]} : vector<16x32xf32> to vector<16x8xf32>
    %cst_144 = arith.constant dense<0.000000e+00> : vector<8x8xf32>
    %260 = tpu.matmul %258, %259, %cst_144 {dimension_numbers = #tpu.dot_dimension_numbers<[1], [0], [0], [1], [0, 0, 1, 1], [], []>} : vector<8x16xf32>, vector<16x8xf32>, vector<8x8xf32> -> vector<8x8xf32>
    %261 = vector.extract_strided_slice %190 {offsets = [16, 0], sizes = [8, 32], strides = [1, 1]} : vector<32x32xf32> to vector<8x32xf32>
    %cst_145 = arith.constant dense<0.000000e+00> : vector<8x32xf32>
    %262 = tpu.matmul %260, %261, %cst_145 {dimension_numbers = #tpu.dot_dimension_numbers<[1], [0], [0], [1], [0, 0, 1, 1], [], []>} : vector<8x8xf32>, vector<8x32xf32>, vector<8x32xf32> -> vector<8x32xf32>
    %263 = arith.addf %242, %262 : vector<8x32xf32>
    %264 = vector.extract_strided_slice %195 {offsets = [0, 24], sizes = [8, 8], strides = [1, 1]} : vector<8x32xf32> to vector<8x8xf32>
    %265 = vector.extract_strided_slice %198 {offsets = [0, 24], sizes = [16, 8], strides = [1, 1]} : vector<16x32xf32> to vector<16x8xf32>
    %cst_146 = arith.constant dense<0.000000e+00> : vector<8x16xf32>
    %266 = tpu.matmul %264, %265, %cst_146 {dimension_numbers = #tpu.dot_dimension_numbers<[1], [1], [0], [0], [0, 0, 1, 0], [], []>} : vector<8x8xf32>, vector<16x8xf32>, vector<8x16xf32> -> vector<8x16xf32>
    %cst_147 = arith.constant 0.353553385 : f32
    %267 = vector.broadcast %cst_147 : f32 to vector<8x16xf32>
    %268 = arith.mulf %266, %267 : vector<8x16xf32>
    %cst_148 = arith.constant -1.000000e+09 : f32
    %269 = vector.broadcast %cst_148 : f32 to vector<8x16xf32>
    %270 = arith.select %13, %268, %269 : vector<8x16xi1>, vector<8x16xf32>
    %cst_149 = arith.constant dense<0xFF800000> : vector<8xf32>
    %271 = vector.multi_reduction <maximumf>, %270, %cst_149 [1] : vector<8x16xf32> to vector<8xf32>
    %272 = vector.shape_cast %271 : vector<8xf32> to vector<8x1xf32>
    %273 = vector.broadcast %272 : vector<8x1xf32> to vector<8x16xf32>
    %274 = arith.subf %270, %273 : vector<8x16xf32>
    %275 = math.exp %274 : vector<8x16xf32>
    %cst_150 = arith.constant dense<0.000000e+00> : vector<8xf32>
    %276 = vector.multi_reduction <add>, %275, %cst_150 [1] : vector<8x16xf32> to vector<8xf32>
    %277 = vector.shape_cast %276 : vector<8xf32> to vector<8x1xf32>
    %278 = vector.broadcast %277 : vector<8x1xf32> to vector<8x16xf32>
    %279 = arith.divf %275, %278 : vector<8x16xf32>
    %280 = vector.extract_strided_slice %201 {offsets = [0, 24], sizes = [16, 8], strides = [1, 1]} : vector<16x32xf32> to vector<16x8xf32>
    %cst_151 = arith.constant dense<0.000000e+00> : vector<8x8xf32>
    %281 = tpu.matmul %279, %280, %cst_151 {dimension_numbers = #tpu.dot_dimension_numbers<[1], [0], [0], [1], [0, 0, 1, 1], [], []>} : vector<8x16xf32>, vector<16x8xf32>, vector<8x8xf32> -> vector<8x8xf32>
    %282 = vector.extract_strided_slice %190 {offsets = [24, 0], sizes = [8, 32], strides = [1, 1]} : vector<32x32xf32> to vector<8x32xf32>
    %cst_152 = arith.constant dense<0.000000e+00> : vector<8x32xf32>
    %283 = tpu.matmul %281, %282, %cst_152 {dimension_numbers = #tpu.dot_dimension_numbers<[1], [0], [0], [1], [0, 0, 1, 1], [], []>} : vector<8x8xf32>, vector<8x32xf32>, vector<8x32xf32> -> vector<8x32xf32>
    %284 = arith.addf %263, %283 : vector<8x32xf32>
    %285 = vector.broadcast %192 : vector<1x32xf32> to vector<8x32xf32>
    %286 = arith.addf %284, %285 : vector<8x32xf32>
    %287 = arith.addf %150, %286 : vector<8x32xf32>
    %c2_153 = arith.constant 2 : index
    %c0_154 = arith.constant 0 : index
    %c0_155 = arith.constant 0 : index
    %288 = vector.load %arg11[%c2_153, %c0_154, %c0_155] : memref<7x1x32xf32, #tpu.memory_space<vmem>>, vector<1x1x32xf32>
    %289 = vector.shape_cast %288 : vector<1x1x32xf32> to vector<1x32xf32>
    %c2_156 = arith.constant 2 : index
    %c0_157 = arith.constant 0 : index
    %c0_158 = arith.constant 0 : index
    %290 = vector.load %arg12[%c2_156, %c0_157, %c0_158] : memref<7x1x32xf32, #tpu.memory_space<vmem>>, vector<1x1x32xf32>
    %291 = vector.shape_cast %290 : vector<1x1x32xf32> to vector<1x32xf32>
    %cst_159 = arith.constant dense<0.000000e+00> : vector<8xf32>
    %292 = vector.multi_reduction <add>, %287, %cst_159 [1] : vector<8x32xf32> to vector<8xf32>
    %293 = vector.shape_cast %292 : vector<8xf32> to vector<8x1xf32>
    %cst_160 = arith.constant 3.200000e+01 : f32
    %294 = vector.broadcast %cst_160 : f32 to vector<8x1xf32>
    %295 = arith.divf %293, %294 : vector<8x1xf32>
    %296 = vector.broadcast %295 : vector<8x1xf32> to vector<8x32xf32>
    %297 = arith.subf %287, %296 : vector<8x32xf32>
    %298 = arith.mulf %297, %297 : vector<8x32xf32>
    %cst_161 = arith.constant dense<0.000000e+00> : vector<8xf32>
    %299 = vector.multi_reduction <add>, %298, %cst_161 [1] : vector<8x32xf32> to vector<8xf32>
    %300 = vector.shape_cast %299 : vector<8xf32> to vector<8x1xf32>
    %cst_162 = arith.constant 3.200000e+01 : f32
    %301 = vector.broadcast %cst_162 : f32 to vector<8x1xf32>
    %302 = arith.divf %300, %301 : vector<8x1xf32>
    %303 = vector.broadcast %295 : vector<8x1xf32> to vector<8x32xf32>
    %304 = arith.subf %287, %303 : vector<8x32xf32>
    %cst_163 = arith.constant 9.99999974E-6 : f32
    %305 = vector.broadcast %cst_163 : f32 to vector<8x1xf32>
    %306 = arith.addf %302, %305 : vector<8x1xf32>
    %307 = math.rsqrt %306 : vector<8x1xf32>
    %308 = vector.broadcast %307 : vector<8x1xf32> to vector<8x32xf32>
    %309 = arith.mulf %304, %308 : vector<8x32xf32>
    %310 = vector.broadcast %289 : vector<1x32xf32> to vector<8x32xf32>
    %311 = arith.mulf %309, %310 : vector<8x32xf32>
    %312 = vector.broadcast %291 : vector<1x32xf32> to vector<8x32xf32>
    %313 = arith.addf %311, %312 : vector<8x32xf32>
    %c0_164 = arith.constant 0 : index
    %c0_165 = arith.constant 0 : index
    %c0_166 = arith.constant 0 : index
    %314 = vector.load %arg7[%c0_164, %c0_165, %c0_166] : memref<2x32x64xf32, #tpu.memory_space<vmem>>, vector<1x32x64xf32>
    %315 = vector.shape_cast %314 : vector<1x32x64xf32> to vector<32x64xf32>
    %cst_167 = arith.constant dense<0.000000e+00> : vector<8x64xf32>
    %316 = tpu.matmul %313, %315, %cst_167 {dimension_numbers = #tpu.dot_dimension_numbers<[1], [0], [0], [1], [0, 0, 1, 1], [], []>} : vector<8x32xf32>, vector<32x64xf32>, vector<8x64xf32> -> vector<8x64xf32>
    %c0_168 = arith.constant 0 : index
    %c0_169 = arith.constant 0 : index
    %c0_170 = arith.constant 0 : index
    %317 = vector.load %arg8[%c0_168, %c0_169, %c0_170] : memref<2x1x64xf32, #tpu.memory_space<vmem>>, vector<1x1x64xf32>
    %318 = vector.shape_cast %317 : vector<1x1x64xf32> to vector<1x64xf32>
    %319 = vector.broadcast %318 : vector<1x64xf32> to vector<8x64xf32>
    %320 = arith.addf %316, %319 : vector<8x64xf32>
    %cst_171 = arith.constant 0.000000e+00 : f32
    %321 = vector.broadcast %cst_171 : f32 to vector<8x64xf32>
    %322 = arith.maximumf %320, %321 : vector<8x64xf32>
    %c0_172 = arith.constant 0 : index
    %c0_173 = arith.constant 0 : index
    %c0_174 = arith.constant 0 : index
    %323 = vector.load %arg9[%c0_172, %c0_173, %c0_174] : memref<2x64x32xf32, #tpu.memory_space<vmem>>, vector<1x64x32xf32>
    %324 = vector.shape_cast %323 : vector<1x64x32xf32> to vector<64x32xf32>
    %cst_175 = arith.constant dense<0.000000e+00> : vector<8x32xf32>
    %325 = tpu.matmul %322, %324, %cst_175 {dimension_numbers = #tpu.dot_dimension_numbers<[1], [0], [0], [1], [0, 0, 1, 1], [], []>} : vector<8x64xf32>, vector<64x32xf32>, vector<8x32xf32> -> vector<8x32xf32>
    %c0_176 = arith.constant 0 : index
    %c0_177 = arith.constant 0 : index
    %c0_178 = arith.constant 0 : index
    %326 = vector.load %arg10[%c0_176, %c0_177, %c0_178] : memref<2x1x32xf32, #tpu.memory_space<vmem>>, vector<1x1x32xf32>
    %327 = vector.shape_cast %326 : vector<1x1x32xf32> to vector<1x32xf32>
    %328 = vector.broadcast %327 : vector<1x32xf32> to vector<8x32xf32>
    %329 = arith.addf %325, %328 : vector<8x32xf32>
    %330 = arith.addf %287, %329 : vector<8x32xf32>
    %c3_179 = arith.constant 3 : index
    %c0_180 = arith.constant 0 : index
    %c0_181 = arith.constant 0 : index
    %331 = vector.load %arg11[%c3_179, %c0_180, %c0_181] : memref<7x1x32xf32, #tpu.memory_space<vmem>>, vector<1x1x32xf32>
    %332 = vector.shape_cast %331 : vector<1x1x32xf32> to vector<1x32xf32>
    %c3_182 = arith.constant 3 : index
    %c0_183 = arith.constant 0 : index
    %c0_184 = arith.constant 0 : index
    %333 = vector.load %arg12[%c3_182, %c0_183, %c0_184] : memref<7x1x32xf32, #tpu.memory_space<vmem>>, vector<1x1x32xf32>
    %334 = vector.shape_cast %333 : vector<1x1x32xf32> to vector<1x32xf32>
    %cst_185 = arith.constant dense<0.000000e+00> : vector<8xf32>
    %335 = vector.multi_reduction <add>, %330, %cst_185 [1] : vector<8x32xf32> to vector<8xf32>
    %336 = vector.shape_cast %335 : vector<8xf32> to vector<8x1xf32>
    %cst_186 = arith.constant 3.200000e+01 : f32
    %337 = vector.broadcast %cst_186 : f32 to vector<8x1xf32>
    %338 = arith.divf %336, %337 : vector<8x1xf32>
    %339 = vector.broadcast %338 : vector<8x1xf32> to vector<8x32xf32>
    %340 = arith.subf %330, %339 : vector<8x32xf32>
    %341 = arith.mulf %340, %340 : vector<8x32xf32>
    %cst_187 = arith.constant dense<0.000000e+00> : vector<8xf32>
    %342 = vector.multi_reduction <add>, %341, %cst_187 [1] : vector<8x32xf32> to vector<8xf32>
    %343 = vector.shape_cast %342 : vector<8xf32> to vector<8x1xf32>
    %cst_188 = arith.constant 3.200000e+01 : f32
    %344 = vector.broadcast %cst_188 : f32 to vector<8x1xf32>
    %345 = arith.divf %343, %344 : vector<8x1xf32>
    %346 = vector.broadcast %338 : vector<8x1xf32> to vector<8x32xf32>
    %347 = arith.subf %330, %346 : vector<8x32xf32>
    %cst_189 = arith.constant 9.99999974E-6 : f32
    %348 = vector.broadcast %cst_189 : f32 to vector<8x1xf32>
    %349 = arith.addf %345, %348 : vector<8x1xf32>
    %350 = math.rsqrt %349 : vector<8x1xf32>
    %351 = vector.broadcast %350 : vector<8x1xf32> to vector<8x32xf32>
    %352 = arith.mulf %347, %351 : vector<8x32xf32>
    %353 = vector.broadcast %332 : vector<1x32xf32> to vector<8x32xf32>
    %354 = arith.mulf %352, %353 : vector<8x32xf32>
    %355 = vector.broadcast %334 : vector<1x32xf32> to vector<8x32xf32>
    %356 = arith.addf %354, %355 : vector<8x32xf32>
    %c1_190 = arith.constant 1 : index
    %c0_191 = arith.constant 0 : index
    %c0_192 = arith.constant 0 : index
    %c0_193 = arith.constant 0 : index
    %357 = vector.load %arg5[%c1_190, %c0_191, %c0_192, %c0_193] : memref<2x8x32x32xf32, #tpu.memory_space<vmem>>, vector<1x1x32x32xf32>
    %358 = vector.shape_cast %357 : vector<1x1x32x32xf32> to vector<32x32xf32>
    %c1_194 = arith.constant 1 : index
    %c0_195 = arith.constant 0 : index
    %c0_196 = arith.constant 0 : index
    %c0_197 = arith.constant 0 : index
    %359 = vector.load %arg6[%c1_194, %c0_195, %c0_196, %c0_197] : memref<2x8x1x32xf32, #tpu.memory_space<vmem>>, vector<1x1x1x32xf32>
    %360 = vector.shape_cast %359 : vector<1x1x1x32xf32> to vector<1x32xf32>
    %c1_198 = arith.constant 1 : index
    %c1_199 = arith.constant 1 : index
    %c0_200 = arith.constant 0 : index
    %c0_201 = arith.constant 0 : index
    %361 = vector.load %arg5[%c1_198, %c1_199, %c0_200, %c0_201] : memref<2x8x32x32xf32, #tpu.memory_space<vmem>>, vector<1x1x32x32xf32>
    %362 = vector.shape_cast %361 : vector<1x1x32x32xf32> to vector<32x32xf32>
    %c1_202 = arith.constant 1 : index
    %c1_203 = arith.constant 1 : index
    %c0_204 = arith.constant 0 : index
    %c0_205 = arith.constant 0 : index
    %363 = vector.load %arg6[%c1_202, %c1_203, %c0_204, %c0_205] : memref<2x8x1x32xf32, #tpu.memory_space<vmem>>, vector<1x1x1x32xf32>
    %364 = vector.shape_cast %363 : vector<1x1x1x32xf32> to vector<1x32xf32>
    %c1_206 = arith.constant 1 : index
    %c2_207 = arith.constant 2 : index
    %c0_208 = arith.constant 0 : index
    %c0_209 = arith.constant 0 : index
    %365 = vector.load %arg5[%c1_206, %c2_207, %c0_208, %c0_209] : memref<2x8x32x32xf32, #tpu.memory_space<vmem>>, vector<1x1x32x32xf32>
    %366 = vector.shape_cast %365 : vector<1x1x32x32xf32> to vector<32x32xf32>
    %c1_210 = arith.constant 1 : index
    %c2_211 = arith.constant 2 : index
    %c0_212 = arith.constant 0 : index
    %c0_213 = arith.constant 0 : index
    %367 = vector.load %arg6[%c1_210, %c2_211, %c0_212, %c0_213] : memref<2x8x1x32xf32, #tpu.memory_space<vmem>>, vector<1x1x1x32xf32>
    %368 = vector.shape_cast %367 : vector<1x1x1x32xf32> to vector<1x32xf32>
    %c1_214 = arith.constant 1 : index
    %c3_215 = arith.constant 3 : index
    %c0_216 = arith.constant 0 : index
    %c0_217 = arith.constant 0 : index
    %369 = vector.load %arg5[%c1_214, %c3_215, %c0_216, %c0_217] : memref<2x8x32x32xf32, #tpu.memory_space<vmem>>, vector<1x1x32x32xf32>
    %370 = vector.shape_cast %369 : vector<1x1x32x32xf32> to vector<32x32xf32>
    %c1_218 = arith.constant 1 : index
    %c3_219 = arith.constant 3 : index
    %c0_220 = arith.constant 0 : index
    %c0_221 = arith.constant 0 : index
    %371 = vector.load %arg6[%c1_218, %c3_219, %c0_220, %c0_221] : memref<2x8x1x32xf32, #tpu.memory_space<vmem>>, vector<1x1x1x32xf32>
    %372 = vector.shape_cast %371 : vector<1x1x1x32xf32> to vector<1x32xf32>
    %cst_222 = arith.constant dense<0.000000e+00> : vector<8x32xf32>
    %373 = tpu.matmul %356, %358, %cst_222 {dimension_numbers = #tpu.dot_dimension_numbers<[1], [0], [0], [1], [0, 0, 1, 1], [], []>} : vector<8x32xf32>, vector<32x32xf32>, vector<8x32xf32> -> vector<8x32xf32>
    %374 = vector.broadcast %360 : vector<1x32xf32> to vector<8x32xf32>
    %375 = arith.addf %373, %374 : vector<8x32xf32>
    %cst_223 = arith.constant dense<0.000000e+00> : vector<8x32xf32>
    %376 = tpu.matmul %356, %362, %cst_223 {dimension_numbers = #tpu.dot_dimension_numbers<[1], [0], [0], [1], [0, 0, 1, 1], [], []>} : vector<8x32xf32>, vector<32x32xf32>, vector<8x32xf32> -> vector<8x32xf32>
    %377 = vector.broadcast %364 : vector<1x32xf32> to vector<8x32xf32>
    %378 = arith.addf %376, %377 : vector<8x32xf32>
    %cst_224 = arith.constant dense<0.000000e+00> : vector<8x32xf32>
    %379 = tpu.matmul %356, %366, %cst_224 {dimension_numbers = #tpu.dot_dimension_numbers<[1], [0], [0], [1], [0, 0, 1, 1], [], []>} : vector<8x32xf32>, vector<32x32xf32>, vector<8x32xf32> -> vector<8x32xf32>
    %380 = vector.broadcast %368 : vector<1x32xf32> to vector<8x32xf32>
    %381 = arith.addf %379, %380 : vector<8x32xf32>
    %382 = vector.extract_strided_slice %375 {offsets = [0, 0], sizes = [8, 8], strides = [1, 1]} : vector<8x32xf32> to vector<8x8xf32>
    %383 = vector.extract_strided_slice %378 {offsets = [0, 0], sizes = [8, 8], strides = [1, 1]} : vector<8x32xf32> to vector<8x8xf32>
    %cst_225 = arith.constant dense<0.000000e+00> : vector<8x8xf32>
    %384 = tpu.matmul %382, %383, %cst_225 {dimension_numbers = #tpu.dot_dimension_numbers<[1], [1], [0], [0], [0, 0, 1, 0], [], []>} : vector<8x8xf32>, vector<8x8xf32>, vector<8x8xf32> -> vector<8x8xf32>
    %cst_226 = arith.constant 0.353553385 : f32
    %385 = vector.broadcast %cst_226 : f32 to vector<8x8xf32>
    %386 = arith.mulf %384, %385 : vector<8x8xf32>
    %cst_227 = arith.constant -1.000000e+09 : f32
    %387 = vector.broadcast %cst_227 : f32 to vector<8x8xf32>
    %388 = arith.select %7, %386, %387 : vector<8x8xi1>, vector<8x8xf32>
    %cst_228 = arith.constant dense<0xFF800000> : vector<8xf32>
    %389 = vector.multi_reduction <maximumf>, %388, %cst_228 [1] : vector<8x8xf32> to vector<8xf32>
    %390 = vector.shape_cast %389 : vector<8xf32> to vector<8x1xf32>
    %391 = vector.broadcast %390 : vector<8x1xf32> to vector<8x8xf32>
    %392 = arith.subf %388, %391 : vector<8x8xf32>
    %393 = math.exp %392 : vector<8x8xf32>
    %cst_229 = arith.constant dense<0.000000e+00> : vector<8xf32>
    %394 = vector.multi_reduction <add>, %393, %cst_229 [1] : vector<8x8xf32> to vector<8xf32>
    %395 = vector.shape_cast %394 : vector<8xf32> to vector<8x1xf32>
    %396 = vector.broadcast %395 : vector<8x1xf32> to vector<8x8xf32>
    %397 = arith.divf %393, %396 : vector<8x8xf32>
    %398 = vector.extract_strided_slice %381 {offsets = [0, 0], sizes = [8, 8], strides = [1, 1]} : vector<8x32xf32> to vector<8x8xf32>
    %cst_230 = arith.constant dense<0.000000e+00> : vector<8x8xf32>
    %399 = tpu.matmul %397, %398, %cst_230 {dimension_numbers = #tpu.dot_dimension_numbers<[1], [0], [0], [1], [0, 0, 1, 1], [], []>} : vector<8x8xf32>, vector<8x8xf32>, vector<8x8xf32> -> vector<8x8xf32>
    %400 = vector.extract_strided_slice %370 {offsets = [0, 0], sizes = [8, 32], strides = [1, 1]} : vector<32x32xf32> to vector<8x32xf32>
    %cst_231 = arith.constant dense<0.000000e+00> : vector<8x32xf32>
    %401 = tpu.matmul %399, %400, %cst_231 {dimension_numbers = #tpu.dot_dimension_numbers<[1], [0], [0], [1], [0, 0, 1, 1], [], []>} : vector<8x8xf32>, vector<8x32xf32>, vector<8x32xf32> -> vector<8x32xf32>
    %402 = vector.extract_strided_slice %375 {offsets = [0, 8], sizes = [8, 8], strides = [1, 1]} : vector<8x32xf32> to vector<8x8xf32>
    %403 = vector.extract_strided_slice %378 {offsets = [0, 8], sizes = [8, 8], strides = [1, 1]} : vector<8x32xf32> to vector<8x8xf32>
    %cst_232 = arith.constant dense<0.000000e+00> : vector<8x8xf32>
    %404 = tpu.matmul %402, %403, %cst_232 {dimension_numbers = #tpu.dot_dimension_numbers<[1], [1], [0], [0], [0, 0, 1, 0], [], []>} : vector<8x8xf32>, vector<8x8xf32>, vector<8x8xf32> -> vector<8x8xf32>
    %cst_233 = arith.constant 0.353553385 : f32
    %405 = vector.broadcast %cst_233 : f32 to vector<8x8xf32>
    %406 = arith.mulf %404, %405 : vector<8x8xf32>
    %cst_234 = arith.constant -1.000000e+09 : f32
    %407 = vector.broadcast %cst_234 : f32 to vector<8x8xf32>
    %408 = arith.select %7, %406, %407 : vector<8x8xi1>, vector<8x8xf32>
    %cst_235 = arith.constant dense<0xFF800000> : vector<8xf32>
    %409 = vector.multi_reduction <maximumf>, %408, %cst_235 [1] : vector<8x8xf32> to vector<8xf32>
    %410 = vector.shape_cast %409 : vector<8xf32> to vector<8x1xf32>
    %411 = vector.broadcast %410 : vector<8x1xf32> to vector<8x8xf32>
    %412 = arith.subf %408, %411 : vector<8x8xf32>
    %413 = math.exp %412 : vector<8x8xf32>
    %cst_236 = arith.constant dense<0.000000e+00> : vector<8xf32>
    %414 = vector.multi_reduction <add>, %413, %cst_236 [1] : vector<8x8xf32> to vector<8xf32>
    %415 = vector.shape_cast %414 : vector<8xf32> to vector<8x1xf32>
    %416 = vector.broadcast %415 : vector<8x1xf32> to vector<8x8xf32>
    %417 = arith.divf %413, %416 : vector<8x8xf32>
    %418 = vector.extract_strided_slice %381 {offsets = [0, 8], sizes = [8, 8], strides = [1, 1]} : vector<8x32xf32> to vector<8x8xf32>
    %cst_237 = arith.constant dense<0.000000e+00> : vector<8x8xf32>
    %419 = tpu.matmul %417, %418, %cst_237 {dimension_numbers = #tpu.dot_dimension_numbers<[1], [0], [0], [1], [0, 0, 1, 1], [], []>} : vector<8x8xf32>, vector<8x8xf32>, vector<8x8xf32> -> vector<8x8xf32>
    %420 = vector.extract_strided_slice %370 {offsets = [8, 0], sizes = [8, 32], strides = [1, 1]} : vector<32x32xf32> to vector<8x32xf32>
    %cst_238 = arith.constant dense<0.000000e+00> : vector<8x32xf32>
    %421 = tpu.matmul %419, %420, %cst_238 {dimension_numbers = #tpu.dot_dimension_numbers<[1], [0], [0], [1], [0, 0, 1, 1], [], []>} : vector<8x8xf32>, vector<8x32xf32>, vector<8x32xf32> -> vector<8x32xf32>
    %422 = arith.addf %401, %421 : vector<8x32xf32>
    %423 = vector.extract_strided_slice %375 {offsets = [0, 16], sizes = [8, 8], strides = [1, 1]} : vector<8x32xf32> to vector<8x8xf32>
    %424 = vector.extract_strided_slice %378 {offsets = [0, 16], sizes = [8, 8], strides = [1, 1]} : vector<8x32xf32> to vector<8x8xf32>
    %cst_239 = arith.constant dense<0.000000e+00> : vector<8x8xf32>
    %425 = tpu.matmul %423, %424, %cst_239 {dimension_numbers = #tpu.dot_dimension_numbers<[1], [1], [0], [0], [0, 0, 1, 0], [], []>} : vector<8x8xf32>, vector<8x8xf32>, vector<8x8xf32> -> vector<8x8xf32>
    %cst_240 = arith.constant 0.353553385 : f32
    %426 = vector.broadcast %cst_240 : f32 to vector<8x8xf32>
    %427 = arith.mulf %425, %426 : vector<8x8xf32>
    %cst_241 = arith.constant -1.000000e+09 : f32
    %428 = vector.broadcast %cst_241 : f32 to vector<8x8xf32>
    %429 = arith.select %7, %427, %428 : vector<8x8xi1>, vector<8x8xf32>
    %cst_242 = arith.constant dense<0xFF800000> : vector<8xf32>
    %430 = vector.multi_reduction <maximumf>, %429, %cst_242 [1] : vector<8x8xf32> to vector<8xf32>
    %431 = vector.shape_cast %430 : vector<8xf32> to vector<8x1xf32>
    %432 = vector.broadcast %431 : vector<8x1xf32> to vector<8x8xf32>
    %433 = arith.subf %429, %432 : vector<8x8xf32>
    %434 = math.exp %433 : vector<8x8xf32>
    %cst_243 = arith.constant dense<0.000000e+00> : vector<8xf32>
    %435 = vector.multi_reduction <add>, %434, %cst_243 [1] : vector<8x8xf32> to vector<8xf32>
    %436 = vector.shape_cast %435 : vector<8xf32> to vector<8x1xf32>
    %437 = vector.broadcast %436 : vector<8x1xf32> to vector<8x8xf32>
    %438 = arith.divf %434, %437 : vector<8x8xf32>
    %439 = vector.extract_strided_slice %381 {offsets = [0, 16], sizes = [8, 8], strides = [1, 1]} : vector<8x32xf32> to vector<8x8xf32>
    %cst_244 = arith.constant dense<0.000000e+00> : vector<8x8xf32>
    %440 = tpu.matmul %438, %439, %cst_244 {dimension_numbers = #tpu.dot_dimension_numbers<[1], [0], [0], [1], [0, 0, 1, 1], [], []>} : vector<8x8xf32>, vector<8x8xf32>, vector<8x8xf32> -> vector<8x8xf32>
    %441 = vector.extract_strided_slice %370 {offsets = [16, 0], sizes = [8, 32], strides = [1, 1]} : vector<32x32xf32> to vector<8x32xf32>
    %cst_245 = arith.constant dense<0.000000e+00> : vector<8x32xf32>
    %442 = tpu.matmul %440, %441, %cst_245 {dimension_numbers = #tpu.dot_dimension_numbers<[1], [0], [0], [1], [0, 0, 1, 1], [], []>} : vector<8x8xf32>, vector<8x32xf32>, vector<8x32xf32> -> vector<8x32xf32>
    %443 = arith.addf %422, %442 : vector<8x32xf32>
    %444 = vector.extract_strided_slice %375 {offsets = [0, 24], sizes = [8, 8], strides = [1, 1]} : vector<8x32xf32> to vector<8x8xf32>
    %445 = vector.extract_strided_slice %378 {offsets = [0, 24], sizes = [8, 8], strides = [1, 1]} : vector<8x32xf32> to vector<8x8xf32>
    %cst_246 = arith.constant dense<0.000000e+00> : vector<8x8xf32>
    %446 = tpu.matmul %444, %445, %cst_246 {dimension_numbers = #tpu.dot_dimension_numbers<[1], [1], [0], [0], [0, 0, 1, 0], [], []>} : vector<8x8xf32>, vector<8x8xf32>, vector<8x8xf32> -> vector<8x8xf32>
    %cst_247 = arith.constant 0.353553385 : f32
    %447 = vector.broadcast %cst_247 : f32 to vector<8x8xf32>
    %448 = arith.mulf %446, %447 : vector<8x8xf32>
    %cst_248 = arith.constant -1.000000e+09 : f32
    %449 = vector.broadcast %cst_248 : f32 to vector<8x8xf32>
    %450 = arith.select %7, %448, %449 : vector<8x8xi1>, vector<8x8xf32>
    %cst_249 = arith.constant dense<0xFF800000> : vector<8xf32>
    %451 = vector.multi_reduction <maximumf>, %450, %cst_249 [1] : vector<8x8xf32> to vector<8xf32>
    %452 = vector.shape_cast %451 : vector<8xf32> to vector<8x1xf32>
    %453 = vector.broadcast %452 : vector<8x1xf32> to vector<8x8xf32>
    %454 = arith.subf %450, %453 : vector<8x8xf32>
    %455 = math.exp %454 : vector<8x8xf32>
    %cst_250 = arith.constant dense<0.000000e+00> : vector<8xf32>
    %456 = vector.multi_reduction <add>, %455, %cst_250 [1] : vector<8x8xf32> to vector<8xf32>
    %457 = vector.shape_cast %456 : vector<8xf32> to vector<8x1xf32>
    %458 = vector.broadcast %457 : vector<8x1xf32> to vector<8x8xf32>
    %459 = arith.divf %455, %458 : vector<8x8xf32>
    %460 = vector.extract_strided_slice %381 {offsets = [0, 24], sizes = [8, 8], strides = [1, 1]} : vector<8x32xf32> to vector<8x8xf32>
    %cst_251 = arith.constant dense<0.000000e+00> : vector<8x8xf32>
    %461 = tpu.matmul %459, %460, %cst_251 {dimension_numbers = #tpu.dot_dimension_numbers<[1], [0], [0], [1], [0, 0, 1, 1], [], []>} : vector<8x8xf32>, vector<8x8xf32>, vector<8x8xf32> -> vector<8x8xf32>
    %462 = vector.extract_strided_slice %370 {offsets = [24, 0], sizes = [8, 32], strides = [1, 1]} : vector<32x32xf32> to vector<8x32xf32>
    %cst_252 = arith.constant dense<0.000000e+00> : vector<8x32xf32>
    %463 = tpu.matmul %461, %462, %cst_252 {dimension_numbers = #tpu.dot_dimension_numbers<[1], [0], [0], [1], [0, 0, 1, 1], [], []>} : vector<8x8xf32>, vector<8x32xf32>, vector<8x32xf32> -> vector<8x32xf32>
    %464 = arith.addf %443, %463 : vector<8x32xf32>
    %465 = vector.broadcast %372 : vector<1x32xf32> to vector<8x32xf32>
    %466 = arith.addf %464, %465 : vector<8x32xf32>
    %467 = arith.addf %330, %466 : vector<8x32xf32>
    %c4_253 = arith.constant 4 : index
    %c0_254 = arith.constant 0 : index
    %c0_255 = arith.constant 0 : index
    %468 = vector.load %arg11[%c4_253, %c0_254, %c0_255] : memref<7x1x32xf32, #tpu.memory_space<vmem>>, vector<1x1x32xf32>
    %469 = vector.shape_cast %468 : vector<1x1x32xf32> to vector<1x32xf32>
    %c4_256 = arith.constant 4 : index
    %c0_257 = arith.constant 0 : index
    %c0_258 = arith.constant 0 : index
    %470 = vector.load %arg12[%c4_256, %c0_257, %c0_258] : memref<7x1x32xf32, #tpu.memory_space<vmem>>, vector<1x1x32xf32>
    %471 = vector.shape_cast %470 : vector<1x1x32xf32> to vector<1x32xf32>
    %cst_259 = arith.constant dense<0.000000e+00> : vector<8xf32>
    %472 = vector.multi_reduction <add>, %467, %cst_259 [1] : vector<8x32xf32> to vector<8xf32>
    %473 = vector.shape_cast %472 : vector<8xf32> to vector<8x1xf32>
    %cst_260 = arith.constant 3.200000e+01 : f32
    %474 = vector.broadcast %cst_260 : f32 to vector<8x1xf32>
    %475 = arith.divf %473, %474 : vector<8x1xf32>
    %476 = vector.broadcast %475 : vector<8x1xf32> to vector<8x32xf32>
    %477 = arith.subf %467, %476 : vector<8x32xf32>
    %478 = arith.mulf %477, %477 : vector<8x32xf32>
    %cst_261 = arith.constant dense<0.000000e+00> : vector<8xf32>
    %479 = vector.multi_reduction <add>, %478, %cst_261 [1] : vector<8x32xf32> to vector<8xf32>
    %480 = vector.shape_cast %479 : vector<8xf32> to vector<8x1xf32>
    %cst_262 = arith.constant 3.200000e+01 : f32
    %481 = vector.broadcast %cst_262 : f32 to vector<8x1xf32>
    %482 = arith.divf %480, %481 : vector<8x1xf32>
    %483 = vector.broadcast %475 : vector<8x1xf32> to vector<8x32xf32>
    %484 = arith.subf %467, %483 : vector<8x32xf32>
    %cst_263 = arith.constant 9.99999974E-6 : f32
    %485 = vector.broadcast %cst_263 : f32 to vector<8x1xf32>
    %486 = arith.addf %482, %485 : vector<8x1xf32>
    %487 = math.rsqrt %486 : vector<8x1xf32>
    %488 = vector.broadcast %487 : vector<8x1xf32> to vector<8x32xf32>
    %489 = arith.mulf %484, %488 : vector<8x32xf32>
    %490 = vector.broadcast %469 : vector<1x32xf32> to vector<8x32xf32>
    %491 = arith.mulf %489, %490 : vector<8x32xf32>
    %492 = vector.broadcast %471 : vector<1x32xf32> to vector<8x32xf32>
    %493 = arith.addf %491, %492 : vector<8x32xf32>
    %c1_264 = arith.constant 1 : index
    %c4_265 = arith.constant 4 : index
    %c0_266 = arith.constant 0 : index
    %c0_267 = arith.constant 0 : index
    %494 = vector.load %arg5[%c1_264, %c4_265, %c0_266, %c0_267] : memref<2x8x32x32xf32, #tpu.memory_space<vmem>>, vector<1x1x32x32xf32>
    %495 = vector.shape_cast %494 : vector<1x1x32x32xf32> to vector<32x32xf32>
    %c1_268 = arith.constant 1 : index
    %c4_269 = arith.constant 4 : index
    %c0_270 = arith.constant 0 : index
    %c0_271 = arith.constant 0 : index
    %496 = vector.load %arg6[%c1_268, %c4_269, %c0_270, %c0_271] : memref<2x8x1x32xf32, #tpu.memory_space<vmem>>, vector<1x1x1x32xf32>
    %497 = vector.shape_cast %496 : vector<1x1x1x32xf32> to vector<1x32xf32>
    %c1_272 = arith.constant 1 : index
    %c5_273 = arith.constant 5 : index
    %c0_274 = arith.constant 0 : index
    %c0_275 = arith.constant 0 : index
    %498 = vector.load %arg5[%c1_272, %c5_273, %c0_274, %c0_275] : memref<2x8x32x32xf32, #tpu.memory_space<vmem>>, vector<1x1x32x32xf32>
    %499 = vector.shape_cast %498 : vector<1x1x32x32xf32> to vector<32x32xf32>
    %c1_276 = arith.constant 1 : index
    %c5_277 = arith.constant 5 : index
    %c0_278 = arith.constant 0 : index
    %c0_279 = arith.constant 0 : index
    %500 = vector.load %arg6[%c1_276, %c5_277, %c0_278, %c0_279] : memref<2x8x1x32xf32, #tpu.memory_space<vmem>>, vector<1x1x1x32xf32>
    %501 = vector.shape_cast %500 : vector<1x1x1x32xf32> to vector<1x32xf32>
    %c1_280 = arith.constant 1 : index
    %c6_281 = arith.constant 6 : index
    %c0_282 = arith.constant 0 : index
    %c0_283 = arith.constant 0 : index
    %502 = vector.load %arg5[%c1_280, %c6_281, %c0_282, %c0_283] : memref<2x8x32x32xf32, #tpu.memory_space<vmem>>, vector<1x1x32x32xf32>
    %503 = vector.shape_cast %502 : vector<1x1x32x32xf32> to vector<32x32xf32>
    %c1_284 = arith.constant 1 : index
    %c6_285 = arith.constant 6 : index
    %c0_286 = arith.constant 0 : index
    %c0_287 = arith.constant 0 : index
    %504 = vector.load %arg6[%c1_284, %c6_285, %c0_286, %c0_287] : memref<2x8x1x32xf32, #tpu.memory_space<vmem>>, vector<1x1x1x32xf32>
    %505 = vector.shape_cast %504 : vector<1x1x1x32xf32> to vector<1x32xf32>
    %c1_288 = arith.constant 1 : index
    %c7_289 = arith.constant 7 : index
    %c0_290 = arith.constant 0 : index
    %c0_291 = arith.constant 0 : index
    %506 = vector.load %arg5[%c1_288, %c7_289, %c0_290, %c0_291] : memref<2x8x32x32xf32, #tpu.memory_space<vmem>>, vector<1x1x32x32xf32>
    %507 = vector.shape_cast %506 : vector<1x1x32x32xf32> to vector<32x32xf32>
    %c1_292 = arith.constant 1 : index
    %c7_293 = arith.constant 7 : index
    %c0_294 = arith.constant 0 : index
    %c0_295 = arith.constant 0 : index
    %508 = vector.load %arg6[%c1_292, %c7_293, %c0_294, %c0_295] : memref<2x8x1x32xf32, #tpu.memory_space<vmem>>, vector<1x1x1x32xf32>
    %509 = vector.shape_cast %508 : vector<1x1x1x32xf32> to vector<1x32xf32>
    %cst_296 = arith.constant dense<0.000000e+00> : vector<8x32xf32>
    %510 = tpu.matmul %493, %495, %cst_296 {dimension_numbers = #tpu.dot_dimension_numbers<[1], [0], [0], [1], [0, 0, 1, 1], [], []>} : vector<8x32xf32>, vector<32x32xf32>, vector<8x32xf32> -> vector<8x32xf32>
    %511 = vector.broadcast %497 : vector<1x32xf32> to vector<8x32xf32>
    %512 = arith.addf %510, %511 : vector<8x32xf32>
    %cst_297 = arith.constant dense<0.000000e+00> : vector<16x32xf32>
    %513 = tpu.matmul %3, %499, %cst_297 {dimension_numbers = #tpu.dot_dimension_numbers<[1], [0], [0], [1], [0, 0, 1, 1], [], []>} : vector<16x32xf32>, vector<32x32xf32>, vector<16x32xf32> -> vector<16x32xf32>
    %514 = vector.broadcast %501 : vector<1x32xf32> to vector<16x32xf32>
    %515 = arith.addf %513, %514 : vector<16x32xf32>
    %cst_298 = arith.constant dense<0.000000e+00> : vector<16x32xf32>
    %516 = tpu.matmul %3, %503, %cst_298 {dimension_numbers = #tpu.dot_dimension_numbers<[1], [0], [0], [1], [0, 0, 1, 1], [], []>} : vector<16x32xf32>, vector<32x32xf32>, vector<16x32xf32> -> vector<16x32xf32>
    %517 = vector.broadcast %505 : vector<1x32xf32> to vector<16x32xf32>
    %518 = arith.addf %516, %517 : vector<16x32xf32>
    %519 = vector.extract_strided_slice %512 {offsets = [0, 0], sizes = [8, 8], strides = [1, 1]} : vector<8x32xf32> to vector<8x8xf32>
    %520 = vector.extract_strided_slice %515 {offsets = [0, 0], sizes = [16, 8], strides = [1, 1]} : vector<16x32xf32> to vector<16x8xf32>
    %cst_299 = arith.constant dense<0.000000e+00> : vector<8x16xf32>
    %521 = tpu.matmul %519, %520, %cst_299 {dimension_numbers = #tpu.dot_dimension_numbers<[1], [1], [0], [0], [0, 0, 1, 0], [], []>} : vector<8x8xf32>, vector<16x8xf32>, vector<8x16xf32> -> vector<8x16xf32>
    %cst_300 = arith.constant 0.353553385 : f32
    %522 = vector.broadcast %cst_300 : f32 to vector<8x16xf32>
    %523 = arith.mulf %521, %522 : vector<8x16xf32>
    %cst_301 = arith.constant -1.000000e+09 : f32
    %524 = vector.broadcast %cst_301 : f32 to vector<8x16xf32>
    %525 = arith.select %13, %523, %524 : vector<8x16xi1>, vector<8x16xf32>
    %cst_302 = arith.constant dense<0xFF800000> : vector<8xf32>
    %526 = vector.multi_reduction <maximumf>, %525, %cst_302 [1] : vector<8x16xf32> to vector<8xf32>
    %527 = vector.shape_cast %526 : vector<8xf32> to vector<8x1xf32>
    %528 = vector.broadcast %527 : vector<8x1xf32> to vector<8x16xf32>
    %529 = arith.subf %525, %528 : vector<8x16xf32>
    %530 = math.exp %529 : vector<8x16xf32>
    %cst_303 = arith.constant dense<0.000000e+00> : vector<8xf32>
    %531 = vector.multi_reduction <add>, %530, %cst_303 [1] : vector<8x16xf32> to vector<8xf32>
    %532 = vector.shape_cast %531 : vector<8xf32> to vector<8x1xf32>
    %533 = vector.broadcast %532 : vector<8x1xf32> to vector<8x16xf32>
    %534 = arith.divf %530, %533 : vector<8x16xf32>
    %535 = vector.extract_strided_slice %518 {offsets = [0, 0], sizes = [16, 8], strides = [1, 1]} : vector<16x32xf32> to vector<16x8xf32>
    %cst_304 = arith.constant dense<0.000000e+00> : vector<8x8xf32>
    %536 = tpu.matmul %534, %535, %cst_304 {dimension_numbers = #tpu.dot_dimension_numbers<[1], [0], [0], [1], [0, 0, 1, 1], [], []>} : vector<8x16xf32>, vector<16x8xf32>, vector<8x8xf32> -> vector<8x8xf32>
    %537 = vector.extract_strided_slice %507 {offsets = [0, 0], sizes = [8, 32], strides = [1, 1]} : vector<32x32xf32> to vector<8x32xf32>
    %cst_305 = arith.constant dense<0.000000e+00> : vector<8x32xf32>
    %538 = tpu.matmul %536, %537, %cst_305 {dimension_numbers = #tpu.dot_dimension_numbers<[1], [0], [0], [1], [0, 0, 1, 1], [], []>} : vector<8x8xf32>, vector<8x32xf32>, vector<8x32xf32> -> vector<8x32xf32>
    %539 = vector.extract_strided_slice %512 {offsets = [0, 8], sizes = [8, 8], strides = [1, 1]} : vector<8x32xf32> to vector<8x8xf32>
    %540 = vector.extract_strided_slice %515 {offsets = [0, 8], sizes = [16, 8], strides = [1, 1]} : vector<16x32xf32> to vector<16x8xf32>
    %cst_306 = arith.constant dense<0.000000e+00> : vector<8x16xf32>
    %541 = tpu.matmul %539, %540, %cst_306 {dimension_numbers = #tpu.dot_dimension_numbers<[1], [1], [0], [0], [0, 0, 1, 0], [], []>} : vector<8x8xf32>, vector<16x8xf32>, vector<8x16xf32> -> vector<8x16xf32>
    %cst_307 = arith.constant 0.353553385 : f32
    %542 = vector.broadcast %cst_307 : f32 to vector<8x16xf32>
    %543 = arith.mulf %541, %542 : vector<8x16xf32>
    %cst_308 = arith.constant -1.000000e+09 : f32
    %544 = vector.broadcast %cst_308 : f32 to vector<8x16xf32>
    %545 = arith.select %13, %543, %544 : vector<8x16xi1>, vector<8x16xf32>
    %cst_309 = arith.constant dense<0xFF800000> : vector<8xf32>
    %546 = vector.multi_reduction <maximumf>, %545, %cst_309 [1] : vector<8x16xf32> to vector<8xf32>
    %547 = vector.shape_cast %546 : vector<8xf32> to vector<8x1xf32>
    %548 = vector.broadcast %547 : vector<8x1xf32> to vector<8x16xf32>
    %549 = arith.subf %545, %548 : vector<8x16xf32>
    %550 = math.exp %549 : vector<8x16xf32>
    %cst_310 = arith.constant dense<0.000000e+00> : vector<8xf32>
    %551 = vector.multi_reduction <add>, %550, %cst_310 [1] : vector<8x16xf32> to vector<8xf32>
    %552 = vector.shape_cast %551 : vector<8xf32> to vector<8x1xf32>
    %553 = vector.broadcast %552 : vector<8x1xf32> to vector<8x16xf32>
    %554 = arith.divf %550, %553 : vector<8x16xf32>
    %555 = vector.extract_strided_slice %518 {offsets = [0, 8], sizes = [16, 8], strides = [1, 1]} : vector<16x32xf32> to vector<16x8xf32>
    %cst_311 = arith.constant dense<0.000000e+00> : vector<8x8xf32>
    %556 = tpu.matmul %554, %555, %cst_311 {dimension_numbers = #tpu.dot_dimension_numbers<[1], [0], [0], [1], [0, 0, 1, 1], [], []>} : vector<8x16xf32>, vector<16x8xf32>, vector<8x8xf32> -> vector<8x8xf32>
    %557 = vector.extract_strided_slice %507 {offsets = [8, 0], sizes = [8, 32], strides = [1, 1]} : vector<32x32xf32> to vector<8x32xf32>
    %cst_312 = arith.constant dense<0.000000e+00> : vector<8x32xf32>
    %558 = tpu.matmul %556, %557, %cst_312 {dimension_numbers = #tpu.dot_dimension_numbers<[1], [0], [0], [1], [0, 0, 1, 1], [], []>} : vector<8x8xf32>, vector<8x32xf32>, vector<8x32xf32> -> vector<8x32xf32>
    %559 = arith.addf %538, %558 : vector<8x32xf32>
    %560 = vector.extract_strided_slice %512 {offsets = [0, 16], sizes = [8, 8], strides = [1, 1]} : vector<8x32xf32> to vector<8x8xf32>
    %561 = vector.extract_strided_slice %515 {offsets = [0, 16], sizes = [16, 8], strides = [1, 1]} : vector<16x32xf32> to vector<16x8xf32>
    %cst_313 = arith.constant dense<0.000000e+00> : vector<8x16xf32>
    %562 = tpu.matmul %560, %561, %cst_313 {dimension_numbers = #tpu.dot_dimension_numbers<[1], [1], [0], [0], [0, 0, 1, 0], [], []>} : vector<8x8xf32>, vector<16x8xf32>, vector<8x16xf32> -> vector<8x16xf32>
    %cst_314 = arith.constant 0.353553385 : f32
    %563 = vector.broadcast %cst_314 : f32 to vector<8x16xf32>
    %564 = arith.mulf %562, %563 : vector<8x16xf32>
    %cst_315 = arith.constant -1.000000e+09 : f32
    %565 = vector.broadcast %cst_315 : f32 to vector<8x16xf32>
    %566 = arith.select %13, %564, %565 : vector<8x16xi1>, vector<8x16xf32>
    %cst_316 = arith.constant dense<0xFF800000> : vector<8xf32>
    %567 = vector.multi_reduction <maximumf>, %566, %cst_316 [1] : vector<8x16xf32> to vector<8xf32>
    %568 = vector.shape_cast %567 : vector<8xf32> to vector<8x1xf32>
    %569 = vector.broadcast %568 : vector<8x1xf32> to vector<8x16xf32>
    %570 = arith.subf %566, %569 : vector<8x16xf32>
    %571 = math.exp %570 : vector<8x16xf32>
    %cst_317 = arith.constant dense<0.000000e+00> : vector<8xf32>
    %572 = vector.multi_reduction <add>, %571, %cst_317 [1] : vector<8x16xf32> to vector<8xf32>
    %573 = vector.shape_cast %572 : vector<8xf32> to vector<8x1xf32>
    %574 = vector.broadcast %573 : vector<8x1xf32> to vector<8x16xf32>
    %575 = arith.divf %571, %574 : vector<8x16xf32>
    %576 = vector.extract_strided_slice %518 {offsets = [0, 16], sizes = [16, 8], strides = [1, 1]} : vector<16x32xf32> to vector<16x8xf32>
    %cst_318 = arith.constant dense<0.000000e+00> : vector<8x8xf32>
    %577 = tpu.matmul %575, %576, %cst_318 {dimension_numbers = #tpu.dot_dimension_numbers<[1], [0], [0], [1], [0, 0, 1, 1], [], []>} : vector<8x16xf32>, vector<16x8xf32>, vector<8x8xf32> -> vector<8x8xf32>
    %578 = vector.extract_strided_slice %507 {offsets = [16, 0], sizes = [8, 32], strides = [1, 1]} : vector<32x32xf32> to vector<8x32xf32>
    %cst_319 = arith.constant dense<0.000000e+00> : vector<8x32xf32>
    %579 = tpu.matmul %577, %578, %cst_319 {dimension_numbers = #tpu.dot_dimension_numbers<[1], [0], [0], [1], [0, 0, 1, 1], [], []>} : vector<8x8xf32>, vector<8x32xf32>, vector<8x32xf32> -> vector<8x32xf32>
    %580 = arith.addf %559, %579 : vector<8x32xf32>
    %581 = vector.extract_strided_slice %512 {offsets = [0, 24], sizes = [8, 8], strides = [1, 1]} : vector<8x32xf32> to vector<8x8xf32>
    %582 = vector.extract_strided_slice %515 {offsets = [0, 24], sizes = [16, 8], strides = [1, 1]} : vector<16x32xf32> to vector<16x8xf32>
    %cst_320 = arith.constant dense<0.000000e+00> : vector<8x16xf32>
    %583 = tpu.matmul %581, %582, %cst_320 {dimension_numbers = #tpu.dot_dimension_numbers<[1], [1], [0], [0], [0, 0, 1, 0], [], []>} : vector<8x8xf32>, vector<16x8xf32>, vector<8x16xf32> -> vector<8x16xf32>
    %cst_321 = arith.constant 0.353553385 : f32
    %584 = vector.broadcast %cst_321 : f32 to vector<8x16xf32>
    %585 = arith.mulf %583, %584 : vector<8x16xf32>
    %cst_322 = arith.constant -1.000000e+09 : f32
    %586 = vector.broadcast %cst_322 : f32 to vector<8x16xf32>
    %587 = arith.select %13, %585, %586 : vector<8x16xi1>, vector<8x16xf32>
    %cst_323 = arith.constant dense<0xFF800000> : vector<8xf32>
    %588 = vector.multi_reduction <maximumf>, %587, %cst_323 [1] : vector<8x16xf32> to vector<8xf32>
    %589 = vector.shape_cast %588 : vector<8xf32> to vector<8x1xf32>
    %590 = vector.broadcast %589 : vector<8x1xf32> to vector<8x16xf32>
    %591 = arith.subf %587, %590 : vector<8x16xf32>
    %592 = math.exp %591 : vector<8x16xf32>
    %cst_324 = arith.constant dense<0.000000e+00> : vector<8xf32>
    %593 = vector.multi_reduction <add>, %592, %cst_324 [1] : vector<8x16xf32> to vector<8xf32>
    %594 = vector.shape_cast %593 : vector<8xf32> to vector<8x1xf32>
    %595 = vector.broadcast %594 : vector<8x1xf32> to vector<8x16xf32>
    %596 = arith.divf %592, %595 : vector<8x16xf32>
    %597 = vector.extract_strided_slice %518 {offsets = [0, 24], sizes = [16, 8], strides = [1, 1]} : vector<16x32xf32> to vector<16x8xf32>
    %cst_325 = arith.constant dense<0.000000e+00> : vector<8x8xf32>
    %598 = tpu.matmul %596, %597, %cst_325 {dimension_numbers = #tpu.dot_dimension_numbers<[1], [0], [0], [1], [0, 0, 1, 1], [], []>} : vector<8x16xf32>, vector<16x8xf32>, vector<8x8xf32> -> vector<8x8xf32>
    %599 = vector.extract_strided_slice %507 {offsets = [24, 0], sizes = [8, 32], strides = [1, 1]} : vector<32x32xf32> to vector<8x32xf32>
    %cst_326 = arith.constant dense<0.000000e+00> : vector<8x32xf32>
    %600 = tpu.matmul %598, %599, %cst_326 {dimension_numbers = #tpu.dot_dimension_numbers<[1], [0], [0], [1], [0, 0, 1, 1], [], []>} : vector<8x8xf32>, vector<8x32xf32>, vector<8x32xf32> -> vector<8x32xf32>
    %601 = arith.addf %580, %600 : vector<8x32xf32>
    %602 = vector.broadcast %509 : vector<1x32xf32> to vector<8x32xf32>
    %603 = arith.addf %601, %602 : vector<8x32xf32>
    %604 = arith.addf %467, %603 : vector<8x32xf32>
    %c5_327 = arith.constant 5 : index
    %c0_328 = arith.constant 0 : index
    %c0_329 = arith.constant 0 : index
    %605 = vector.load %arg11[%c5_327, %c0_328, %c0_329] : memref<7x1x32xf32, #tpu.memory_space<vmem>>, vector<1x1x32xf32>
    %606 = vector.shape_cast %605 : vector<1x1x32xf32> to vector<1x32xf32>
    %c5_330 = arith.constant 5 : index
    %c0_331 = arith.constant 0 : index
    %c0_332 = arith.constant 0 : index
    %607 = vector.load %arg12[%c5_330, %c0_331, %c0_332] : memref<7x1x32xf32, #tpu.memory_space<vmem>>, vector<1x1x32xf32>
    %608 = vector.shape_cast %607 : vector<1x1x32xf32> to vector<1x32xf32>
    %cst_333 = arith.constant dense<0.000000e+00> : vector<8xf32>
    %609 = vector.multi_reduction <add>, %604, %cst_333 [1] : vector<8x32xf32> to vector<8xf32>
    %610 = vector.shape_cast %609 : vector<8xf32> to vector<8x1xf32>
    %cst_334 = arith.constant 3.200000e+01 : f32
    %611 = vector.broadcast %cst_334 : f32 to vector<8x1xf32>
    %612 = arith.divf %610, %611 : vector<8x1xf32>
    %613 = vector.broadcast %612 : vector<8x1xf32> to vector<8x32xf32>
    %614 = arith.subf %604, %613 : vector<8x32xf32>
    %615 = arith.mulf %614, %614 : vector<8x32xf32>
    %cst_335 = arith.constant dense<0.000000e+00> : vector<8xf32>
    %616 = vector.multi_reduction <add>, %615, %cst_335 [1] : vector<8x32xf32> to vector<8xf32>
    %617 = vector.shape_cast %616 : vector<8xf32> to vector<8x1xf32>
    %cst_336 = arith.constant 3.200000e+01 : f32
    %618 = vector.broadcast %cst_336 : f32 to vector<8x1xf32>
    %619 = arith.divf %617, %618 : vector<8x1xf32>
    %620 = vector.broadcast %612 : vector<8x1xf32> to vector<8x32xf32>
    %621 = arith.subf %604, %620 : vector<8x32xf32>
    %cst_337 = arith.constant 9.99999974E-6 : f32
    %622 = vector.broadcast %cst_337 : f32 to vector<8x1xf32>
    %623 = arith.addf %619, %622 : vector<8x1xf32>
    %624 = math.rsqrt %623 : vector<8x1xf32>
    %625 = vector.broadcast %624 : vector<8x1xf32> to vector<8x32xf32>
    %626 = arith.mulf %621, %625 : vector<8x32xf32>
    %627 = vector.broadcast %606 : vector<1x32xf32> to vector<8x32xf32>
    %628 = arith.mulf %626, %627 : vector<8x32xf32>
    %629 = vector.broadcast %608 : vector<1x32xf32> to vector<8x32xf32>
    %630 = arith.addf %628, %629 : vector<8x32xf32>
    %c1_338 = arith.constant 1 : index
    %c0_339 = arith.constant 0 : index
    %c0_340 = arith.constant 0 : index
    %631 = vector.load %arg7[%c1_338, %c0_339, %c0_340] : memref<2x32x64xf32, #tpu.memory_space<vmem>>, vector<1x32x64xf32>
    %632 = vector.shape_cast %631 : vector<1x32x64xf32> to vector<32x64xf32>
    %cst_341 = arith.constant dense<0.000000e+00> : vector<8x64xf32>
    %633 = tpu.matmul %630, %632, %cst_341 {dimension_numbers = #tpu.dot_dimension_numbers<[1], [0], [0], [1], [0, 0, 1, 1], [], []>} : vector<8x32xf32>, vector<32x64xf32>, vector<8x64xf32> -> vector<8x64xf32>
    %c1_342 = arith.constant 1 : index
    %c0_343 = arith.constant 0 : index
    %c0_344 = arith.constant 0 : index
    %634 = vector.load %arg8[%c1_342, %c0_343, %c0_344] : memref<2x1x64xf32, #tpu.memory_space<vmem>>, vector<1x1x64xf32>
    %635 = vector.shape_cast %634 : vector<1x1x64xf32> to vector<1x64xf32>
    %636 = vector.broadcast %635 : vector<1x64xf32> to vector<8x64xf32>
    %637 = arith.addf %633, %636 : vector<8x64xf32>
    %cst_345 = arith.constant 0.000000e+00 : f32
    %638 = vector.broadcast %cst_345 : f32 to vector<8x64xf32>
    %639 = arith.maximumf %637, %638 : vector<8x64xf32>
    %c1_346 = arith.constant 1 : index
    %c0_347 = arith.constant 0 : index
    %c0_348 = arith.constant 0 : index
    %640 = vector.load %arg9[%c1_346, %c0_347, %c0_348] : memref<2x64x32xf32, #tpu.memory_space<vmem>>, vector<1x64x32xf32>
    %641 = vector.shape_cast %640 : vector<1x64x32xf32> to vector<64x32xf32>
    %cst_349 = arith.constant dense<0.000000e+00> : vector<8x32xf32>
    %642 = tpu.matmul %639, %641, %cst_349 {dimension_numbers = #tpu.dot_dimension_numbers<[1], [0], [0], [1], [0, 0, 1, 1], [], []>} : vector<8x64xf32>, vector<64x32xf32>, vector<8x32xf32> -> vector<8x32xf32>
    %c1_350 = arith.constant 1 : index
    %c0_351 = arith.constant 0 : index
    %c0_352 = arith.constant 0 : index
    %643 = vector.load %arg10[%c1_350, %c0_351, %c0_352] : memref<2x1x32xf32, #tpu.memory_space<vmem>>, vector<1x1x32xf32>
    %644 = vector.shape_cast %643 : vector<1x1x32xf32> to vector<1x32xf32>
    %645 = vector.broadcast %644 : vector<1x32xf32> to vector<8x32xf32>
    %646 = arith.addf %642, %645 : vector<8x32xf32>
    %647 = arith.addf %604, %646 : vector<8x32xf32>
    %c6_353 = arith.constant 6 : index
    %c0_354 = arith.constant 0 : index
    %c0_355 = arith.constant 0 : index
    %648 = vector.load %arg11[%c6_353, %c0_354, %c0_355] : memref<7x1x32xf32, #tpu.memory_space<vmem>>, vector<1x1x32xf32>
    %649 = vector.shape_cast %648 : vector<1x1x32xf32> to vector<1x32xf32>
    %c6_356 = arith.constant 6 : index
    %c0_357 = arith.constant 0 : index
    %c0_358 = arith.constant 0 : index
    %650 = vector.load %arg12[%c6_356, %c0_357, %c0_358] : memref<7x1x32xf32, #tpu.memory_space<vmem>>, vector<1x1x32xf32>
    %651 = vector.shape_cast %650 : vector<1x1x32xf32> to vector<1x32xf32>
    %cst_359 = arith.constant dense<0.000000e+00> : vector<8xf32>
    %652 = vector.multi_reduction <add>, %647, %cst_359 [1] : vector<8x32xf32> to vector<8xf32>
    %653 = vector.shape_cast %652 : vector<8xf32> to vector<8x1xf32>
    %cst_360 = arith.constant 3.200000e+01 : f32
    %654 = vector.broadcast %cst_360 : f32 to vector<8x1xf32>
    %655 = arith.divf %653, %654 : vector<8x1xf32>
    %656 = vector.broadcast %655 : vector<8x1xf32> to vector<8x32xf32>
    %657 = arith.subf %647, %656 : vector<8x32xf32>
    %658 = arith.mulf %657, %657 : vector<8x32xf32>
    %cst_361 = arith.constant dense<0.000000e+00> : vector<8xf32>
    %659 = vector.multi_reduction <add>, %658, %cst_361 [1] : vector<8x32xf32> to vector<8xf32>
    %660 = vector.shape_cast %659 : vector<8xf32> to vector<8x1xf32>
    %cst_362 = arith.constant 3.200000e+01 : f32
    %661 = vector.broadcast %cst_362 : f32 to vector<8x1xf32>
    %662 = arith.divf %660, %661 : vector<8x1xf32>
    %663 = vector.broadcast %655 : vector<8x1xf32> to vector<8x32xf32>
    %664 = arith.subf %647, %663 : vector<8x32xf32>
    %cst_363 = arith.constant 9.99999974E-6 : f32
    %665 = vector.broadcast %cst_363 : f32 to vector<8x1xf32>
    %666 = arith.addf %662, %665 : vector<8x1xf32>
    %667 = math.rsqrt %666 : vector<8x1xf32>
    %668 = vector.broadcast %667 : vector<8x1xf32> to vector<8x32xf32>
    %669 = arith.mulf %664, %668 : vector<8x32xf32>
    %670 = vector.broadcast %649 : vector<1x32xf32> to vector<8x32xf32>
    %671 = arith.mulf %669, %670 : vector<8x32xf32>
    %672 = vector.broadcast %651 : vector<1x32xf32> to vector<8x32xf32>
    %673 = arith.addf %671, %672 : vector<8x32xf32>
    %c0_364 = arith.constant 0 : index
    %c0_365 = arith.constant 0 : index
    %c0_366 = arith.constant 0 : index
    %674 = vector.load %arg13[%c0_364, %c0_365, %c0_366] : memref<1x8x32xf32, #tpu.memory_space<vmem>>, vector<1x8x32xf32>
    %675 = vector.shape_cast %674 : vector<1x8x32xf32> to vector<8x32xf32>
    %676 = vector.shape_cast %673 : vector<8x32xf32> to vector<1x8x32xf32>
    tpu.vector_store %arg13[%c0_364, %c0_365, %c0_366], %676 {strides = array<i32>} : memref<1x8x32xf32, #tpu.memory_space<vmem>>, vector<1x8x32xf32>,
    return
  }
  func.func @transform_0(%arg0: i32) -> (i32, i32, i32) {
    %c0_i32 = arith.constant 0 : i32
    %c0_i32_0 = arith.constant 0 : i32
    %c0_i32_1 = arith.constant 0 : i32
    return %arg0, %c0_i32, %c0_i32_0 : i32, i32, i32
  }
  func.func @transform_1(%arg0: i32) -> (i32, i32, i32) {
    %c0_i32 = arith.constant 0 : i32
    %c0_i32_0 = arith.constant 0 : i32
    %c0_i32_1 = arith.constant 0 : i32
    return %arg0, %c0_i32, %c0_i32_0 : i32, i32, i32
  }
  func.func @transform_2(%arg0: i32) -> (i32, i32, i32) {
    %c0_i32 = arith.constant 0 : i32
    %c0_i32_0 = arith.constant 0 : i32
    %c0_i32_1 = arith.constant 0 : i32
    return %arg0, %c0_i32, %c0_i32_0 : i32, i32, i32
  }
  func.func @transform_3(%arg0: i32) -> (i32, i32, i32) {
    %c0_i32 = arith.constant 0 : i32
    %c0_i32_0 = arith.constant 0 : i32
    %c0_i32_1 = arith.constant 0 : i32
    return %arg0, %c0_i32, %c0_i32_0 : i32, i32, i32
  }
  func.func @transform_4(%arg0: i32) -> (i32, i32, i32, i32) {
    %c0_i32 = arith.constant 0 : i32
    %c0_i32_0 = arith.constant 0 : i32
    %c0_i32_1 = arith.constant 0 : i32
    %c0_i32_2 = arith.constant 0 : i32
    %c0_i32_3 = arith.constant 0 : i32
    return %c0_i32, %c0_i32_0, %c0_i32_1, %c0_i32_2 : i32, i32, i32, i32
  }
  func.func @transform_5(%arg0: i32) -> (i32, i32, i32, i32) {
    %c0_i32 = arith.constant 0 : i32
    %c0_i32_0 = arith.constant 0 : i32
    %c0_i32_1 = arith.constant 0 : i32
    %c0_i32_2 = arith.constant 0 : i32
    %c0_i32_3 = arith.constant 0 : i32
    return %c0_i32, %c0_i32_0, %c0_i32_1, %c0_i32_2 : i32, i32, i32, i32
  }
  func.func @transform_6(%arg0: i32) -> (i32, i32, i32) {
    %c0_i32 = arith.constant 0 : i32
    %c0_i32_0 = arith.constant 0 : i32
    %c0_i32_1 = arith.constant 0 : i32
    %c0_i32_2 = arith.constant 0 : i32
    return %c0_i32, %c0_i32_0, %c0_i32_1 : i32, i32, i32
  }
  func.func @transform_7(%arg0: i32) -> (i32, i32, i32) {
    %c0_i32 = arith.constant 0 : i32
    %c0_i32_0 = arith.constant 0 : i32
    %c0_i32_1 = arith.constant 0 : i32
    %c0_i32_2 = arith.constant 0 : i32
    return %c0_i32, %c0_i32_0, %c0_i32_1 : i32, i32, i32
  }
  func.func @transform_8(%arg0: i32) -> (i32, i32, i32) {
    %c0_i32 = arith.constant 0 : i32
    %c0_i32_0 = arith.constant 0 : i32
    %c0_i32_1 = arith.constant 0 : i32
    %c0_i32_2 = arith.constant 0 : i32
    return %c0_i32, %c0_i32_0, %c0_i32_1 : i32, i32, i32
  }
  func.func @transform_9(%arg0: i32) -> (i32, i32, i32) {
    %c0_i32 = arith.constant 0 : i32
    %c0_i32_0 = arith.constant 0 : i32
    %c0_i32_1 = arith.constant 0 : i32
    %c0_i32_2 = arith.constant 0 : i32
    return %c0_i32, %c0_i32_0, %c0_i32_1 : i32, i32, i32
  }
  func.func @transform_10(%arg0: i32) -> (i32, i32, i32) {
    %c0_i32 = arith.constant 0 : i32
    %c0_i32_0 = arith.constant 0 : i32
    %c0_i32_1 = arith.constant 0 : i32
    %c0_i32_2 = arith.constant 0 : i32
    return %c0_i32, %c0_i32_0, %c0_i32_1 : i32, i32, i32
  }
  func.func @transform_11(%arg0: i32) -> (i32, i32, i32) {
    %c0_i32 = arith.constant 0 : i32
    %c0_i32_0 = arith.constant 0 : i32
    %c0_i32_1 = arith.constant 0 : i32
    %c0_i32_2 = arith.constant 0 : i32
    return %c0_i32, %c0_i32_0, %c0_i32_1 : i32, i32, i32
  }
  func.func @transform_12(%arg0: i32) -> (i32, i32, i32) {
    %c0_i32 = arith.constant 0 : i32
    %c0_i32_0 = arith.constant 0 : i32
    %c0_i32_1 = arith.constant 0 : i32
    return %arg0, %c0_i32, %c0_i32_0 : i32, i32, i32
  }
}

</mosaic_0001>

<bundles_post_ra>
// kernel: tpu_custom_call.1
= control target key start
LH: loop header
LB: loop body
LE: loop exit
PB: predicated region body
PF: predicated region fallthrough
CT: control target
= control target key end

     0   :  { %s4260_s0 = inlined_call_operand.vmem [shape: f32[2,8,32], index: 0, kind: input, shape index: {}]   ;;  %s4261_s1 = inlined_call_operand.vmem [shape: f32[2,16,32], index: 1, kind: input, shape index: {}]   ;;  %s4262_s2 = inlined_call_operand.vmem [shape: f32[2,1,16], index: 2, kind: input, shape index: {}]   ;;  %s4263_s3 = inlined_call_operand.vmem [shape: f32[2,8,8], index: 3, kind: input, shape index: {}]   ;;  %s4264_s4 = inlined_call_operand.hbm [shape: f32[2,8,32,32], index: 4, kind: input, shape index: {}]   ;;  %s4265_s5 = inlined_call_operand.vmem [shape: f32[2,8,1,32], index: 5, kind: input, shape index: {}]   ;;  %s4266_s6 = inlined_call_operand.vmem [shape: f32[2,32,64], index: 6, kind: input, shape index: {}]   ;;  %s4267_s7 = inlined_call_operand.vmem [shape: f32[2,1,64], index: 7, kind: input, shape index: {}]   ;;  %s4268_s8 = inlined_call_operand.vmem [shape: f32[2,64,32], index: 8, kind: input, shape index: {}]   ;;  %s4269_s9 = inlined_call_operand.vmem [shape: f32[2,1,32], index: 9, kind: input, shape index: {}]   ;;  %s4270_s10 = inlined_call_operand.vmem [shape: f32[7,1,32], index: 10, kind: input, shape index: {}]   ;;  %s4271_s11 = inlined_call_operand.vmem [shape: f32[7,1,32], index: 11, kind: input, shape index: {}]   ;;  %s4272_s12 = inlined_call_operand.hbm [shape: f32[2,8,32], index: 12, kind: output, shape index: {}]  }
   0x1   :  { %4280 = sst [smem:[#allocation8_spill]] %s4260_s0 }
   0x2   :  { %4281 = sst [smem:[#allocation9_spill]] %s4261_s1 }
   0x3   :  { %4282 = sst [smem:[#allocation10_spill]] %s4262_s2 }
   0x4   :  { %4283 = sst [smem:[#allocation11_spill]] %s4263_s3 }
   0x5   :  { %17 = vsyncpa [#allocation3], 0 }
   0x6   :  { %18 = vsyncpa [#allocation4], 0 }
   0x7   :  { %20 = vsyncpa [#allocation4 + $0x1], 0  ;;  %s3643_s21 = smov 0   ;;  %s3645_s22 = smov 0  }
   0x8   :  { %s3647_s23 = smov 0   ;;  %s3649_s24 = smov 0  }
   0x9 LB: > { %s3664_s25 = sadd.s32 4294967295, %s3569_s24   ;;  %s3121_s26 = sadd.s32 4294967294, %s3569_s24   ;;  %s3569_s24 = sphi %s3649_s24, %s4298_s24   ;;  %s3565_s23 = sphi %s3647_s23, %s4297_s23   ;;  %s3561_s22 = sphi %s3645_s22, %s4296_s22   ;;  %s3557_s21 = sphi %s3643_s21, %s4295_s21  }
   0xa   : > { %s3668_s27 = sadd.s32 1, %s3569_s24   ;;  %s305_s28 = sadd.s32 1, %s3565_s23 }
   0xb   : > { %s302_s29 = ssub.s32 %s3569_s24, %s3668_s27  ;;  %p315_p0 = scmp.ne.s32.totalorder %s3565_s23, %s3561_s22 }
   0xc   : > { %p303_p1 = scmp.eq.s32.totalorder %s302_s29, 0  ;;  %p316_p2 = scmp.eq.s32.totalorder %s3664_s25, 1 }
   0xd   : > { %p321_p3 = scmp.ne.s32.totalorder %s3561_s22, %s3557_s21  ;;  %p322_p4 = scmp.eq.s32.totalorder %s3121_s26, 1 }
   0xe   : > { %s3679_s30 = scalar_select %p303_p1, %s3565_s23, %s305_s28  }
   0xf   : > { %p3681_p5 = por %p316_p2, %p315_p0  ;;  %p3685_p6 = por %p322_p4, %p321_p3 }
  0x10   : > { %p3122_p7 = scmp.ge.s32.totalorder %s3569_s24, 1  ;;  %p329_p8 = scmp.lt.s32.totalorder %s3569_s24, 3 }
  0x11   : > { %p3284_p9 = scmp.eq.s32.totalorder %s3664_s25, 0  ;;  %s340_s17 = sshll.u32 %s4264_s4, 4  ;;  %s341_s17 = int_to_ptr.hbm [resolvable:$true] %s340_s17 }
  0x12   : > { %p330_p10 = pnand %p3122_p7, %p329_p8  ;;  %s3571_s18 = smov [#allocation2]  }
  0x13   : > { %s342_s19 = sshll.u32 %s3571_s18, 4  ;;  %s3572_s20 = smov 128   ;;  %s343_s19 = int_to_ptr.vmem [resolvable:$true] %s342_s19 }
  0x14   : > { %p3276_p11 = pneg %p330_p10  ;;  %s3573_s26 = smov 8  }
  0x15   : > { %407 = sbr.rel (%p330_p10) target bundleno = 7748 (0x1e44), region = 68 }
  0x16   : > { %p3277_p12 = pnand %p3284_p9, %p3276_p11 }
  0x18   : > { %3279 = dma.hbm_to_vmem [thread:$0]  (!%p3277_p12), %s341_s17, 8192, %s343_s19, [#allocation3], %s3572_s20, %s3572_s20, %s3573_s26  }
  0x1a   : > { %3548 = dma.done.wait (%p3284_p9), [#allocation3], 8192  }
  0x1b   : > { %3550 = vsyncadd (%p3284_p9), [#allocation3], 4294959104  ;;  %p461_p13 = scmp.lt.s32.totalorder %s3664_s25, 1  ;;  %s4286_s0 = sld [smem:[#allocation8_spill]]  ;;  %vm489_vm0 = vcmask 261120   ;;  %v3574_v2 = vmov 32.0  }
  0x1c   : > { %s4287_s2 = sld [smem:[#allocation10_spill]]  ;;  %3391 = vrcp.f32 %v3574_v2  ;;  %v530_v14 = vld [vmem:[#allocation2 + $0x18] sm:$0xff]  ;;  %v529_v17 = vld [vmem:[#allocation2 + $0x10] sm:$0xff]  ;;  %v528_v20 = vld [vmem:[#allocation2 + $0x8] sm:$0xff]  ;;  %vm625_vm5 = vcmask 64512   ;;  %s4276_s16 = smov 112  }
  0x1d   : > { %s3703_s28 = scalar_select %p461_p13, %s3664_s25, 1  ;;  %v536_v15 = vld [vmem:[#allocation2 + $0x38] sm:$0xff]  ;;  %571 = vmatpush.msra.mxu0 %v530_v14  ;;  %v535_v18 = vld [vmem:[#allocation2 + $0x30] sm:$0xff]  ;;  %v534_v21 = vld [vmem:[#allocation2 + $0x28] sm:$0xff] }
  0x1e   : > { %v543_v16 = vld [vmem:[#allocation2 + $0x58] sm:$0xff]  ;;  %594 = vmatpush.msra.mxu1 %v536_v15  ;;  %v542_v19 = vld [vmem:[#allocation2 + $0x50] sm:$0xff]  ;;  %v541_v22 = vld [vmem:[#allocation2 + $0x48] sm:$0xff]  ;;  %s4274_s18 = smov 104   ;;  %s4289_s3 = sld [smem:[#allocation11_spill]] }
  0x1f   : > { %s4273_s29 = sshll.u32 %s3703_s28, 3  ;;  %617 = vmatpush.msra.mxu2 %v543_v16  ;;  %572 = vmatpush.msra.mxu0 %v529_v17  ;;  %v527_v23 = vld [vmem:[#allocation2] sm:$0xff]  ;;  %s3269_s20 = sshll.u32 %s3703_s28, 4 }
  0x20   : > { %595 = vmatpush.msra.mxu1 %v535_v18  ;;  %v533_v24 = vld [vmem:[#allocation2 + $0x20] sm:$0xff]  ;;  %s4290_s1 = sld [smem:[#allocation9_spill]] }
  0x21   : > { %s464_s17 = scalar_lea.vmem %s4286_s0, %s4273_s29  ;;  %618 = vmatpush.msra.mxu2 %v542_v19  ;;  %573 = vmatpush.msra.mxu0 %v528_v20  ;;  %v540_v25 = vld [vmem:[#allocation2 + $0x40] sm:$0xff]  ;;  %s4288_s29 = sshll.u32 %s3703_s28, 3 }
  0x22   : > { %v3715_v0 = vld [vmem:[%s464_s17] sm:$0xff]  ;;  %v3392_v3 = vpop.eup %3391  ;;  %596 = vmatpush.msra.mxu1 %v534_v21  ;;  %s4278_s17 = smov 120   ;;  %s4293_s19 = scalar_lea.vmem %s4287_s2, %s3703_s28 }
  0x23   : > { %v490_v1 = vsel %vm489_vm0, %v3715_v0, 0.0  ;;  %v494_v4 = vmul.f32 32.0, %v3392_v3  ;;  %vm498_vm1 = vweird.f32 %v3392_v3  ;;  %619 = vmatpush.msra.mxu2 %v541_v22  ;;  %574 = vmatpush.msra.mxu0 %v527_v23  ;;  %v3357_v35 = vld [vmem:[%s4270_s10] ss:$0 sm:$0xff]  ;;  %v3360_v41 = vld [vmem:[%s4265_s5 + $0x1] ss:$0 sm:$0xff] }
  0x24   : > { %491 = vadd.xlane.f32.xlu0 %v490_v1  ;;  %597 = vmatpush.msra.mxu1 %v533_v24  ;;  %v3358_v38 = vld [vmem:[%s4271_s11] ss:$0 sm:$0xff]  ;;  %v3361_v46 = vld [vmem:[%s4265_s5 + $0x2] ss:$0 sm:$0xff]  ;;  %s476_s26 = scalar_lea.vmem %s4289_s3, %s4288_s29  ;;  %s4291_s29 = smov 112  }
  0x25   : > { %v495_v5 = vsub.f32 1.0, %v494_v4  ;;  %620 = vmatpush.msra.mxu2 %v540_v25  ;;  %v3359_v43 = vld [vmem:[%s4265_s5] ss:$0 sm:$0xff]  ;;  %s3266_s28 = sshll.u32 %s3664_s25, 3 }
  0x26   : > { %v3762_v54 = vld [vmem:[%s476_s26] sm:$0xff]  ;;  %s3821_s15 = scalar_lea.vmem %s4290_s1, %s3269_s20  ;;  %s4292_s20 = smov 104  }
  0x27   : > { %v496_v6 = vmul.f32 %v3392_v3, %v495_v5  ;;  %vm481_vm6 = vcmp.gt.f32.partialorder %v3762_v54, 0.0  ;;  %v547_v18 = vld [vmem:[#allocation2 + $0x60] sm:$0xff]  ;;  %s4294_s26 = smov 120   ;;  %v1788_v54 = vld [vmem:[#allocation2 + $0x168] sm:$0xff] }
  0x29   : > { %v497_v7 = vadd.f32 %v3392_v3, %v496_v6 }
  0x2b   : > { %v3719_v8 = vsel %vm498_vm1, %v3392_v3, %v497_v7 }
  0x97   : > { %v492_v9 = vpop.xlane.xlu0 %491 }
  0x98   : > { %v500_v10 = vmul.f32 %v3719_v8, %v492_v9 }
  0x9a   : > { %v501_v11 = vsub.f32 %v3715_v0, %v500_v10 }
  0x9c   : > { %v502_v12 = vmul.f32 %v501_v11, %v501_v11 }
  0x9e   : > { %v503_v13 = vsel %vm489_vm0, %v502_v12, 0.0 }
  0x9f   : > { %504 = vadd.xlane.f32.xlu0 %v503_v13 }
 0x112   : > { %v505_v26 = vpop.xlane.xlu0 %504 }
 0x113   : > { %v506_v27 = vmul.f32 %v505_v26, %v3719_v8 }
 0x115   : > { %v507_v28 = vadd.f32 1e-05, %v506_v27 }
 0x117   : > { %3393 = vrsqrt.f32 %v507_v28  ;;  %vm514_vm3 = vweird.f32 %v507_v28 }
 0x11d   : > { %v3394_v29 = vpop.eup %3393 }
 0x11e   : > { %v509_v30 = vmul.f32 %v3394_v29, %v507_v28  ;;  %vm515_vm2 = vweird.f32 %v3394_v29 }
 0x11f   : > { %vm516_vm4 = vmor %vm514_vm3, %vm515_vm2 }
 0x120   : > { %v510_v31 = vmul.f32 %v3394_v29, %v509_v30 }
 0x122   : > { %v511_v32 = vmul.f32 0.5, %v510_v31 }
 0x124   : > { %v512_v33 = vsub.f32 1.5, %v511_v32 }
 0x126   : > { %v513_v34 = vmul.f32 %v3394_v29, %v512_v33 }
 0x128   : > { %v517_v36 = vsel %vm516_vm4, %v3394_v29, %v513_v34 }
 0x129   : > { %v518_v37 = vmul.f32 %v517_v36, %v501_v11 }
 0x12b   : > { %v522_v39 = vmul.f32 %v3357_v35, %v518_v37 }
 0x12d   : > { %v526_v40 = vadd.f32 %v3358_v38, %v522_v39 }
 0x12f   : > { %3135 = vmatmul.msk.f32.vlgmr.msra.gmra.mxu0 %vm489_vm0, %v526_v40  ;;  %3136 = vmatmul.msk.f32.vlgmr.msra.gmra.mxu1 %vm489_vm0, %v526_v40 }
 0x130   : > { %3137 = vmatmul.msk.f32.vlgmr.msra.gmra.mxu2 %vm489_vm0, %v526_v40 }
 0x1ac   : > { %v599_v42 = vpop.f32.mrf.mxu1  ;;  %v576_v45 = vpop.f32.mrf.mxu0 }
 0x1ad   : > { %v600_v44 = vadd.f32 %v3360_v41, %v599_v42  ;;  %v577_v47 = vadd.f32 %v3359_v43, %v576_v45 }
 0x1af   : > { %830 = vrot.lane.b32.xlu0 %v600_v44, %s4276_s16  ;;  %703 = vrot.lane.b32.xlu2 %v600_v44, %s4278_s17 }
 0x1b0   : > { %3138 = vmatpush.xpose.msk.msrb.mxu0 %vm625_vm5, %v600_v44 }
 0x1b3   : > { %v622_v48 = vpop.f32.mrf.mxu2  ;;  %3139 = vmatmul.msk.f32.vlgmr.msrb.gmra.mxu0 %vm625_vm5, %v577_v47 }
 0x1b4   : > { %v3747_v49 = vadd.f32 %v3361_v46, %v622_v48 }
 0x1b6   : > { %696 = vmatpush.msra.mxu3 %v3747_v49 }
 0x1b7   : > { %701 = vrot.lane.b32.xlu2 %v577_v47, %s4278_s17 }
 0x1b8   : > { %823 = vmatpush.msrb.mxu3 %v547_v18 }
 0x1bf   : > { %828 = vrot.lane.b32.xlu2 %v577_v47, %s4276_s16 }
 0x1c7   : > { %932 = vrot.lane.b32.xlu2 %v577_v47, %s4274_s18 }
 0x209   : > { %v704_v50 = vpop.permute.xlu2 %703 }
 0x20a   : > { %3141 = vmatpush.xpose.msk.msra.mxu0 %vm625_vm5, %v704_v50 }
 0x211   : > { %v702_v51 = vpop.permute.xlu2 %701 }
 0x212   : > { %3142 = vmatmul.msk.f32.vlgmr.msra.gmra.mxu0 %vm625_vm5, %v702_v51 }
 0x219   : > { %v829_v53 = vpop.permute.xlu2 %828 }
 0x221   : > { %v831_v52 = vpop.permute.xlu0 %830  ;;  %v933_v10 = vpop.permute.xlu2 %932 }
 0x222   : > { %3146 = vmatpush.xpose.msk.msrb.mxu0 %vm625_vm5, %v831_v52 }
 0x225   : > { %3147 = vmatmul.msk.f32.vlgmr.msrb.gmra.mxu0 %vm625_vm5, %v829_v53 }
 0x230   : > { %v649_v55 = vpop.f32.mrf.mxu0 }
 0x231   : > { %v652_v56 = vmul.f32 0.35355338, %v649_v55 }
 0x233   : > { %v653_v57 = vsel %vm481_vm6, %v652_v56, -1e+09 }
 0x234   : > { %v654_v58 = vsel %vm625_vm5, %v653_v57, -inf }
 0x235   : > { %655 = vmax.xlane.f32.xlu1 %v654_v58 }
 0x28f   : > { %v726_v59 = vpop.f32.mrf.mxu0 }
 0x290   : > { %v729_v60 = vmul.f32 0.35355338, %v726_v59 }
 0x292   : > { %v730_v61 = vsel %vm481_vm6, %v729_v60, -1e+09 }
 0x293   : > { %v731_v62 = vsel %vm625_vm5, %v730_v61, -inf }
 0x294   : > { %732 = vmax.xlane.f32.xlu2 %v731_v62 }
 0x2a2   : > { %v853_v63 = vpop.f32.mrf.mxu0 }
 0x2a3   : > { %v856_v1 = vmul.f32 0.35355338, %v853_v63 }
 0x2a5   : > { %v857_v2 = vsel %vm481_vm6, %v856_v1, -1e+09 }
 0x2a6   : > { %v858_v3 = vsel %vm625_vm5, %v857_v2, -inf }
 0x2a7   : > { %859 = vmax.xlane.f32.xlu0 %v858_v3 }
 0x2a8   : > { %v656_v4 = vpop.xlane.xlu1 %655 }
 0x2a9   : > { %v657_v5 = vsub.f32 %v653_v57, %v656_v4 }
 0x2ab   : > { %v658_v6 = vmul.f32 1.442695, %v657_v5 }
 0x2ad   : > { %3395 = vpow2.f32 %v658_v6 }
 0x2b3   : > { %v3396_v7 = vpop.eup %3395 }
 0x2b4   : > { %v660_v9 = vsel %vm625_vm5, %v3396_v7, 0.0 }
 0x2b5   : > { %661 = vadd.xlane.f32.xlu1 %v660_v9 }
 0x2ce   : > { %934 = vrot.lane.b32.xlu1 %v600_v44, %s4274_s18 }
 0x307   : > { %v733_v11 = vpop.xlane.xlu2 %732 }
 0x308   : > { %v734_v12 = vsub.f32 %v730_v61, %v733_v11 }
 0x30a   : > { %v735_v13 = vmul.f32 1.442695, %v734_v12  ;;  %v548_v12 = vld [vmem:[#allocation2 + $0x68] sm:$0xff] }
 0x30b   : > { %800 = vmatpush.msrb.mxu2 %v548_v12 }
 0x30c   : > { %3397 = vpow2.f32 %v735_v13  ;;  %v549_v13 = vld [vmem:[#allocation2 + $0x70] sm:$0xff] }
 0x30d   : > { %926 = vmatpush.msra.mxu2 %v549_v13 }
 0x312   : > { %v3776_v14 = vpop.eup %3397 }
 0x313   : > { %v737_v15 = vsel %vm625_vm5, %v3776_v14, 0.0 }
 0x314   : > { %738 = vadd.xlane.f32.xlu2 %v737_v15  ;;  %v550_v15 = vld [vmem:[#allocation2 + $0x78] sm:$0xff] }
 0x31a   : > { %v860_v16 = vpop.xlane.xlu0 %859 }
 0x31b   : > { %v861_v17 = vsub.f32 %v857_v2, %v860_v16 }
 0x31d   : > { %v862_v19 = vmul.f32 1.442695, %v861_v17 }
 0x31f   : > { %3399 = vpow2.f32 %v862_v19 }
 0x325   : > { %v3780_v20 = vpop.eup %3399 }
 0x326   : > { %v864_v21 = vsel %vm625_vm5, %v3780_v20, 0.0 }
 0x327   : > { %865 = vadd.xlane.f32.xlu0 %v864_v21 }
 0x328   : > { %v662_v22 = vpop.xlane.xlu1 %661 }
 0x329   : > { %3401 = vrcp.f32 %v662_v22  ;;  %v674_v26 = vand.u32 2147483648, %v662_v22  ;;  %v672_v28 = vand.u32 2147483647, %v662_v22  ;;  %vm668_vm8 = vweird.f32 %v662_v22 }
 0x32b   : > { %v675_v30 = vor.u32 1.1754944e-38, %v674_v26  ;;  %vm673_vm10 = vcmp.eq.f32.partialorder %v672_v28, 8.507059e+37 }
 0x32f   : > { %v3402_v23 = vpop.eup %3401 }
 0x330   : > { %v664_v24 = vmul.f32 %v3402_v23, %v662_v22  ;;  %vm669_vm7 = vweird.f32 %v3402_v23 }
 0x331   : > { %vm670_vm9 = vmor %vm668_vm8, %vm669_vm7 }
 0x332   : > { %v665_v25 = vsub.f32 1.0, %v664_v24 }
 0x334   : > { %v666_v27 = vmul.f32 %v3402_v23, %v665_v25 }
 0x336   : > { %v667_v29 = vadd.f32 %v3402_v23, %v666_v27 }
 0x338   : > { %v671_v31 = vsel %vm670_vm9, %v3402_v23, %v667_v29 }
 0x339   : > { %v676_v32 = vsel %vm673_vm10, %v675_v30, %v671_v31 }
 0x33a   : > { %v677_v33 = vmul.f32 %v3396_v7, %v676_v32 }
 0x33b   : > { %882 = vrot.lane.b32.xlu0 %v3747_v49, %s4276_s16 }
 0x33c   : > { %3140 = vmatmul.msk.f32.vlgmr.msra.gmra.mxu3 %vm625_vm5, %v677_v33 }
 0x340   : > { %v935_v34 = vpop.permute.xlu1 %934 }
 0x341   : > { %3150 = vmatpush.xpose.msk.msra.mxu3 %vm625_vm5, %v935_v34  ;;  %v3362_v34 = vld [vmem:[%s4265_s5 + $0x3] ss:$0 sm:$0xff] }
 0x387   : > { %v739_v41 = vpop.xlane.xlu2 %738 }
 0x388   : > { %3403 = vrcp.f32 %v739_v41  ;;  %v751_v58 = vand.u32 2147483648, %v739_v41  ;;  %vm745_vm12 = vweird.f32 %v739_v41  ;;  %v749_v59 = vand.u32 2147483647, %v739_v41 }
 0x38a   : > { %v752_v62 = vor.u32 1.1754944e-38, %v751_v58  ;;  %vm750_vm14 = vcmp.eq.f32.partialorder %v749_v59, 8.507059e+37 }
 0x38e   : > { %v3404_v43 = vpop.eup %3403 }
 0x38f   : > { %v741_v46 = vmul.f32 %v3404_v43, %v739_v41  ;;  %vm746_vm11 = vweird.f32 %v3404_v43  ;;  %v1086_v41 = vld [vmem:[#allocation2 + $0xb8] sm:$0xff] }
 0x390   : > { %vm747_vm13 = vmor %vm745_vm12, %vm746_vm11 }
 0x391   : > { %v742_v48 = vsub.f32 1.0, %v741_v46 }
 0x393   : > { %v743_v51 = vmul.f32 %v3404_v43, %v742_v48 }
 0x395   : > { %v744_v56 = vadd.f32 %v3404_v43, %v743_v51  ;;  %v1079_v51 = vld [vmem:[#allocation2 + $0x98] sm:$0xff] }
 0x397   : > { %v748_v61 = vsel %vm747_vm13, %v3404_v43, %v744_v56  ;;  %v1083_v43 = vld [vmem:[#allocation2 + $0xa0] sm:$0xff] }
 0x398   : > { %v753_v63 = vsel %vm750_vm14, %v752_v62, %v748_v61  ;;  %vm1218_vm14 = vcmask 130048  }
 0x399   : > { %v754_v5 = vmul.f32 %v3776_v14, %v753_v63 }
 0x39a   : > { %v866_v42 = vpop.xlane.xlu0 %865 }
 0x39b   : > { %3405 = vrcp.f32 %v866_v42  ;;  %v878_v2 = vand.u32 2147483648, %v866_v42  ;;  %vm872_vm1 = vweird.f32 %v866_v42  ;;  %v876_v3 = vand.u32 2147483647, %v866_v42 }
 0x39d   : > { %v879_v9 = vor.u32 1.1754944e-38, %v878_v2  ;;  %vm877_vm3 = vcmp.eq.f32.partialorder %v876_v3, 8.507059e+37  ;;  %v3363_v2 = vld [vmem:[%s4270_s10 + $0x1] ss:$0 sm:$0xff] }
 0x3a1   : > { %v3406_v50 = vpop.eup %3405 }
 0x3a2   : > { %v868_v52 = vmul.f32 %v3406_v50, %v866_v42  ;;  %vm873_vm15 = vweird.f32 %v3406_v50  ;;  %v1085_v42 = vld [vmem:[#allocation2 + $0xb0] sm:$0xff] }
 0x3a3   : > { %vm874_vm2 = vmor %vm872_vm1, %vm873_vm15 }
 0x3a4   : > { %v869_v57 = vsub.f32 1.0, %v868_v52  ;;  %v1078_v52 = vld [vmem:[#allocation2 + $0x90] sm:$0xff] }
 0x3a6   : > { %v870_v60 = vmul.f32 %v3406_v50, %v869_v57 }
 0x3a8   : > { %v871_v1 = vadd.f32 %v3406_v50, %v870_v60 }
 0x3aa   : > { %v875_v6 = vsel %vm874_vm2, %v3406_v50, %v871_v1  ;;  %v479_v50 = vld [vmem:[%s3821_s15 + $0x8] sm:$0xff] }
 0x3ad   : > { %v883_v7 = vpop.permute.xlu0 %882 }
 0x3bf   : > { %v698_v35 = vpop.f32.mrf.mxu3 }
 0x3c0   : > { %3145 = vmatmul.msk.f32.vlgmr.msrb.gmra.mxu3 %vm625_vm5, %v698_v35 }
 0x3c1   : > { %1150 = vmatpush.msrb.mxu3 %v1086_v41 }
 0x3c3   : > { %1151 = vmatpush.msrb.mxu3 %v1085_v42 }
 0x3c8   : > { %3151 = vmatmul.msk.f32.vlgmr.msra.gmra.mxu3 %vm625_vm5, %v933_v10  ;;  %v880_v10 = vsel %vm877_vm3, %v879_v9, %v875_v6 }
 0x3c9   : > { %v881_v11 = vmul.f32 %v3780_v20, %v880_v10  ;;  %v3365_v10 = vld [vmem:[%s4265_s5 + $0x5] ss:$0 sm:$0xff] }
 0x443   : > { %v3790_v36 = vpop.f32.mrf.mxu3 }
 0x44b   : > { %v957_v37 = vpop.f32.mrf.mxu3 }
 0x44c   : > { %v960_v38 = vmul.f32 0.35355338, %v957_v37 }
 0x44e   : > { %v961_v39 = vsel %vm481_vm6, %v960_v38, -1e+09 }
 0x44f   : > { %v962_v40 = vsel %vm625_vm5, %v961_v39, -inf }
 0x450   : > { %963 = vmax.xlane.f32.xlu1 %v962_v40 }
 0x469   : > { %756 = vrot.lane.b32.xlu1 %v3747_v49, %s4278_s17 }
 0x4c3   : > { %v964_v44 = vpop.xlane.xlu1 %963 }
 0x4c4   : > { %v965_v45 = vsub.f32 %v961_v39, %v964_v44 }
 0x4c6   : > { %v966_v47 = vmul.f32 1.442695, %v965_v45 }
 0x4c8   : > { %3407 = vpow2.f32 %v966_v47 }
 0x4ce   : > { %v3408_v53 = vpop.eup %3407 }
 0x4cf   : > { %v968_v55 = vsel %vm625_vm5, %v3408_v53, 0.0 }
 0x4d0   : > { %969 = vadd.xlane.f32.xlu2 %v968_v55  ;;  %v1076_v55 = vld [vmem:[#allocation2 + $0x80] sm:$0xff] }
 0x4db   : > { %v757_v4 = vpop.permute.xlu1 %756 }
 0x4dc   : > { %777 = vmatpush.msrb.mxu1 %v757_v4 }
 0x4dd   : > { %3143 = vmatmul.msk.f32.vlgmr.msrb.gmra.mxu1 %vm625_vm5, %v754_v5  ;;  %v3364_v5 = vld [vmem:[%s4271_s11 + $0x1] ss:$0 sm:$0xff] }
 0x4de   : > { %903 = vmatpush.msra.mxu1 %v883_v7 }
 0x4e0   : > { %1030 = vmatpush.msrb.mxu1 %v550_v15 }
 0x4e5   : > { %3148 = vmatmul.msk.f32.vlgmr.msra.gmra.mxu1 %vm625_vm5, %v881_v11 }
 0x4e8   : > { %986 = vrot.lane.b32.xlu2 %v3747_v49, %s4274_s18  ;;  %s458_s18 = sand.u32 1, %s3561_s22  }
 0x543   : > { %v970_v14 = vpop.xlane.xlu2 %969 }
 0x544   : > { %3409 = vrcp.f32 %v970_v14  ;;  %v982_v21 = vand.u32 2147483648, %v970_v14  ;;  %v980_v22 = vand.u32 2147483647, %v970_v14  ;;  %vm976_vm7 = vweird.f32 %v970_v14 }
 0x546   : > { %v983_v49 = vor.u32 1.1754944e-38, %v982_v21  ;;  %vm981_vm9 = vcmp.eq.f32.partialorder %v980_v22, 8.507059e+37  ;;  %v1090_v21 = vld [vmem:[#allocation2 + $0xc0] sm:$0xff] }
 0x54a   : > { %v3410_v16 = vpop.eup %3409 }
 0x54b   : > { %v972_v17 = vmul.f32 %v3410_v16, %v970_v14  ;;  %v987_v18 = vpop.permute.xlu2 %986  ;;  %vm977_vm4 = vweird.f32 %v3410_v16  ;;  %v3366_v14 = vld [vmem:[%s4265_s5 + $0x4] ss:$0 sm:$0xff] }
 0x54c   : > { %1007 = vmatpush.msra.mxu0 %v987_v18  ;;  %vm978_vm8 = vmor %vm976_vm7, %vm977_vm4  ;;  %v1092_v18 = vld [vmem:[#allocation2 + $0xd0] sm:$0xff] }
 0x54d   : > { %v973_v19 = vsub.f32 1.0, %v972_v17  ;;  %v1093_v17 = vld [vmem:[#allocation2 + $0xd8] sm:$0xff] }
 0x54e   : > { %1176 = vmatpush.msrb.mxu0 %v1093_v17 }
 0x54f   : > { %v974_v20 = vmul.f32 %v3410_v16, %v973_v19  ;;  %v1091_v19 = vld [vmem:[#allocation2 + $0xc8] sm:$0xff] }
 0x550   : > { %1177 = vmatpush.msrb.mxu0 %v1092_v18 }
 0x551   : > { %v975_v23 = vadd.f32 %v3410_v16, %v974_v20  ;;  %v1097_v20 = vld [vmem:[#allocation2 + $0xe0] sm:$0xff] }
 0x552   : > { %1178 = vmatpush.msrb.mxu0 %v1091_v19 }
 0x553   : > { %v979_v24 = vsel %vm978_vm8, %v3410_v16, %v975_v23 }
 0x554   : > { %v984_v25 = vsel %vm981_vm9, %v983_v49, %v979_v24  ;;  %1179 = vmatpush.msrb.mxu0 %v1090_v21  ;;  %v3863_v24 = vld [vmem:[%s4293_s19] ss:$0 sm:$0xff]  ;;  %s3127_s19 = sshll.u32 %s458_s18, 3 }
 0x555   : > { %v985_v26 = vmul.f32 %v3408_v53, %v984_v25  ;;  %v1077_v53 = vld [vmem:[#allocation2 + $0x88] sm:$0xff]  ;;  %vm486_vm13 = vcmp.gt.f32.partialorder %v3863_v24, 0.0  ;;  %s460_s2 = scalar_lea.vmem [#allocation5], %s3127_s19  ;;  %s3523_s19 = scalar_lea.hbm %s4272_s12, 16 }
 0x556   : > { %s3014_s25 = sshll.u32 %s460_s2, 4  ;;  %s3015_s25 = int_to_ptr.vmem [resolvable:$true] %s3014_s25 }
 0x557   : > { %3152 = vmatmul.msk.f32.vlgmr.msra.gmra.mxu0 %vm625_vm5, %v985_v26 }
 0x558   : > { %1396 = vmatpush.msra.mxu0 %v1097_v20 }
 0x55a   : > { %v779_v27 = vpop.f32.mrf.mxu1 }
 0x55b   : > { %3144 = vmatmul.msk.f32.vlgmr.msrb.gmra.mxu2 %vm625_vm5, %v779_v27 }
 0x55c   : > { %1121 = vmatpush.msrb.mxu2 %v1079_v51 }
 0x55e   : > { %1122 = vmatpush.msrb.mxu2 %v1078_v52 }
 0x560   : > { %1123 = vmatpush.msrb.mxu2 %v1077_v53 }
 0x562   : > { %v905_v28 = vpop.f32.mrf.mxu1  ;;  %1124 = vmatpush.msrb.mxu2 %v1076_v55 }
 0x563   : > { %3149 = vmatmul.msk.f32.vlgmr.msra.gmra.mxu2 %vm625_vm5, %v905_v28 }
 0x5d4   : > { %v1009_v29 = vpop.f32.mrf.mxu0 }
 0x5d5   : > { %3153 = vmatmul.msk.f32.vlgmr.msrb.gmra.mxu1 %vm625_vm5, %v1009_v29 }
 0x5de   : > { %v802_v30 = vpop.f32.mrf.mxu2 }
 0x5df   : > { %v826_v32 = vadd.f32 %v3790_v36, %v802_v30  ;;  %v1084_v36 = vld [vmem:[#allocation2 + $0xa8] sm:$0xff] }
 0x5e0   : > { %1152 = vmatpush.msrb.mxu3 %v1084_v36 }
 0x5e2   : > { %1153 = vmatpush.msrb.mxu3 %v1083_v43 }
 0x5e6   : > { %v928_v31 = vpop.f32.mrf.mxu2 }
 0x5e7   : > { %v931_v33 = vadd.f32 %v928_v31, %v826_v32 }
 0x652   : > { %v1032_v35 = vpop.f32.mrf.mxu1 }
 0x653   : > { %v1035_v37 = vadd.f32 %v1032_v35, %v931_v33 }
 0x655   : > { %v1039_v38 = vadd.f32 %v3362_v34, %v1035_v37  ;;  %v3367_v37 = vld [vmem:[%s4265_s5 + $0x6] ss:$0 sm:$0xff] }
 0x657   : > { %v3813_v39 = vadd.f32 %v1039_v38, %v3715_v0  ;;  %v3824_v0 = vld [vmem:[%s3821_s15] sm:$0xff] }
 0x658   : > { %3161 = vmatmul.msk.f32.vlgmr.msrb.gmra.mxu3 %vm489_vm0, %v3824_v0  ;;  %3163 = vmatmul.msk.f32.vlgmr.msrb.gmra.mxu0 %vm489_vm0, %v3824_v0 }
 0x659   : > { %v1045_v40 = vsel %vm489_vm0, %v3813_v39, 0.0 }
 0x65a   : > { %1046 = vadd.xlane.f32.xlu0 %v1045_v40 }
 0x660   : > { %3162 = vmatmul.msk.f32.gmra.mxu3 %vm489_vm0, %v479_v50  ;;  %3164 = vmatmul.msk.f32.gmra.mxu0 %vm489_vm0, %v479_v50 }
 0x6cd   : > { %v1047_v44 = vpop.xlane.xlu0 %1046 }
 0x6ce   : > { %v1048_v45 = vmul.f32 %v1047_v44, %v3719_v8 }
 0x6d0   : > { %v1049_v46 = vsub.f32 %v3813_v39, %v1048_v45 }
 0x6d2   : > { %v1050_v47 = vmul.f32 %v1049_v46, %v1049_v46 }
 0x6d4   : > { %v1051_v48 = vsel %vm489_vm0, %v1050_v47, 0.0 }
 0x6d5   : > { %1052 = vadd.xlane.f32.xlu1 %v1051_v48  ;;  %v1181_v35 = vpop.f32.mrf.mxu0 }
 0x6d6   : > { %v1182_v40 = vadd.f32 %v3367_v37, %v1181_v35 }
 0x6db   : > { %v1155_v9 = vpop.f32.mrf.mxu3 }
 0x6dc   : > { %v1156_v13 = vadd.f32 %v3365_v10, %v1155_v9 }
 0x6dd   : > { %v1184_v38 = vpop.f32.mrf.mxu0 }
 0x6de   : > { %v1185_v41 = vadd.f32 %v3367_v37, %v1184_v38 }
 0x6e0   : > { %1260 = vmatpush.msra.mxu2 %v1185_v41  ;;  %v3881_v42 = vpack.i.bf16 %v1182_v40, %v1185_v41 }
 0x6e2   : > { %1261 = vmatpush.msra.mxu2 %v1182_v40 }
 0x6e3   : > { %v1158_v11 = vpop.f32.mrf.mxu3 }
 0x6e4   : > { %v1159_v12 = vadd.f32 %v3365_v10, %v1158_v11 }
 0x6e6   : > { %3165 = vmatpush.xpose.msk.msra.mxu1 %vm625_vm5, %v1159_v12 }
 0x6ea   : > { %3166 = vmatpush.xpose.msk.msra.mxu1 %vm625_vm5, %v1156_v13 }
 0x6ee   : > { %1270 = vrot.lane.b32.xlu1 %v1159_v12, %s4278_s17 }
 0x6f6   : > { %1405 = vrot.lane.b32.xlu1 %v1159_v12, %s4291_s29 }
 0x6fe   : > { %1516 = vrot.lane.b32.xlu1 %v1159_v12, %s4292_s20 }
 0x748   : > { %v1053_v56 = vpop.xlane.xlu1 %1052 }
 0x749   : > { %v1054_v57 = vmul.f32 %v1053_v56, %v3719_v8 }
 0x74b   : > { %v1055_v58 = vadd.f32 1e-05, %v1054_v57 }
 0x74d   : > { %3411 = vrsqrt.f32 %v1055_v58  ;;  %vm1062_vm11 = vweird.f32 %v1055_v58 }
 0x753   : > { %v3412_v59 = vpop.eup %3411 }
 0x754   : > { %v1057_v60 = vmul.f32 %v3412_v59, %v1055_v58  ;;  %vm1063_vm10 = vweird.f32 %v3412_v59 }
 0x755   : > { %vm1064_vm12 = vmor %vm1062_vm11, %vm1063_vm10 }
 0x756   : > { %v1058_v61 = vmul.f32 %v3412_v59, %v1057_v60 }
 0x758   : > { %v1059_v62 = vmul.f32 0.5, %v1058_v61 }
 0x75a   : > { %v1060_v63 = vsub.f32 1.5, %v1059_v62 }
 0x75c   : > { %v1061_v1 = vmul.f32 %v3412_v59, %v1060_v63 }
 0x75e   : > { %v1065_v3 = vsel %vm1064_vm12, %v3412_v59, %v1061_v1 }
 0x75f   : > { %v1066_v4 = vmul.f32 %v1065_v3, %v1049_v46 }
 0x760   : > { %v1271_v22 = vpop.permute.xlu1 %1270 }
 0x761   : > { %v1070_v6 = vmul.f32 %v3363_v2, %v1066_v4  ;;  %3169 = vmatpush.xpose.msk.msrb.mxu1 %vm625_vm5, %v1271_v22 }
 0x763   : > { %v1074_v7 = vadd.f32 %v3364_v5, %v1070_v6 }
 0x765   : > { %3160 = vmatmul.msk.f32.vlgmr.msrb.gmra.mxu2 %vm489_vm0, %v1074_v7 }
 0x768   : > { %v1406_v23 = vpop.permute.xlu1 %1405 }
 0x770   : > { %v1517_v49 = vpop.permute.xlu1 %1516 }
 0x771   : > { %3180 = vmatpush.xpose.msk.msrb.mxu0 %vm625_vm5, %v1517_v49 }
 0x7e8   : > { %v1126_v15 = vpop.f32.mrf.mxu2 }
 0x7e9   : > { %v1127_v16 = vadd.f32 %v3366_v14, %v1126_v15 }
 0x7eb   : > { %3167 = vmatmul.msk.f32.vlgmr.msra.gmra.mxu1 %vm625_vm5, %v1127_v16 }
 0x868   : > { %v1213_v25 = vpop.f32.mrf.mxu1 }
 0x869   : > { %v1216_v26 = vmul.f32 0.35355338, %v1213_v25 }
 0x86b   : > { %v1217_v27 = vsel %vm486_vm13, %v1216_v26, -1e+09 }
 0x86c   : > { %v1219_v28 = vsel %vm1218_vm14, %v1217_v27, -inf }
 0x86d   : > { %1220 = vmax.xlane.f32.xlu2 %v1219_v28 }
 0x885   : > { %1268 = vrot.lane.b32.xlu2 %v1156_v13, %s4278_s17 }
 0x88d   : > { %1401 = vrot.lane.b32.xlu2 %v1127_v16, %s4291_s29 }
 0x895   : > { %1512 = vrot.lane.b32.xlu2 %v1127_v16, %s4292_s20 }
 0x8e0   : > { %v1221_v29 = vpop.xlane.xlu2 %1220 }
 0x8e1   : > { %v1222_v30 = vsub.f32 %v1217_v27, %v1221_v29 }
 0x8e3   : > { %v1223_v31 = vmul.f32 1.442695, %v1222_v30 }
 0x8e5   : > { %3413 = vpow2.f32 %v1223_v31 }
 0x8e8   : > { %v1269_v32 = vpop.permute.xlu2 %1268 }
 0x8e9   : > { %3170 = vmatpush.xpose.msk.msrb.mxu1 %vm625_vm5, %v1269_v32 }
 0x8eb   : > { %v3414_v33 = vpop.eup %3413 }
 0x8ec   : > { %v1225_v34 = vsel %vm1218_vm14, %v3414_v33, 0.0 }
 0x8ed   : > { %3175 = vmatpush.xpose.msk.msra.mxu1 %vm625_vm5, %v1406_v23  ;;  %1226 = vadd.xlane.f32.xlu0 %v1225_v34 }
 0x8f0   : > { %v1402_v57 = vpop.permute.xlu2 %1401 }
 0x8f8   : > { %v1513_v3 = vpop.permute.xlu2 %1512 }
 0x901   : > { %1266 = vrot.lane.b32.xlu0 %v1127_v16, %s4278_s17 }
 0x909   : > { %1403 = vrot.lane.b32.xlu0 %v1156_v13, %s4291_s29 }
 0x911   : > { %1514 = vrot.lane.b32.xlu0 %v1156_v13, %s4292_s20 }
 0x960   : > { %v1227_v36 = vpop.xlane.xlu0 %1226 }
 0x961   : > { %3415 = vrcp.f32 %v1227_v36  ;;  %v1239_v45 = vand.u32 2147483648, %v1227_v36  ;;  %v1237_v47 = vand.u32 2147483647, %v1227_v36  ;;  %vm1233_vm1 = vweird.f32 %v1227_v36 }
 0x963   : > { %v1240_v50 = vor.u32 1.1754944e-38, %v1239_v45  ;;  %vm1238_vm3 = vcmp.eq.f32.partialorder %v1237_v47, 8.507059e+37 }
 0x967   : > { %v3416_v43 = vpop.eup %3415 }
 0x968   : > { %v1229_v0 = vmul.f32 %v3416_v43, %v1227_v36  ;;  %vm1234_vm15 = vweird.f32 %v3416_v43 }
 0x969   : > { %vm1235_vm2 = vmor %vm1233_vm1, %vm1234_vm15 }
 0x96a   : > { %v1230_v44 = vsub.f32 1.0, %v1229_v0 }
 0x96c   : > { %v1231_v46 = vmul.f32 %v3416_v43, %v1230_v44 }
 0x96e   : > { %v1232_v48 = vadd.f32 %v3416_v43, %v1231_v46 }
 0x970   : > { %v1236_v51 = vsel %vm1235_vm2, %v3416_v43, %v1232_v48 }
 0x971   : > { %v1241_v52 = vsel %vm1238_vm3, %v1240_v50, %v1236_v51 }
 0x972   : > { %v1242_v53 = vmul.f32 %v3414_v33, %v1241_v52 }
 0x973   : > { %v1267_v55 = vpop.permute.xlu0 %1266 }
 0x974   : > { %3168 = vmatmul.msk.f32.vlgmr.msra.gmra.mxu2 %vm1218_vm14, %v1242_v53  ;;  %3171 = vmatmul.msk.f32.vlgmr.msrb.gmra.mxu1 %vm625_vm5, %v1267_v55 }
 0x97b   : > { %v1404_v56 = vpop.permute.xlu0 %1403 }
 0x97c   : > { %3176 = vmatpush.xpose.msk.msra.mxu1 %vm625_vm5, %v1404_v56 }
 0x97f   : > { %3177 = vmatmul.msk.f32.vlgmr.msra.gmra.mxu1 %vm625_vm5, %v1402_v57 }
 0x983   : > { %v1515_v58 = vpop.permute.xlu0 %1514 }
 0x984   : > { %3181 = vmatpush.xpose.msk.msrb.mxu0 %vm625_vm5, %v1515_v58 }
 0x9f1   : > { %v1295_v59 = vpop.f32.mrf.mxu1 }
 0x9f2   : > { %v1298_v60 = vmul.f32 0.35355338, %v1295_v59 }
 0x9f4   : > { %v1299_v61 = vsel %vm486_vm13, %v1298_v60, -1e+09  ;;  %v1098_v60 = vld [vmem:[#allocation2 + $0xe8] sm:$0xff] }
 0x9f5   : > { %v1300_v62 = vsel %vm1218_vm14, %v1299_v61, -inf  ;;  %1373 = vmatpush.msra.mxu3 %v1098_v60  ;;  %v1695_v60 = vld [vmem:[%s4268_s8 + $0x8] sm:$0xff] }
 0x9f6   : > { %1301 = vmax.xlane.f32.xlu1 %v1300_v62  ;;  %v1100_v62 = vld [vmem:[#allocation2 + $0xf8] sm:$0xff] }
 0x9f7   : > { %v1263_v63 = vpop.f32.mrf.mxu2 }
 0x9f8   : > { %3174 = vmatmul.msk.f32.vlgmr.msra.gmra.mxu0 %vm625_vm5, %v1263_v63 }
 0x9fc   : > { %v1430_v1 = vpop.f32.mrf.mxu1 }
 0x9fd   : > { %v1433_v2 = vmul.f32 0.35355338, %v1430_v1 }
 0x9ff   : > { %v1434_v4 = vsel %vm486_vm13, %v1433_v2, -1e+09 }
 0xa00   : > { %3182 = vmatmul.msk.f32.vlgmr.msrb.gmra.mxu0 %vm625_vm5, %v1513_v3  ;;  %v1435_v5 = vsel %vm1218_vm14, %v1434_v4, -inf }
 0xa01   : > { %1436 = vmax.xlane.f32.xlu0 %v1435_v5 }
 0xa69   : > { %v1302_v6 = vpop.xlane.xlu1 %1301 }
 0xa6a   : > { %v1303_v7 = vsub.f32 %v1299_v61, %v1302_v6  ;;  %v1099_v61 = vld [vmem:[#allocation2 + $0xf0] sm:$0xff] }
 0xa6b   : > { %1506 = vmatpush.msrb.mxu3 %v1099_v61  ;;  %v1694_v61 = vld [vmem:[%s4268_s8] sm:$0xff] }
 0xa6c   : > { %v1304_v9 = vmul.f32 1.442695, %v1303_v7 }
 0xa6e   : > { %3417 = vpow2.f32 %v1304_v9 }
 0xa74   : > { %v3418_v10 = vpop.eup %3417  ;;  %v1437_v11 = vpop.xlane.xlu0 %1436 }
 0xa75   : > { %v1438_v12 = vsub.f32 %v1434_v4, %v1437_v11  ;;  %v3896_v13 = vpop.f32.mrf.mxu0  ;;  %v1306_v14 = vsel %vm1218_vm14, %v3418_v10, 0.0 }
 0xa76   : > { %1307 = vadd.xlane.f32.xlu1 %v1306_v14 }
 0xa77   : > { %v1439_v15 = vmul.f32 1.442695, %v1438_v12 }
 0xa79   : > { %3419 = vpow2.f32 %v1439_v15 }
 0xa7d   : > { %v1541_v16 = vpop.f32.mrf.mxu0 }
 0xa7e   : > { %v1544_v17 = vmul.f32 0.35355338, %v1541_v16 }
 0xa7f   : > { %v3420_v18 = vpop.eup %3419 }
 0xa80   : > { %v1441_v19 = vsel %vm1218_vm14, %v3420_v18, 0.0  ;;  %v1545_v21 = vsel %vm486_vm13, %v1544_v17, -1e+09 }
 0xa81   : > { %1442 = vadd.xlane.f32.xlu0 %v1441_v19  ;;  %v1546_v20 = vsel %vm1218_vm14, %v1545_v21, -inf }
 0xa82   : > { %1547 = vmax.xlane.f32.xlu2 %v1546_v20 }
 0xa8f   : > { %3327 = vrot.lane.b32.xlu1 %v3881_v42, %s4278_s17  ;;  %s3002_s17 = scalar_lea.sflag [#allocation4], %s458_s18 }
 0xa95   : > { %3332 = vrot.lane.b32.xlu0 %v3881_v42, %s4291_s29 }
 0xae9   : > { %v1308_v22 = vpop.xlane.xlu1 %1307 }
 0xaea   : > { %3421 = vrcp.f32 %v1308_v22  ;;  %v1320_v33 = vand.u32 2147483648, %v1308_v22  ;;  %vm1314_vm7 = vweird.f32 %v1308_v22  ;;  %v1318_v35 = vand.u32 2147483647, %v1308_v22 }
 0xaec   : > { %v1321_v41 = vor.u32 1.1754944e-38, %v1320_v33  ;;  %vm1319_vm9 = vcmp.eq.f32.partialorder %v1318_v35, 8.507059e+37  ;;  %v1665_v33 = vld [vmem:[%s4266_s6 + $0x18] sm:$0xff]  ;;  %v1662_v35 = vld [vmem:[%s4266_s6] sm:$0xff] }
 0xaf0   : > { %v3422_v23 = vpop.eup %3421 }
 0xaf1   : > { %v1310_v49 = vmul.f32 %v3422_v23, %v1308_v22  ;;  %vm1315_vm4 = vweird.f32 %v3422_v23 }
 0xaf2   : > { %vm1316_vm8 = vmor %vm1314_vm7, %vm1315_vm4 }
 0xaf3   : > { %v1311_v25 = vsub.f32 1.0, %v1310_v49 }
 0xaf4   : > { %v1443_v26 = vpop.xlane.xlu0 %1442 }
 0xaf5   : > { %3423 = vrcp.f32 %v1443_v26  ;;  %v1548_v27 = vpop.xlane.xlu2 %1547  ;;  %v1312_v29 = vmul.f32 %v3422_v23, %v1311_v25  ;;  %v1455_v47 = vand.u32 2147483648, %v1443_v26  ;;  %vm1449_vm11 = vweird.f32 %v1443_v26 }
 0xaf6   : > { %v1549_v28 = vsub.f32 %v1545_v21, %v1548_v27  ;;  %v1453_v50 = vand.u32 2147483647, %v1443_v26 }
 0xaf7   : > { %v1313_v32 = vadd.f32 %v3422_v23, %v1312_v29  ;;  %v1456_v55 = vor.u32 1.1754944e-38, %v1455_v47 }
 0xaf8   : > { %v1550_v30 = vmul.f32 1.442695, %v1549_v28  ;;  %vm1454_vm15 = vcmp.eq.f32.partialorder %v1453_v50, 8.507059e+37 }
 0xaf9   : > { %v1317_v38 = vsel %vm1316_vm8, %v3422_v23, %v1313_v32  ;;  %v3368_v23 = vld [vmem:[%s4265_s5 + $0x7] ss:$0 sm:$0xff] }
 0xafa   : > { %3425 = vpow2.f32 %v1550_v30  ;;  %v1322_v44 = vsel %vm1319_vm9, %v1321_v41, %v1317_v38  ;;  %v1700_v38 = vld [vmem:[%s4268_s8 + $0x30] sm:$0xff] }
 0xafb   : > { %v3424_v31 = vpop.eup %3423  ;;  %v1323_v51 = vmul.f32 %v3418_v10, %v1322_v44  ;;  %v1697_v44 = vld [vmem:[%s4268_s8 + $0x18] sm:$0xff] }
 0xafc   : > { %v1445_v34 = vmul.f32 %v3424_v31, %v1443_v26  ;;  %vm1450_vm10 = vweird.f32 %v3424_v31 }
 0xafd   : > { %vm1451_vm12 = vmor %vm1449_vm11, %vm1450_vm10  ;;  %vm1706_vm10 = vcmask 523264  }
 0xafe   : > { %v1446_v37 = vsub.f32 1.0, %v1445_v34  ;;  %v1663_v34 = vld [vmem:[%s4266_s6 + $0x8] sm:$0xff] }
 0xb00   : > { %v3426_v40 = vpop.eup %3425  ;;  %v1447_v36 = vmul.f32 %v3424_v31, %v1446_v37  ;;  %v1701_v37 = vld [vmem:[%s4268_s8 + $0x38] sm:$0xff] }
 0xb01   : > { %v3328_v43 = vpop.permute.xlu1 %3327  ;;  %v1552_v0 = vsel %vm1218_vm14, %v3426_v40, 0.0  ;;  %1718 = vmatpush.msra.mxu0 %v1701_v37  ;;  %v3374_v37 = vld [vmem:[%s4271_s11 + $0x3] ss:$0 sm:$0xff] }
 0xb02   : > { %v3329_v45 = vunpack.i.l.bf16 %v3328_v43  ;;  %1553 = vadd.xlane.f32.xlu2 %v1552_v0  ;;  %v1448_v46 = vadd.f32 %v3424_v31, %v1447_v36  ;;  %v3330_v48 = vunpack.i.h.bf16 %v3328_v43  ;;  %v1698_v43 = vld [vmem:[%s4268_s8 + $0x20] sm:$0xff] }
 0xb03   : > { %1719 = vmatpush.msra.mxu0 %v1700_v38 }
 0xb04   : > { %1349 = vmatpush.msrb.mxu2 %v3329_v45  ;;  %v1452_v52 = vsel %vm1451_vm12, %v3424_v31, %v1448_v46 }
 0xb05   : > { %v1457_v57 = vsel %vm1454_vm15, %v1456_v55, %v1452_v52  ;;  %v3369_v52 = vld [vmem:[%s4270_s10 + $0x2] ss:$0 sm:$0xff] }
 0xb06   : > { %1350 = vmatpush.msrb.mxu2 %v3330_v48  ;;  %v1458_v59 = vmul.f32 %v3420_v18, %v1457_v57 }
 0xb07   : > { %v3333_v53 = vpop.permute.xlu0 %3332  ;;  %3172 = vmatmul.msk.f32.vlgmr.msrb.gmra.mxu2 %vm1218_vm14, %v1323_v51 }
 0xb08   : > { %v3334_v56 = vunpack.i.l.bf16 %v3333_v53  ;;  %v3335_v58 = vunpack.i.h.bf16 %v3333_v53 }
 0xb0a   : > { %1482 = vmatpush.msra.mxu2 %v3334_v56  ;;  %v3370_v56 = vld [vmem:[%s4271_s11 + $0x2] ss:$0 sm:$0xff] }
 0xb0c   : > { %1483 = vmatpush.msra.mxu2 %v3335_v58 }
 0xb0e   : > { %1617 = vmatpush.msrb.mxu2 %v1100_v62  ;;  %v3371_v62 = vld [vmem:[%s4267_s7] ss:$0 sm:$0xff] }
 0xb0f   : > { %3178 = vmatmul.msk.f32.vlgmr.msra.gmra.mxu2 %vm1218_vm14, %v1458_v59  ;;  %v1696_v59 = vld [vmem:[%s4268_s8 + $0x10] sm:$0xff] }
 0xb1a   : > { %3337 = vrot.lane.b32.xlu2 %v3881_v42, %s4292_s20 }
 0xb75   : > { %v1554_v63 = vpop.xlane.xlu2 %1553 }
 0xb76   : > { %3427 = vrcp.f32 %v1554_v63  ;;  %v1566_v6 = vand.u32 2147483648, %v1554_v63  ;;  %v1564_v10 = vand.u32 2147483647, %v1554_v63  ;;  %vm1560_vm2 = vweird.f32 %v1554_v63 }
 0xb78   : > { %v1567_v11 = vor.u32 1.1754944e-38, %v1566_v6  ;;  %vm1565_vm4 = vcmp.eq.f32.partialorder %v1564_v10, 8.507059e+37 }
 0xb7c   : > { %v3428_v1 = vpop.eup %3427 }
 0xb7d   : > { %v1556_v2 = vmul.f32 %v3428_v1, %v1554_v63  ;;  %v3338_v3 = vpop.permute.xlu2 %3337  ;;  %vm1561_vm1 = vweird.f32 %v3428_v1 }
 0xb7e   : > { %v3339_v4 = vunpack.i.l.bf16 %v3338_v3  ;;  %v3340_v7 = vunpack.i.h.bf16 %v3338_v3  ;;  %vm1562_vm3 = vmor %vm1560_vm2, %vm1561_vm1  ;;  %v3372_v3 = vld [vmem:[%s4269_s9] ss:$0 sm:$0xff] }
 0xb7f   : > { %v1557_v5 = vsub.f32 1.0, %v1556_v2 }
 0xb80   : > { %1593 = vmatpush.msrb.mxu1 %v3339_v4 }
 0xb81   : > { %v1558_v9 = vmul.f32 %v3428_v1, %v1557_v5 }
 0xb82   : > { %1594 = vmatpush.msrb.mxu1 %v3340_v7 }
 0xb83   : > { %v1559_v42 = vadd.f32 %v3428_v1, %v1558_v9 }
 0xb85   : > { %v1563_v12 = vsel %vm1562_vm3, %v3428_v1, %v1559_v42 }
 0xb86   : > { %v1568_v14 = vsel %vm1565_vm4, %v1567_v11, %v1563_v12 }
 0xb87   : > { %v1569_v15 = vmul.f32 %v3426_v40, %v1568_v14  ;;  %v1699_v40 = vld [vmem:[%s4268_s8 + $0x28] sm:$0xff]  ;;  %v1769_v14 = vld [vmem:[#allocation2 + $0x118] sm:$0xff] }
 0xb88   : > { %1720 = vmatpush.msra.mxu0 %v1699_v40  ;;  %1811 = vmatpush.msra.mxu1 %v1769_v14 }
 0xb89   : > { %3183 = vmatmul.msk.f32.vlgmr.msrb.gmra.mxu1 %vm1218_vm14, %v1569_v15  ;;  %v1776_v15 = vld [vmem:[#allocation2 + $0x138] sm:$0xff] }
 0xb8a   : > { %v1352_v16 = vpop.f32.mrf.mxu2  ;;  %1721 = vmatpush.msra.mxu0 %v1698_v43  ;;  %1834 = vmatpush.msra.mxu2 %v1776_v15  ;;  %v3375_v43 = vld [vmem:[%s4265_s5 + $0x8] ss:$0 sm:$0xff] }
 0xb8b   : > { %3173 = vmatmul.msk.f32.vlgmr.msra.gmra.mxu3 %vm625_vm5, %v1352_v16  ;;  %v1783_v16 = vld [vmem:[#allocation2 + $0x158] sm:$0xff] }
 0xb8c   : > { %1685 = vmatpush.msra.mxu3 %v1665_v33  ;;  %1722 = vmatpush.msra.mxu0 %v1697_v44 }
 0xb8e   : > { %1723 = vmatpush.msra.mxu0 %v1696_v59 }
 0xb90   : > { %1724 = vmatpush.msra.mxu0 %v1695_v60 }
 0xb92   : > { %v1485_v17 = vpop.f32.mrf.mxu2  ;;  %1725 = vmatpush.msra.mxu0 %v1694_v61 }
 0xb93   : > { %3179 = vmatmul.msk.f32.vlgmr.msrb.gmra.mxu3 %vm625_vm5, %v1485_v17  ;;  %v1768_v17 = vld [vmem:[#allocation2 + $0x110] sm:$0xff] }
 0xb94   : > { %1812 = vmatpush.msra.mxu1 %v1768_v17 }
 0xc06   : > { %v1596_v18 = vpop.f32.mrf.mxu1 }
 0xc07   : > { %3184 = vmatmul.msk.f32.vlgmr.msrb.gmra.mxu2 %vm625_vm5, %v1596_v18  ;;  %v1775_v18 = vld [vmem:[#allocation2 + $0x130] sm:$0xff] }
 0xc08   : > { %1835 = vmatpush.msra.mxu2 %v1775_v18 }
 0xc0e   : > { %v1375_v19 = vpop.f32.mrf.mxu3 }
 0xc0f   : > { %v1399_v20 = vadd.f32 %v3896_v13, %v1375_v19  ;;  %v1782_v19 = vld [vmem:[#allocation2 + $0x150] sm:$0xff] }
 0xc16   : > { %v1508_v21 = vpop.f32.mrf.mxu3 }
 0xc17   : > { %v1511_v22 = vadd.f32 %v1508_v21, %v1399_v20  ;;  %v1767_v21 = vld [vmem:[#allocation2 + $0x108] sm:$0xff] }
 0xc18   : > { %v1774_v20 = vld [vmem:[#allocation2 + $0x128] sm:$0xff]  ;;  %1813 = vmatpush.msra.mxu1 %v1767_v21 }
 0xc19   : > { %1836 = vmatpush.msra.mxu2 %v1774_v20 }
 0xc8a   : > { %v1619_v49 = vpop.f32.mrf.mxu2 }
 0xc8b   : > { %v1622_v25 = vadd.f32 %v1619_v49, %v1511_v22  ;;  %v1781_v22 = vld [vmem:[#allocation2 + $0x148] sm:$0xff]  ;;  %v1773_v49 = vld [vmem:[#allocation2 + $0x120] sm:$0xff] }
 0xc8c   : > { %1837 = vmatpush.msra.mxu2 %v1773_v49 }
 0xc8d   : > { %v1626_v26 = vadd.f32 %v3368_v23, %v1622_v25  ;;  %v1766_v23 = vld [vmem:[#allocation2 + $0x100] sm:$0xff] }
 0xc8e   : > { %v1780_v25 = vld [vmem:[#allocation2 + $0x140] sm:$0xff]  ;;  %1814 = vmatpush.msra.mxu1 %v1766_v23 }
 0xc8f   : > { %v1627_v27 = vadd.f32 %v1626_v26, %v3813_v39  ;;  %v1664_v39 = vld [vmem:[%s4266_s6 + $0x10] sm:$0xff] }
 0xc90   : > { %1686 = vmatpush.msra.mxu3 %v1664_v39  ;;  %v3373_v39 = vld [vmem:[%s4270_s10 + $0x3] ss:$0 sm:$0xff] }
 0xc91   : > { %v1632_v28 = vsel %vm489_vm0, %v1627_v27, 0.0 }
 0xc92   : > { %1633 = vadd.xlane.f32.xlu0 %v1632_v28  ;;  %1687 = vmatpush.msra.mxu3 %v1663_v34 }
 0xc94   : > { %1688 = vmatpush.msra.mxu3 %v1662_v35 }
 0xc96   : > { %1857 = vmatpush.msrb.mxu3 %v1783_v16 }
 0xc98   : > { %1858 = vmatpush.msrb.mxu3 %v1782_v19 }
 0xc9a   : > { %1859 = vmatpush.msrb.mxu3 %v1781_v22 }
 0xc9c   : > { %1860 = vmatpush.msrb.mxu3 %v1780_v25 }
 0xd05   : > { %v1634_v29 = vpop.xlane.xlu0 %1633 }
 0xd06   : > { %v1635_v30 = vmul.f32 %v1634_v29, %v3719_v8 }
 0xd08   : > { %v1636_v31 = vsub.f32 %v1627_v27, %v1635_v30 }
 0xd0a   : > { %v1637_v32 = vmul.f32 %v1636_v31, %v1636_v31 }
 0xd0c   : > { %v1638_v13 = vsel %vm489_vm0, %v1637_v32, 0.0 }
 0xd0d   : > { %1639 = vadd.xlane.f32.xlu1 %v1638_v13 }
 0xd80   : > { %v1640_v41 = vpop.xlane.xlu1 %1639 }
 0xd81   : > { %v1641_v36 = vmul.f32 %v1640_v41, %v3719_v8  ;;  %v3376_v41 = vld [vmem:[%s4265_s5 + $0x9] ss:$0 sm:$0xff] }
 0xd83   : > { %v1642_v0 = vadd.f32 1e-05, %v1641_v36  ;;  %v3377_v36 = vld [vmem:[%s4265_s5 + $0xa] ss:$0 sm:$0xff] }
 0xd85   : > { %3429 = vrsqrt.f32 %v1642_v0  ;;  %vm1649_vm8 = vweird.f32 %v1642_v0 }
 0xd8b   : > { %v3430_v45 = vpop.eup %3429 }
 0xd8c   : > { %v1644_v46 = vmul.f32 %v3430_v45, %v1642_v0  ;;  %vm1650_vm7 = vweird.f32 %v3430_v45 }
 0xd8d   : > { %vm1651_vm9 = vmor %vm1649_vm8, %vm1650_vm7 }
 0xd8e   : > { %v1645_v47 = vmul.f32 %v3430_v45, %v1644_v46 }
 0xd90   : > { %v1646_v48 = vmul.f32 0.5, %v1645_v47 }
 0xd92   : > { %v1647_v50 = vsub.f32 1.5, %v1646_v48 }
 0xd94   : > { %v1648_v51 = vmul.f32 %v3430_v45, %v1647_v50 }
 0xd96   : > { %v1652_v53 = vsel %vm1651_vm9, %v3430_v45, %v1648_v51 }
 0xd97   : > { %v1653_v55 = vmul.f32 %v1652_v53, %v1636_v31 }
 0xd99   : > { %v1657_v57 = vmul.f32 %v3369_v52, %v1653_v55 }
 0xd9b   : > { %v1661_v58 = vadd.f32 %v3370_v56, %v1657_v57 }
 0xd9d   : > { %3187 = vmatmul.msk.f32.vlgmr.msra.gmra.mxu3 %vm489_vm0, %v1661_v58 }
 0xe20   : > { %v1690_v63 = vpop.f32.mrf.mxu3 }
 0xe21   : > { %v1691_v1 = vadd.f32 %v3371_v62, %v1690_v63 }
 0xe23   : > { %v1693_v2 = vmax.f32 %v1691_v1, 0.0  ;;  %v1787_v1 = vld [vmem:[#allocation2 + $0x160] sm:$0xff] }
 0xe25   : > { %3188 = vmatmul.msk.f32.vlgmr.msra.gmra.mxu0 %vm1706_vm10, %v1693_v2 }
 0xea2   : > { %v1727_v4 = vpop.f32.mrf.mxu0 }
 0xea3   : > { %v1728_v5 = vadd.f32 %v3372_v3, %v1727_v4 }
 0xea5   : > { %v3975_v6 = vadd.f32 %v1728_v5, %v1627_v27 }
 0xea7   : > { %v1735_v7 = vsel %vm489_vm0, %v3975_v6, 0.0 }
 0xea8   : > { %1736 = vadd.xlane.f32.xlu2 %v1735_v7 }
 0xf1b   : > { %v1737_v9 = vpop.xlane.xlu2 %1736 }
 0xf1c   : > { %v1738_v10 = vmul.f32 %v1737_v9, %v3719_v8 }
 0xf1e   : > { %v1739_v42 = vsub.f32 %v3975_v6, %v1738_v10 }
 0xf20   : > { %v1740_v11 = vmul.f32 %v1739_v42, %v1739_v42 }
 0xf22   : > { %v1741_v12 = vsel %vm489_vm0, %v1740_v11, 0.0 }
 0xf23   : > { %1742 = vadd.xlane.f32.xlu0 %v1741_v12 }
 0xf96   : > { %v1743_v26 = vpop.xlane.xlu0 %1742 }
 0xf97   : > { %v1744_v27 = vmul.f32 %v1743_v26, %v3719_v8 }
 0xf99   : > { %v1745_v28 = vadd.f32 1e-05, %v1744_v27 }
 0xf9b   : > { %3431 = vrsqrt.f32 %v1745_v28  ;;  %vm1752_vm12 = vweird.f32 %v1745_v28 }
 0xfa1   : > { %v3432_v29 = vpop.eup %3431 }
 0xfa2   : > { %v1747_v30 = vmul.f32 %v3432_v29, %v1745_v28  ;;  %vm1753_vm11 = vweird.f32 %v3432_v29 }
 0xfa3   : > { %vm1754_vm15 = vmor %vm1752_vm12, %vm1753_vm11 }
 0xfa4   : > { %v1748_v31 = vmul.f32 %v3432_v29, %v1747_v30 }
 0xfa6   : > { %v1749_v32 = vmul.f32 0.5, %v1748_v31 }
 0xfa8   : > { %v1750_v13 = vsub.f32 1.5, %v1749_v32 }
 0xfaa   : > { %v1751_v33 = vmul.f32 %v3432_v29, %v1750_v13 }
 0xfac   : > { %v1755_v34 = vsel %vm1754_vm15, %v3432_v29, %v1751_v33 }
 0xfad   : > { %v1756_v35 = vmul.f32 %v1755_v34, %v1739_v42 }
 0xfaf   : > { %v1760_v38 = vmul.f32 %v3373_v39, %v1756_v35 }
 0xfb1   : > { %v1764_v40 = vadd.f32 %v3374_v37, %v1760_v38 }
 0xfb3   : > { %3195 = vmatmul.msk.f32.vlgmr.msra.gmra.mxu1 %vm489_vm0, %v1764_v40  ;;  %3196 = vmatmul.msk.f32.vlgmr.msra.gmra.mxu2 %vm489_vm0, %v1764_v40 }
 0xfb4   : > { %3197 = vmatmul.msk.f32.vlgmr.msrb.gmra.mxu3 %vm489_vm0, %v1764_v40 }
0x1030   : > { %v1816_v44 = vpop.f32.mrf.mxu1 }
0x1031   : > { %v1817_v48 = vadd.f32 %v3375_v43, %v1816_v44 }
0x1036   : > { %v1839_v0 = vpop.f32.mrf.mxu2 }
0x1037   : > { %v1840_v45 = vadd.f32 %v3376_v41, %v1839_v0  ;;  %v1862_v46 = vpop.f32.mrf.mxu3 }
0x1038   : > { %v4001_v47 = vadd.f32 %v3377_v36, %v1862_v46 }
0x1039   : > { %1942 = vrot.lane.b32.xlu0 %v1840_v45, %s4294_s26  ;;  %3198 = vmatpush.xpose.msk.msrb.mxu1 %vm625_vm5, %v1840_v45 }
0x103a   : > { %1935 = vmatpush.msrb.mxu2 %v4001_v47 }
0x103c   : > { %3199 = vmatmul.msk.f32.vlgmr.msrb.gmra.mxu1 %vm625_vm5, %v1817_v48  ;;  %2062 = vmatpush.msra.mxu2 %v1787_v1 }
0x103d   : > { %2039 = vmatpush.msra.mxu1 %v1788_v54 }
0x1041   : > { %2171 = vrot.lane.b32.xlu0 %v1817_v48, %s4292_s20 }
0x1049   : > { %2069 = vrot.lane.b32.xlu0 %v1840_v45, %s4291_s29 }
0x10ab   : > { %v1943_v50 = vpop.permute.xlu0 %1942 }
0x10ac   : > { %3201 = vmatpush.xpose.msk.msra.mxu3 %vm625_vm5, %v1943_v50 }
0x10b3   : > { %v2172_v51 = vpop.permute.xlu0 %2171 }
0x10b9   : > { %v1888_v52 = vpop.f32.mrf.mxu1 }
0x10ba   : > { %v1891_v53 = vmul.f32 0.35355338, %v1888_v52 }
0x10bb   : > { %v2070_v55 = vpop.permute.xlu0 %2069 }
0x10bc   : > { %3206 = vmatpush.xpose.msk.msrb.mxu3 %vm625_vm5, %v2070_v55  ;;  %v1892_v56 = vsel %vm481_vm6, %v1891_v53, -1e+09 }
0x10bd   : > { %v1893_v57 = vsel %vm625_vm5, %v1892_v56, -inf }
0x10be   : > { %1894 = vmax.xlane.f32.xlu1 %v1893_v57 }
0x10d7   : > { %1940 = vrot.lane.b32.xlu1 %v1817_v48, %s4294_s26 }
0x1131   : > { %v1895_v58 = vpop.xlane.xlu1 %1894 }
0x1132   : > { %v1896_v59 = vsub.f32 %v1892_v56, %v1895_v58 }
0x1134   : > { %v1897_v60 = vmul.f32 1.442695, %v1896_v59 }
0x1136   : > { %3433 = vpow2.f32 %v1897_v60 }
0x113c   : > { %v3434_v61 = vpop.eup %3433 }
0x113d   : > { %v1899_v62 = vsel %vm625_vm5, %v3434_v61, 0.0 }
0x113e   : > { %1900 = vadd.xlane.f32.xlu2 %v1899_v62 }
0x1149   : > { %v1941_v63 = vpop.permute.xlu1 %1940 }
0x114a   : > { %3202 = vmatmul.msk.f32.vlgmr.msra.gmra.mxu3 %vm625_vm5, %v1941_v63 }
0x1156   : > { %2173 = vrot.lane.b32.xlu2 %v1840_v45, %s4292_s20 }
0x115e   : > { %2067 = vrot.lane.b32.xlu2 %v1817_v48, %s4291_s29 }
0x11b1   : > { %v1901_v2 = vpop.xlane.xlu2 %1900 }
0x11b2   : > { %3435 = vrcp.f32 %v1901_v2  ;;  %v1913_v9 = vand.u32 2147483648, %v1901_v2  ;;  %v1911_v42 = vand.u32 2147483647, %v1901_v2  ;;  %vm1907_vm2 = vweird.f32 %v1901_v2 }
0x11b4   : > { %v1914_v12 = vor.u32 1.1754944e-38, %v1913_v9  ;;  %vm1912_vm4 = vcmp.eq.f32.partialorder %v1911_v42, 8.507059e+37 }
0x11b8   : > { %v3436_v3 = vpop.eup %3435 }
0x11b9   : > { %v1903_v4 = vmul.f32 %v3436_v3, %v1901_v2  ;;  %v2174_v5 = vpop.permute.xlu2 %2173  ;;  %vm1908_vm1 = vweird.f32 %v3436_v3 }
0x11ba   : > { %vm1909_vm3 = vmor %vm1907_vm2, %vm1908_vm1 }
0x11bb   : > { %v1904_v7 = vsub.f32 1.0, %v1903_v4 }
0x11bd   : > { %v1905_v10 = vmul.f32 %v3436_v3, %v1904_v7 }
0x11bf   : > { %v1906_v11 = vadd.f32 %v3436_v3, %v1905_v10 }
0x11c1   : > { %v1910_v14 = vsel %vm1909_vm3, %v3436_v3, %v1906_v11  ;;  %v2068_v15 = vpop.permute.xlu2 %2067 }
0x11c2   : > { %v1915_v16 = vsel %vm1912_vm4, %v1914_v12, %v1910_v14  ;;  %3207 = vmatmul.msk.f32.vlgmr.msrb.gmra.mxu3 %vm625_vm5, %v2068_v15  ;;  %v1789_v15 = vld [vmem:[#allocation2 + $0x170] sm:$0xff] }
0x11c3   : > { %v1916_v17 = vmul.f32 %v3434_v61, %v1915_v16  ;;  %2165 = vmatpush.msrb.mxu1 %v1789_v15  ;;  %v1790_v16 = vld [vmem:[#allocation2 + $0x178] sm:$0xff] }
0x11c5   : > { %3200 = vmatmul.msk.f32.vlgmr.msrb.gmra.mxu2 %vm625_vm5, %v1916_v17 }
0x11c6   : > { %3210 = vmatpush.xpose.msk.msrb.mxu2 %vm625_vm5, %v2174_v5 }
0x11cd   : > { %v1965_v18 = vpop.f32.mrf.mxu3 }
0x11ce   : > { %v1968_v19 = vmul.f32 0.35355338, %v1965_v18 }
0x11d0   : > { %v1969_v21 = vsel %vm481_vm6, %v1968_v19, -1e+09 }
0x11d1   : > { %v1970_v20 = vsel %vm625_vm5, %v1969_v21, -inf }
0x11d2   : > { %1971 = vmax.xlane.f32.xlu1 %v1970_v20 }
0x1245   : > { %v2092_v22 = vpop.f32.mrf.mxu3  ;;  %v1972_v23 = vpop.xlane.xlu1 %1971 }
0x1246   : > { %v2095_v49 = vmul.f32 0.35355338, %v2092_v22  ;;  %v1973_v25 = vsub.f32 %v1969_v21, %v1972_v23 }
0x1248   : > { %v1974_v26 = vmul.f32 1.442695, %v1973_v25  ;;  %v1937_v27 = vpop.f32.mrf.mxu2  ;;  %v2096_v28 = vsel %vm481_vm6, %v2095_v49, -1e+09 }
0x1249   : > { %3205 = vmatmul.msk.f32.vlgmr.msra.gmra.mxu2 %vm625_vm5, %v1937_v27  ;;  %v2097_v29 = vsel %vm625_vm5, %v2096_v28, -inf }
0x124a   : > { %3437 = vpow2.f32 %v1974_v26  ;;  %2098 = vmax.xlane.f32.xlu2 %v2097_v29 }
0x1250   : > { %v3438_v30 = vpop.eup %3437 }
0x1251   : > { %3211 = vmatmul.msk.f32.vlgmr.msrb.gmra.mxu2 %vm625_vm5, %v2172_v51  ;;  %v1976_v31 = vsel %vm625_vm5, %v3438_v30, 0.0 }
0x1252   : > { %1977 = vadd.xlane.f32.xlu1 %v1976_v31 }
0x126b   : > { %1995 = vrot.lane.b32.xlu1 %v4001_v47, %s4294_s26 }
0x12bd   : > { %v2099_v33 = vpop.xlane.xlu2 %2098 }
0x12be   : > { %v2100_v35 = vsub.f32 %v2096_v28, %v2099_v33 }
0x12c0   : > { %v2101_v40 = vmul.f32 1.442695, %v2100_v35 }
0x12c5   : > { %v1978_v32 = vpop.xlane.xlu1 %1977 }
0x12c6   : > { %3439 = vrcp.f32 %v1978_v32  ;;  %v1990_v36 = vand.u32 2147483648, %v1978_v32  ;;  %vm1984_vm8 = vweird.f32 %v1978_v32  ;;  %v1988_v0 = vand.u32 2147483647, %v1978_v32 }
0x12c7   : > { %3441 = vpow2.f32 %v2101_v40 }
0x12c8   : > { %v1991_v48 = vor.u32 1.1754944e-38, %v1990_v36  ;;  %vm1989_vm11 = vcmp.eq.f32.partialorder %v1988_v0, 8.507059e+37  ;;  %v2325_v36 = vld [vmem:[#allocation2 + $0x1b8] sm:$0xff]  ;;  %v2322_v0 = vld [vmem:[#allocation2 + $0x1a0] sm:$0xff] }
0x12c9   : > { %2383 = vmatpush.msra.mxu2 %v2325_v36 }
0x12cc   : > { %v3440_v13 = vpop.eup %3439  ;;  %v4033_v39 = vpop.f32.mrf.mxu2 }
0x12cd   : > { %v1980_v34 = vmul.f32 %v3440_v13, %v1978_v32  ;;  %vm1985_vm7 = vweird.f32 %v3440_v13  ;;  %v3442_v52 = vpop.eup %3441 }
0x12ce   : > { %vm1986_vm9 = vmor %vm1984_vm8, %vm1985_vm7  ;;  %v2103_v56 = vsel %vm625_vm5, %v3442_v52, 0.0 }
0x12cf   : > { %v1981_v37 = vsub.f32 1.0, %v1980_v34  ;;  %v3378_v34 = vld [vmem:[%s4265_s5 + $0xb] ss:$0 sm:$0xff] }
0x12d1   : > { %v1982_v38 = vmul.f32 %v3440_v13, %v1981_v37 }
0x12d3   : > { %v1983_v41 = vadd.f32 %v3440_v13, %v1982_v38 }
0x12d4   : > { %v2196_v43 = vpop.f32.mrf.mxu2 }
0x12d5   : > { %v2199_v44 = vmul.f32 0.35355338, %v2196_v43  ;;  %v1987_v45 = vsel %vm1986_vm9, %v3440_v13, %v1983_v41  ;;  %v2324_v43 = vld [vmem:[#allocation2 + $0x1b0] sm:$0xff] }
0x12d6   : > { %v1992_v51 = vsel %vm1989_vm11, %v1991_v48, %v1987_v45  ;;  %2384 = vmatpush.msra.mxu2 %v2324_v43  ;;  %v4065_v45 = vld [vmem:[%s3821_s15 + $0x8] sm:$0xff] }
0x12d7   : > { %v2200_v46 = vsel %vm481_vm6, %v2199_v44, -1e+09  ;;  %v1993_v55 = vmul.f32 %v3438_v30, %v1992_v51  ;;  %v4060_v44 = vld [vmem:[%s3821_s15] sm:$0xff] }
0x12d8   : > { %v2201_v50 = vsel %vm625_vm5, %v2200_v46, -inf }
0x12d9   : > { %2202 = vmax.xlane.f32.xlu0 %v2201_v50 }
0x12dd   : > { %v1996_v53 = vpop.permute.xlu1 %1995 }
0x12de   : > { %2016 = vmatpush.msrb.mxu0 %v1996_v53  ;;  %v2317_v53 = vld [vmem:[#allocation2 + $0x190] sm:$0xff] }
0x12df   : > { %3203 = vmatmul.msk.f32.vlgmr.msrb.gmra.mxu0 %vm625_vm5, %v1993_v55  ;;  %v2316_v55 = vld [vmem:[#allocation2 + $0x188] sm:$0xff] }
0x12e1   : > { %2104 = vadd.xlane.f32.xlu0 %v2103_v56  ;;  %v2315_v56 = vld [vmem:[#allocation2 + $0x180] sm:$0xff] }
0x12f5   : > { %2121 = vrot.lane.b32.xlu0 %v4001_v47, %s4291_s29 }
0x134c   : > { %v2203_v57 = vpop.xlane.xlu0 %2202 }
0x134d   : > { %v2204_v58 = vsub.f32 %v2200_v46, %v2203_v57 }
0x134f   : > { %v2205_v59 = vmul.f32 1.442695, %v2204_v58 }
0x1351   : > { %3443 = vpow2.f32 %v2205_v59  ;;  %v3381_v59 = vld [vmem:[%s4265_s5 + $0xd] ss:$0 sm:$0xff] }
0x1354   : > { %v2105_v60 = vpop.xlane.xlu0 %2104 }
0x1355   : > { %3445 = vrcp.f32 %v2105_v60  ;;  %v2117_v4 = vand.u32 2147483648, %v2105_v60  ;;  %v2115_v7 = vand.u32 2147483647, %v2105_v60  ;;  %vm2111_vm12 = vweird.f32 %v2105_v60 }
0x1357   : > { %v3444_v61 = vpop.eup %3443  ;;  %v2118_v10 = vor.u32 1.1754944e-38, %v2117_v4  ;;  %vm2116_vm1 = vcmp.eq.f32.partialorder %v2115_v7, 8.507059e+37 }
0x1358   : > { %v2207_v62 = vsel %vm625_vm5, %v3444_v61, 0.0 }
0x1359   : > { %2208 = vadd.xlane.f32.xlu2 %v2207_v62 }
0x135b   : > { %v3446_v63 = vpop.eup %3445 }
0x135c   : > { %v2107_v1 = vmul.f32 %v3446_v63, %v2105_v60  ;;  %v2018_v2 = vpop.f32.mrf.mxu0  ;;  %vm2112_vm6 = vweird.f32 %v3446_v63 }
0x135d   : > { %3204 = vmatmul.msk.f32.vlgmr.msra.gmra.mxu1 %vm625_vm5, %v2018_v2  ;;  %vm2113_vm15 = vmor %vm2111_vm12, %vm2112_vm6 }
0x135e   : > { %v2108_v3 = vsub.f32 1.0, %v2107_v1 }
0x1360   : > { %v2109_v5 = vmul.f32 %v3446_v63, %v2108_v3 }
0x1362   : > { %v2110_v9 = vadd.f32 %v3446_v63, %v2109_v5 }
0x1364   : > { %v2114_v42 = vsel %vm2113_vm15, %v3446_v63, %v2110_v9  ;;  %v3379_v9 = vld [vmem:[%s4270_s10 + $0x4] ss:$0 sm:$0xff] }
0x1365   : > { %v2119_v11 = vsel %vm2116_vm1, %v2118_v10, %v2114_v42 }
0x1366   : > { %v2120_v12 = vmul.f32 %v3442_v52, %v2119_v11  ;;  %v2318_v52 = vld [vmem:[#allocation2 + $0x198] sm:$0xff]  ;;  %v3380_v11 = vld [vmem:[%s4271_s11 + $0x4] ss:$0 sm:$0xff] }
0x1367   : > { %v2122_v14 = vpop.permute.xlu0 %2121  ;;  %2360 = vmatpush.msra.mxu1 %v2318_v52 }
0x1368   : > { %2142 = vmatpush.msra.mxu0 %v2122_v14 }
0x1369   : > { %3208 = vmatmul.msk.f32.vlgmr.msra.gmra.mxu0 %vm625_vm5, %v2120_v12  ;;  %2361 = vmatpush.msra.mxu1 %v2317_v53 }
0x136a   : > { %2269 = vmatpush.msrb.mxu0 %v1790_v16  ;;  %v3382_v16 = vld [vmem:[%s4265_s5 + $0xc] ss:$0 sm:$0xff] }
0x136b   : > { %2362 = vmatpush.msra.mxu1 %v2316_v55 }
0x136d   : > { %2363 = vmatpush.msra.mxu1 %v2315_v56 }
0x1371   : > { %2225 = vrot.lane.b32.xlu2 %v4001_v47, %s4292_s20 }
0x13cc   : > { %v2209_v17 = vpop.xlane.xlu2 %2208 }
0x13cd   : > { %3447 = vrcp.f32 %v2209_v17  ;;  %v2221_v22 = vand.u32 2147483648, %v2209_v17  ;;  %v2219_v49 = vand.u32 2147483647, %v2209_v17  ;;  %vm2215_vm3 = vweird.f32 %v2209_v17 }
0x13cf   : > { %v2222_v26 = vor.u32 1.1754944e-38, %v2221_v22  ;;  %vm2220_vm7 = vcmp.eq.f32.partialorder %v2219_v49, 8.507059e+37  ;;  %v2331_v49 = vld [vmem:[#allocation2 + $0x1d0] sm:$0xff] }
0x13d3   : > { %v3448_v18 = vpop.eup %3447 }
0x13d4   : > { %v2211_v19 = vmul.f32 %v3448_v18, %v2209_v17  ;;  %v2226_v21 = vpop.permute.xlu2 %2225  ;;  %vm2216_vm2 = vweird.f32 %v3448_v18 }
0x13d5   : > { %2246 = vmatpush.msra.mxu3 %v2226_v21  ;;  %vm2217_vm4 = vmor %vm2215_vm3, %vm2216_vm2 }
0x13d6   : > { %v2212_v20 = vsub.f32 1.0, %v2211_v19 }
0x13d8   : > { %v2213_v23 = vmul.f32 %v3448_v18, %v2212_v20 }
0x13da   : > { %v2214_v25 = vadd.f32 %v3448_v18, %v2213_v23  ;;  %v2041_v31 = vpop.f32.mrf.mxu1  ;;  %v2332_v23 = vld [vmem:[#allocation2 + $0x1d8] sm:$0xff] }
0x13db   : > { %v2065_v13 = vadd.f32 %v4033_v39, %v2041_v31  ;;  %v2323_v39 = vld [vmem:[#allocation2 + $0x1a8] sm:$0xff]  ;;  %2409 = vmatpush.msrb.mxu3 %v2332_v23 }
0x13dc   : > { %v2218_v47 = vsel %vm2217_vm4, %v3448_v18, %v2214_v25  ;;  %2385 = vmatpush.msra.mxu2 %v2323_v39  ;;  %v2330_v25 = vld [vmem:[#allocation2 + $0x1c8] sm:$0xff] }
0x13dd   : > { %v2223_v27 = vsel %vm2220_vm7, %v2222_v26, %v2218_v47  ;;  %2410 = vmatpush.msrb.mxu3 %v2331_v49  ;;  %v2329_v26 = vld [vmem:[#allocation2 + $0x1c0] sm:$0xff] }
0x13de   : > { %v2224_v28 = vmul.f32 %v3444_v61, %v2223_v27  ;;  %2386 = vmatpush.msra.mxu2 %v2322_v0  ;;  %v2336_v47 = vld [vmem:[#allocation2 + $0x1e0] sm:$0xff] }
0x13df   : > { %3221 = vmatmul.msk.f32.vlgmr.msra.gmra.mxu2 %vm489_vm0, %v4060_v44  ;;  %2411 = vmatpush.msrb.mxu3 %v2330_v25 }
0x13e0   : > { %3212 = vmatmul.msk.f32.vlgmr.msra.gmra.mxu3 %vm625_vm5, %v2224_v28 }
0x13e1   : > { %2412 = vmatpush.msrb.mxu3 %v2329_v26 }
0x13e3   : > { %2628 = vmatpush.msra.mxu3 %v2336_v47 }
0x13e6   : > { %v2144_v29 = vpop.f32.mrf.mxu0 }
0x13e7   : > { %3209 = vmatmul.msk.f32.vlgmr.msrb.gmra.mxu1 %vm625_vm5, %v2144_v29  ;;  %3222 = vmatmul.msk.f32.gmra.mxu2 %vm489_vm0, %v4065_v45 }
0x13e8   : > { %3223 = vmatmul.msk.f32.vlgmr.msrb.gmra.mxu3 %vm489_vm0, %v4060_v44 }
0x13f0   : > { %3224 = vmatmul.msk.f32.gmra.mxu3 %vm489_vm0, %v4065_v45 }
0x1462   : > { %v2388_v54 = vpop.f32.mrf.mxu2 }
0x1463   : > { %v2248_v30 = vpop.f32.mrf.mxu3  ;;  %v4076_v63 = vadd.f32 %v3381_v59, %v2388_v54 }
0x1464   : > { %3213 = vmatmul.msk.f32.vlgmr.msrb.gmra.mxu0 %vm625_vm5, %v2248_v30  ;;  %v2167_v32 = vpop.f32.mrf.mxu1 }
0x1465   : > { %v2170_v33 = vadd.f32 %v2167_v32, %v2065_v13 }
0x146a   : > { %v2391_v61 = vpop.f32.mrf.mxu2 }
0x146b   : > { %v2392_v62 = vadd.f32 %v3381_v59, %v2391_v61 }
0x146d   : > { %3225 = vmatpush.xpose.msk.msra.mxu0 %vm625_vm5, %v2392_v62 }
0x1471   : > { %3226 = vmatpush.xpose.msk.msra.mxu0 %vm625_vm5, %v4076_v63 }
0x14e1   : > { %v2271_v35 = vpop.f32.mrf.mxu0 }
0x14e2   : > { %v2274_v37 = vadd.f32 %v2271_v35, %v2170_v33  ;;  %v2414_v35 = vpop.f32.mrf.mxu3 }
0x14e4   : > { %v2278_v38 = vadd.f32 %v3378_v34, %v2274_v37  ;;  %v3383_v37 = vld [vmem:[%s4265_s5 + $0xe] ss:$0 sm:$0xff] }
0x14e6   : > { %v4055_v40 = vadd.f32 %v2278_v38, %v3975_v6 }
0x14e8   : > { %v2284_v41 = vsel %vm489_vm0, %v4055_v40, 0.0 }
0x14e9   : > { %2285 = vadd.xlane.f32.xlu1 %v2284_v41  ;;  %v2415_v41 = vadd.f32 %v3383_v37, %v2414_v35 }
0x14ea   : > { %v2417_v38 = vpop.f32.mrf.mxu3 }
0x14eb   : > { %v2418_v36 = vadd.f32 %v3383_v37, %v2417_v38 }
0x14ed   : > { %2492 = vmatpush.msrb.mxu1 %v2418_v36  ;;  %v4120_v43 = vpack.i.bf16 %v2415_v41, %v2418_v36 }
0x14ef   : > { %2493 = vmatpush.msrb.mxu1 %v2415_v41 }
0x155c   : > { %v2286_v6 = vpop.xlane.xlu1 %2285 }
0x155d   : > { %v2287_v46 = vmul.f32 %v2286_v6, %v3719_v8 }
0x155f   : > { %v2288_v48 = vsub.f32 %v4055_v40, %v2287_v46 }
0x1561   : > { %v2289_v50 = vmul.f32 %v2288_v48, %v2288_v48 }
0x1563   : > { %v2290_v51 = vsel %vm489_vm0, %v2289_v50, 0.0 }
0x1564   : > { %2291 = vadd.xlane.f32.xlu0 %v2290_v51 }
0x1578   : > { %2502 = vrot.lane.b32.xlu0 %v2392_v62, %s4294_s26 }
0x1580   : > { %2637 = vrot.lane.b32.xlu0 %v2392_v62, %s4291_s29 }
0x1588   : > { %2635 = vrot.lane.b32.xlu0 %v4076_v63, %s4291_s29 }
0x15d7   : > { %v2292_v57 = vpop.xlane.xlu0 %2291 }
0x15d8   : > { %v2293_v58 = vmul.f32 %v2292_v57, %v3719_v8 }
0x15da   : > { %v2294_v60 = vadd.f32 1e-05, %v2293_v58 }
0x15dc   : > { %3449 = vrsqrt.f32 %v2294_v60  ;;  %vm2301_vm9 = vweird.f32 %v2294_v60 }
0x15e2   : > { %v3450_v1 = vpop.eup %3449 }
0x15e3   : > { %v2296_v2 = vmul.f32 %v3450_v1, %v2294_v60  ;;  %vm2302_vm8 = vweird.f32 %v3450_v1 }
0x15e4   : > { %vm2303_vm11 = vmor %vm2301_vm9, %vm2302_vm8 }
0x15e5   : > { %v2297_v3 = vmul.f32 %v3450_v1, %v2296_v2 }
0x15e7   : > { %v2298_v4 = vmul.f32 0.5, %v2297_v3 }
0x15e9   : > { %v2299_v5 = vsub.f32 1.5, %v2298_v4 }
0x15ea   : > { %v2503_v15 = vpop.permute.xlu0 %2502 }
0x15eb   : > { %v2300_v7 = vmul.f32 %v3450_v1, %v2299_v5  ;;  %3229 = vmatpush.xpose.msk.msrb.mxu0 %vm625_vm5, %v2503_v15 }
0x15ed   : > { %v2304_v10 = vsel %vm2303_vm11, %v3450_v1, %v2300_v7 }
0x15ee   : > { %v2305_v42 = vmul.f32 %v2304_v10, %v2288_v48 }
0x15f0   : > { %v2309_v12 = vmul.f32 %v3379_v9, %v2305_v42 }
0x15f2   : > { %v2313_v14 = vadd.f32 %v3380_v11, %v2309_v12  ;;  %v2638_v29 = vpop.permute.xlu0 %2637 }
0x15f4   : > { %3220 = vmatmul.msk.f32.vlgmr.msra.gmra.mxu1 %vm489_vm0, %v2313_v14 }
0x15fa   : > { %v2636_v33 = vpop.permute.xlu0 %2635 }
0x1671   : > { %v2365_v17 = vpop.f32.mrf.mxu1 }
0x1672   : > { %v2366_v18 = vadd.f32 %v3382_v16, %v2365_v17 }
0x1674   : > { %2744 = vrot.lane.b32.xlu0 %v2366_v18, %s4292_s20  ;;  %3227 = vmatmul.msk.f32.vlgmr.msra.gmra.mxu0 %vm625_vm5, %v2366_v18 }
0x16e6   : > { %v2745_v61 = vpop.permute.xlu0 %2744 }
0x16f1   : > { %v2446_v19 = vpop.f32.mrf.mxu0 }
0x16f2   : > { %v2449_v21 = vmul.f32 0.35355338, %v2446_v19 }
0x16f4   : > { %v2450_v20 = vsel %vm486_vm13, %v2449_v21, -1e+09 }
0x16f5   : > { %v2451_v22 = vsel %vm1218_vm14, %v2450_v20, -inf }
0x16f6   : > { %2452 = vmax.xlane.f32.xlu2 %v2451_v22 }
0x170e   : > { %2500 = vrot.lane.b32.xlu2 %v4076_v63, %s4294_s26 }
0x1716   : > { %2748 = vrot.lane.b32.xlu2 %v2392_v62, %s4292_s20 }
0x171e   : > { %2633 = vrot.lane.b32.xlu2 %v2366_v18, %s4291_s29 }
0x1769   : > { %v2453_v27 = vpop.xlane.xlu2 %2452 }
0x176a   : > { %v2454_v28 = vsub.f32 %v2450_v20, %v2453_v27 }
0x176c   : > { %v2455_v30 = vmul.f32 1.442695, %v2454_v28 }
0x176e   : > { %3451 = vpow2.f32 %v2455_v30 }
0x1771   : > { %v2501_v31 = vpop.permute.xlu2 %2500 }
0x1772   : > { %3230 = vmatpush.xpose.msk.msrb.mxu0 %vm625_vm5, %v2501_v31 }
0x1774   : > { %v3452_v32 = vpop.eup %3451 }
0x1775   : > { %v2457_v13 = vsel %vm1218_vm14, %v3452_v32, 0.0 }
0x1776   : > { %3235 = vmatpush.xpose.msk.msra.mxu0 %vm625_vm5, %v2638_v29  ;;  %2458 = vadd.xlane.f32.xlu1 %v2457_v13 }
0x1779   : > { %v2749_v34 = vpop.permute.xlu2 %2748 }
0x177a   : > { %3236 = vmatpush.xpose.msk.msra.mxu0 %vm625_vm5, %v2636_v33  ;;  %3240 = vmatpush.xpose.msk.msrb.mxu3 %vm625_vm5, %v2749_v34 }
0x1781   : > { %v2634_v54 = vpop.permute.xlu2 %2633 }
0x178f   : > { %2498 = vrot.lane.b32.xlu1 %v2366_v18, %s4294_s26 }
0x1797   : > { %2746 = vrot.lane.b32.xlu1 %v4076_v63, %s4292_s20 }
0x17e9   : > { %v2459_v39 = vpop.xlane.xlu1 %2458 }
0x17ea   : > { %3453 = vrcp.f32 %v2459_v39  ;;  %v2471_v6 = vand.u32 2147483648, %v2459_v39  ;;  %v2469_v48 = vand.u32 2147483647, %v2459_v39  ;;  %vm2465_vm12 = vweird.f32 %v2459_v39 }
0x17ec   : > { %v2472_v51 = vor.u32 1.1754944e-38, %v2471_v6  ;;  %vm2470_vm1 = vcmp.eq.f32.partialorder %v2469_v48, 8.507059e+37 }
0x17f0   : > { %v3454_v0 = vpop.eup %3453 }
0x17f1   : > { %v2461_v44 = vmul.f32 %v3454_v0, %v2459_v39  ;;  %vm2466_vm6 = vweird.f32 %v3454_v0 }
0x17f2   : > { %vm2467_vm15 = vmor %vm2465_vm12, %vm2466_vm6 }
0x17f3   : > { %v2462_v45 = vsub.f32 1.0, %v2461_v44 }
0x17f5   : > { %v2463_v46 = vmul.f32 %v3454_v0, %v2462_v45 }
0x17f7   : > { %v2464_v50 = vadd.f32 %v3454_v0, %v2463_v46 }
0x17f9   : > { %v2468_v52 = vsel %vm2467_vm15, %v3454_v0, %v2464_v50 }
0x17fa   : > { %v2473_v53 = vsel %vm2470_vm1, %v2472_v51, %v2468_v52 }
0x17fb   : > { %v2474_v55 = vmul.f32 %v3452_v32, %v2473_v53 }
0x17fd   : > { %3228 = vmatmul.msk.f32.vlgmr.msrb.gmra.mxu1 %vm1218_vm14, %v2474_v55 }
0x1801   : > { %v2499_v56 = vpop.permute.xlu1 %2498 }
0x1802   : > { %3231 = vmatmul.msk.f32.vlgmr.msrb.gmra.mxu0 %vm625_vm5, %v2499_v56 }
0x1809   : > { %v2747_v57 = vpop.permute.xlu1 %2746 }
0x180a   : > { %3237 = vmatmul.msk.f32.vlgmr.msra.gmra.mxu0 %vm625_vm5, %v2634_v54  ;;  %3241 = vmatpush.xpose.msk.msrb.mxu3 %vm625_vm5, %v2747_v57  ;;  %v2337_v57 = vld [vmem:[#allocation2 + $0x1e8] sm:$0xff] }
0x180b   : > { %2605 = vmatpush.msrb.mxu2 %v2337_v57  ;;  %v3387_v57 = vld [vmem:[%s4267_s7 + $0x1] ss:$0 sm:$0xff] }
0x187a   : > { %v2495_v58 = vpop.f32.mrf.mxu1 }
0x187b   : > { %3234 = vmatmul.msk.f32.vlgmr.msra.gmra.mxu3 %vm625_vm5, %v2495_v58  ;;  %v2338_v58 = vld [vmem:[#allocation2 + $0x1f0] sm:$0xff] }
0x187c   : > { %2738 = vmatpush.msra.mxu2 %v2338_v58 }
0x187f   : > { %v2527_v59 = vpop.f32.mrf.mxu0 }
0x1880   : > { %v2530_v60 = vmul.f32 0.35355338, %v2527_v59  ;;  %v2339_v59 = vld [vmem:[#allocation2 + $0x1f8] sm:$0xff] }
0x1882   : > { %v2531_v62 = vsel %vm486_vm13, %v2530_v60, -1e+09 }
0x1883   : > { %3242 = vmatmul.msk.f32.vlgmr.msrb.gmra.mxu3 %vm625_vm5, %v2745_v61  ;;  %v2532_v63 = vsel %vm1218_vm14, %v2531_v62, -inf }
0x1884   : > { %2533 = vmax.xlane.f32.xlu1 %v2532_v63 }
0x1887   : > { %v2662_v1 = vpop.f32.mrf.mxu0 }
0x1888   : > { %v2665_v2 = vmul.f32 0.35355338, %v2662_v1 }
0x188a   : > { %v2666_v3 = vsel %vm486_vm13, %v2665_v2, -1e+09 }
0x188b   : > { %v2667_v4 = vsel %vm1218_vm14, %v2666_v3, -inf }
0x188c   : > { %2668 = vmax.xlane.f32.xlu2 %v2667_v4 }
0x18f7   : > { %v2534_v5 = vpop.xlane.xlu1 %2533 }
0x18f8   : > { %v2535_v7 = vsub.f32 %v2531_v62, %v2534_v5 }
0x18fa   : > { %v2536_v9 = vmul.f32 1.442695, %v2535_v7 }
0x18fc   : > { %3455 = vpow2.f32 %v2536_v9 }
0x18fe   : > { %v4134_v10 = vpop.f32.mrf.mxu3 }
0x18ff   : > { %v2669_v42 = vpop.xlane.xlu2 %2668 }
0x1900   : > { %v2670_v11 = vsub.f32 %v2666_v3, %v2669_v42 }
0x1902   : > { %v3456_v12 = vpop.eup %3455  ;;  %v2671_v14 = vmul.f32 1.442695, %v2670_v11 }
0x1903   : > { %v2538_v15 = vsel %vm1218_vm14, %v3456_v12, 0.0 }
0x1904   : > { %3457 = vpow2.f32 %v2671_v14  ;;  %2539 = vadd.xlane.f32.xlu1 %v2538_v15 }
0x1906   : > { %v2773_v16 = vpop.f32.mrf.mxu3 }
0x1907   : > { %v2776_v17 = vmul.f32 0.35355338, %v2773_v16 }
0x1909   : > { %v2777_v18 = vsel %vm486_vm13, %v2776_v17, -1e+09 }
0x190a   : > { %v3458_v19 = vpop.eup %3457  ;;  %v2778_v21 = vsel %vm1218_vm14, %v2777_v18, -inf }
0x190b   : > { %2779 = vmax.xlane.f32.xlu0 %v2778_v21  ;;  %v2673_v20 = vsel %vm1218_vm14, %v3458_v19, 0.0 }
0x190c   : > { %2674 = vadd.xlane.f32.xlu2 %v2673_v20  ;;  %v3384_v20 = vld [vmem:[%s4265_s5 + $0xf] ss:$0 sm:$0xff] }
0x191d   : > { %3342 = vrot.lane.b32.xlu1 %v4120_v43, %s4294_s26  ;;  %s3012_s26 = scalar_lea.hbm %s4272_s12, %s3266_s28 }
0x191e   : > { %s3016_s3 = sshll.u32 %s3012_s26, 4  ;;  %s3017_s3 = int_to_ptr.hbm [resolvable:$true] %s3016_s3 }
0x191f   : > { %s3517_s16 = sshra.s32 %s3017_s3, 4  ;;  %s3518_s16 = int_to_ptr.hbm [resolvable:$true] %s3517_s16 }
0x1920   : > { %s3519_s28 = scalar_lea.hbm %s3518_s16, 8  ;;  %p3524_p3 = scmp.lt.s32.totalorder %s3518_s16, %s4272_s12 }
0x1921   : > { %p3520_p0 = scmp.ne.s32.totalorder %s3518_s16, %s3519_s28  ;;  %p3525_p4 = scmp.lt.s32.totalorder %s3523_s19, %s3519_s28 }
0x1923   : > { %p3521_p1 = pnand %p3520_p0, %p3681_p5  ;;  %p3526_p7 = por %p3525_p4, %p3524_p3 }
0x1924   : > { %3347 = vrot.lane.b32.xlu2 %v4120_v43, %s4291_s29 }
0x1925   : > { %p3522_p2 = pneg %p3521_p1 }
0x1927   : > { %p3527_p8 = pnand %p3526_p7, %p3522_p2 }
0x1977   : > { %v2540_v22 = vpop.xlane.xlu1 %2539 }
0x1978   : > { %3459 = vrcp.f32 %v2540_v22  ;;  %v2552_v33 = vand.u32 2147483648, %v2540_v22  ;;  %vm2546_vm2 = vweird.f32 %v2540_v22  ;;  %v2550_v35 = vand.u32 2147483647, %v2540_v22 }
0x197a   : > { %v2553_v41 = vor.u32 1.1754944e-38, %v2552_v33  ;;  %vm2551_vm4 = vcmp.eq.f32.partialorder %v2550_v35, 8.507059e+37  ;;  %v3258_v33 = vld [vmem:[%s4268_s8 + $0x68] sm:$0xff] }
0x197e   : > { %v3460_v23 = vpop.eup %3459  ;;  %v2780_v49 = vpop.xlane.xlu0 %2779 }
0x197f   : > { %v2542_v25 = vmul.f32 %v3460_v23, %v2540_v22  ;;  %v2781_v24 = vsub.f32 %v2777_v18, %v2780_v49  ;;  %v2675_v26 = vpop.xlane.xlu2 %2674  ;;  %vm2547_vm13 = vweird.f32 %v3460_v23 }
0x1980   : > { %3461 = vrcp.f32 %v2675_v26  ;;  %vm2548_vm3 = vmor %vm2546_vm2, %vm2547_vm13  ;;  %v2687_v6 = vand.u32 2147483648, %v2675_v26  ;;  %vm2681_vm8 = vweird.f32 %v2675_v26  ;;  %v2685_v48 = vand.u32 2147483647, %v2675_v26 }
0x1981   : > { %v2543_v47 = vsub.f32 1.0, %v2542_v25  ;;  %v2782_v27 = vmul.f32 1.442695, %v2781_v24 }
0x1982   : > { %v2688_v53 = vor.u32 1.1754944e-38, %v2687_v6  ;;  %vm2686_vm11 = vcmp.eq.f32.partialorder %v2685_v48, 8.507059e+37 }
0x1983   : > { %3463 = vpow2.f32 %v2782_v27  ;;  %v2544_v28 = vmul.f32 %v3460_v23, %v2543_v47 }
0x1985   : > { %v2545_v32 = vadd.f32 %v3460_v23, %v2544_v28 }
0x1986   : > { %v3462_v29 = vpop.eup %3461 }
0x1987   : > { %v2677_v30 = vmul.f32 %v3462_v29, %v2675_v26  ;;  %v2549_v37 = vsel %vm2548_vm3, %v3460_v23, %v2545_v32  ;;  %vm2682_vm7 = vweird.f32 %v3462_v29  ;;  %v3348_v45 = vpop.permute.xlu2 %3347  ;;  %v3260_v32 = vld [vmem:[%s4268_s8 + $0x78] sm:$0xff] }
0x1988   : > { %v2554_v39 = vsel %vm2551_vm4, %v2553_v41, %v2549_v37  ;;  %vm2683_vm9 = vmor %vm2681_vm8, %vm2682_vm7  ;;  %v3349_v51 = vunpack.i.l.bf16 %v3348_v45  ;;  %v3350_v55 = vunpack.i.h.bf16 %v3348_v45  ;;  %2953 = vmatpush.msra.mxu3 %v3260_v32  ;;  %v3257_v37 = vld [vmem:[%s4268_s8 + $0x60] sm:$0xff]  ;;  %v3256_v41 = vld [vmem:[%s4268_s8 + $0x58] sm:$0xff] }
0x1989   : > { %v4145_v31 = vpop.eup %3463  ;;  %v2678_v13 = vsub.f32 1.0, %v2677_v30  ;;  %v2555_v50 = vmul.f32 %v3456_v12, %v2554_v39  ;;  %v3248_v30 = vld [vmem:[%s4266_s6 + $0x28] sm:$0xff] }
0x198a   : > { %v2784_v34 = vsel %vm1218_vm14, %v4145_v31, 0.0 }
0x198b   : > { %2785 = vadd.xlane.f32.xlu0 %v2784_v34  ;;  %v2679_v38 = vmul.f32 %v3462_v29, %v2678_v13  ;;  %v3259_v13 = vld [vmem:[%s4268_s8 + $0x70] sm:$0xff] }
0x198c   : > { %2954 = vmatpush.msra.mxu3 %v3259_v13 }
0x198d   : > { %v2680_v44 = vadd.f32 %v3462_v29, %v2679_v38 }
0x198e   : > { %2955 = vmatpush.msra.mxu3 %v3258_v33 }
0x198f   : > { %v3343_v36 = vpop.permute.xlu1 %3342  ;;  %v2684_v52 = vsel %vm2683_vm9, %v3462_v29, %v2680_v44  ;;  %v3250_v29 = vld [vmem:[%s4266_s6 + $0x38] sm:$0xff] }
0x1990   : > { %v3344_v0 = vunpack.i.l.bf16 %v3343_v36  ;;  %v3345_v46 = vunpack.i.h.bf16 %v3343_v36  ;;  %v2689_v56 = vsel %vm2686_vm11, %v2688_v53, %v2684_v52  ;;  %2956 = vmatpush.msra.mxu3 %v3257_v37 }
0x1991   : > { %v2690_v54 = vmul.f32 %v3458_v19, %v2689_v56  ;;  %v3254_v56 = vld [vmem:[%s4268_s8 + $0x48] sm:$0xff] }
0x1992   : > { %2581 = vmatpush.msra.mxu1 %v3344_v0  ;;  %2957 = vmatpush.msra.mxu3 %v3256_v41 }
0x1994   : > { %2582 = vmatpush.msra.mxu1 %v3345_v46  ;;  %v3385_v46 = vld [vmem:[%s4270_s10 + $0x5] ss:$0 sm:$0xff] }
0x1995   : > { %3232 = vmatmul.msk.f32.vlgmr.msra.gmra.mxu1 %vm1218_vm14, %v2555_v50 }
0x1996   : > { %2714 = vmatpush.msrb.mxu1 %v3349_v51  ;;  %v3386_v51 = vld [vmem:[%s4271_s11 + $0x5] ss:$0 sm:$0xff] }
0x1998   : > { %2715 = vmatpush.msrb.mxu1 %v3350_v55  ;;  %v3255_v55 = vld [vmem:[%s4268_s8 + $0x50] sm:$0xff] }
0x1999   : > { %2958 = vmatpush.msra.mxu3 %v3255_v55 }
0x199a   : > { %2849 = vmatpush.msra.mxu1 %v2339_v59 }
0x199b   : > { %2959 = vmatpush.msra.mxu3 %v3254_v56 }
0x199d   : > { %3238 = vmatmul.msk.f32.vlgmr.msrb.gmra.mxu1 %vm1218_vm14, %v2690_v54  ;;  %v3253_v54 = vld [vmem:[%s4268_s8 + $0x40] sm:$0xff] }
0x199e   : > { %2960 = vmatpush.msra.mxu3 %v3253_v54 }
0x199f   : > { %3352 = vrot.lane.b32.xlu0 %v4120_v43, %s4292_s20 }
0x19fe   : > { %v2786_v60 = vpop.xlane.xlu0 %2785 }
0x19ff   : > { %3465 = vrcp.f32 %v2786_v60  ;;  %v2798_v3 = vand.u32 2147483648, %v2786_v60  ;;  %vm2792_vm12 = vweird.f32 %v2786_v60  ;;  %v2796_v4 = vand.u32 2147483647, %v2786_v60 }
0x1a01   : > { %v2799_v43 = vor.u32 1.1754944e-38, %v2798_v3  ;;  %vm2797_vm1 = vcmp.eq.f32.partialorder %v2796_v4, 8.507059e+37 }
0x1a05   : > { %v3466_v61 = vpop.eup %3465 }
0x1a06   : > { %v2788_v62 = vmul.f32 %v3466_v61, %v2786_v60  ;;  %vm2793_vm6 = vweird.f32 %v3466_v61 }
0x1a07   : > { %vm2794_vm15 = vmor %vm2792_vm12, %vm2793_vm6 }
0x1a08   : > { %v2789_v63 = vsub.f32 1.0, %v2788_v62 }
0x1a0a   : > { %v2790_v1 = vmul.f32 %v3466_v61, %v2789_v63 }
0x1a0c   : > { %v2791_v2 = vadd.f32 %v3466_v61, %v2790_v1 }
0x1a0e   : > { %v2795_v5 = vsel %vm2794_vm15, %v3466_v61, %v2791_v2  ;;  %v3388_v61 = vld [vmem:[%s4269_s9 + $0x1] ss:$0 sm:$0xff] }
0x1a0f   : > { %v2800_v9 = vsel %vm2797_vm1, %v2799_v43, %v2795_v5 }
0x1a10   : > { %v2801_v14 = vmul.f32 %v4145_v31, %v2800_v9  ;;  %v3247_v31 = vld [vmem:[%s4266_s6 + $0x20] sm:$0xff] }
0x1a11   : > { %v3353_v7 = vpop.permute.xlu0 %3352 }
0x1a12   : > { %v3354_v42 = vunpack.i.l.bf16 %v3353_v7  ;;  %v2584_v11 = vpop.f32.mrf.mxu1  ;;  %v3355_v12 = vunpack.i.h.bf16 %v3353_v7 }
0x1a13   : > { %3233 = vmatmul.msk.f32.vlgmr.msrb.gmra.mxu2 %vm625_vm5, %v2584_v11 }
0x1a14   : > { %2825 = vmatpush.msrb.mxu0 %v3354_v42  ;;  %2919 = vmatpush.msrb.mxu2 %v3250_v29 }
0x1a16   : > { %2826 = vmatpush.msrb.mxu0 %v3355_v12 }
0x1a17   : > { %3243 = vmatmul.msk.f32.vlgmr.msrb.gmra.mxu0 %vm1218_vm14, %v2801_v14 }
0x1a1a   : > { %v2717_v15 = vpop.f32.mrf.mxu1 }
0x1a1b   : > { %3239 = vmatmul.msk.f32.vlgmr.msra.gmra.mxu2 %vm625_vm5, %v2717_v15 }
0x1a94   : > { %v2828_v16 = vpop.f32.mrf.mxu0 }
0x1a95   : > { %3244 = vmatmul.msk.f32.vlgmr.msra.gmra.mxu1 %vm625_vm5, %v2828_v16 }
0x1a96   : > { %v2607_v17 = vpop.f32.mrf.mxu2 }
0x1a97   : > { %v2631_v19 = vadd.f32 %v4134_v10, %v2607_v17 }
0x1a9e   : > { %v2740_v18 = vpop.f32.mrf.mxu2 }
0x1a9f   : > { %v2743_v21 = vadd.f32 %v2740_v18, %v2631_v19  ;;  %v3389_v19 = vld [vmem:[%s4270_s10 + $0x6] ss:$0 sm:$0xff] }
0x1b12   : > { %v2851_v22 = vpop.f32.mrf.mxu1 }
0x1b13   : > { %v2854_v23 = vadd.f32 %v2851_v22, %v2743_v21 }
0x1b15   : > { %v2858_v49 = vadd.f32 %v3384_v20, %v2854_v23  ;;  %v3390_v20 = vld [vmem:[%s4271_s11 + $0x6] ss:$0 sm:$0xff] }
0x1b17   : > { %v2859_v25 = vadd.f32 %v2858_v49, %v4055_v40  ;;  %v3249_v40 = vld [vmem:[%s4266_s6 + $0x30] sm:$0xff] }
0x1b18   : > { %2920 = vmatpush.msrb.mxu2 %v3249_v40 }
0x1b19   : > { %v2864_v24 = vsel %vm489_vm0, %v2859_v25, 0.0 }
0x1b1a   : > { %2865 = vadd.xlane.f32.xlu0 %v2864_v24  ;;  %2921 = vmatpush.msrb.mxu2 %v3248_v30 }
0x1b1c   : > { %2922 = vmatpush.msrb.mxu2 %v3247_v31 }
0x1b8d   : > { %v2866_v26 = vpop.xlane.xlu0 %2865 }
0x1b8e   : > { %v2867_v47 = vmul.f32 %v2866_v26, %v3719_v8 }
0x1b90   : > { %v2868_v27 = vsub.f32 %v2859_v25, %v2867_v47 }
0x1b92   : > { %v2869_v28 = vmul.f32 %v2868_v27, %v2868_v27 }
0x1b94   : > { %v2870_v10 = vsel %vm489_vm0, %v2869_v28, 0.0 }
0x1b95   : > { %2871 = vadd.xlane.f32.xlu1 %v2870_v10 }
0x1c08   : > { %v2872_v34 = vpop.xlane.xlu1 %2871 }
0x1c09   : > { %v2873_v35 = vmul.f32 %v2872_v34, %v3719_v8 }
0x1c0b   : > { %v2874_v38 = vadd.f32 1e-05, %v2873_v35 }
0x1c0d   : > { %3467 = vrsqrt.f32 %v2874_v38  ;;  %vm2881_vm14 = vweird.f32 %v2874_v38 }
0x1c13   : > { %v3468_v36 = vpop.eup %3467 }
0x1c14   : > { %v2876_v39 = vmul.f32 %v3468_v36, %v2874_v38  ;;  %vm2882_vm5 = vweird.f32 %v3468_v36 }
0x1c15   : > { %vm2883_vm13 = vmor %vm2881_vm14, %vm2882_vm5 }
0x1c16   : > { %v2877_v0 = vmul.f32 %v3468_v36, %v2876_v39 }
0x1c18   : > { %v2878_v44 = vmul.f32 0.5, %v2877_v0 }
0x1c1a   : > { %v2879_v45 = vsub.f32 1.5, %v2878_v44 }
0x1c1c   : > { %v2880_v6 = vmul.f32 %v3468_v36, %v2879_v45 }
0x1c1e   : > { %v2884_v48 = vsel %vm2883_vm13, %v3468_v36, %v2880_v6 }
0x1c1f   : > { %v2885_v50 = vmul.f32 %v2884_v48, %v2868_v27 }
0x1c21   : > { %v2889_v52 = vmul.f32 %v3385_v46, %v2885_v50 }
0x1c23   : > { %v2893_v53 = vadd.f32 %v3386_v51, %v2889_v52 }
0x1c25   : > { %3252 = vmatmul.msk.f32.vlgmr.msrb.gmra.mxu2 %vm489_vm0, %v2893_v53 }
0x1ca8   : > { %v2924_v58 = vpop.f32.mrf.mxu2 }
0x1ca9   : > { %v2925_v59 = vadd.f32 %v3387_v57, %v2924_v58 }
0x1cab   : > { %v2927_v60 = vmax.f32 %v2925_v59, 0.0 }
0x1cad   : > { %3262 = vmatmul.msk.f32.vlgmr.msra.gmra.mxu3 %vm1706_vm10, %v2927_v60 }
0x1d30   : > { %v2962_v62 = vpop.f32.mrf.mxu3 }
0x1d31   : > { %v2963_v63 = vadd.f32 %v3388_v61, %v2962_v62 }
0x1d33   : > { %v2965_v1 = vadd.f32 %v2963_v63, %v2859_v25 }
0x1d35   : > { %v2970_v2 = vsel %vm489_vm0, %v2965_v1, 0.0 }
0x1d36   : > { %2971 = vadd.xlane.f32.xlu2 %v2970_v2 }
0x1da9   : > { %v2972_v3 = vpop.xlane.xlu2 %2971 }
0x1daa   : > { %v2973_v4 = vmul.f32 %v2972_v3, %v3719_v8 }
0x1dac   : > { %v2974_v5 = vsub.f32 %v2965_v1, %v2973_v4 }
0x1dae   : > { %v2975_v43 = vmul.f32 %v2974_v5, %v2974_v5 }
0x1db0   : > { %v2976_v7 = vsel %vm489_vm0, %v2975_v43, 0.0 }
0x1db1   : > { %2977 = vadd.xlane.f32.xlu0 %v2976_v7 }
0x1e24   : > { %v2978_v9 = vpop.xlane.xlu0 %2977 }
0x1e25   : > { %v2979_v42 = vmul.f32 %v2978_v9, %v3719_v8 }
0x1e27   : > { %v2980_v11 = vadd.f32 1e-05, %v2979_v42 }
0x1e29   : > { %3469 = vrsqrt.f32 %v2980_v11  ;;  %vm2987_vm2 = vweird.f32 %v2980_v11 }
0x1e2f   : > { %v3470_v12 = vpop.eup %3469 }
0x1e30   : > { %v2982_v14 = vmul.f32 %v3470_v12, %v2980_v11  ;;  %vm2988_vm10 = vweird.f32 %v3470_v12 }
0x1e31   : > { %vm2989_vm3 = vmor %vm2987_vm2, %vm2988_vm10 }
0x1e32   : > { %v2983_v15 = vmul.f32 %v3470_v12, %v2982_v14 }
0x1e34   : > { %v2984_v16 = vmul.f32 0.5, %v2983_v15 }
0x1e36   : > { %v2985_v17 = vsub.f32 1.5, %v2984_v16 }
0x1e38   : > { %v2986_v18 = vmul.f32 %v3470_v12, %v2985_v17 }
0x1e3a   : > { %v2990_v8 = vsel %vm2989_vm3, %v3470_v12, %v2986_v18 }
0x1e3b   : > { %v2991_v21 = vmul.f32 %v2990_v8, %v2974_v5 }
0x1e3d   : > { %v2995_v22 = vmul.f32 %v3389_v19, %v2991_v21 }
0x1e3f   : > { %v2999_v23 = vadd.f32 %v3390_v20, %v2995_v22 }
0x1e41   : > { %3000 = vst.msk [vmem:[%s460_s2] sm:$0xff] %vm489_vm0, %v2999_v23 }
0x1e42   : > { %3530 = shalt.err (!%p3527_p8)
}
0x1e43   : > { %3274 = dma.vmem_to_hbm [thread:$0]  (%p3681_p5), %s3015_s25, 128, %s3017_s3, %s3002_s17  }
0x1e44 PF: > { %p3286_p9 = scmp.ge.s32.totalorder %s3569_s24, 2  ;;  %s3028_s18 = sand.u32 1, %s3557_s21  }
0x1e45   : > { %s3029_s15 = scalar_lea.sflag [#allocation4], %s3028_s18 }
0x1e46   : > { %p3281_p10 = pnand %p3286_p9, %p3685_p6 }
0x1e48   : > { %p3282_p11 = pneg %p3281_p10 }
0x1e4a   : > { %3552 = dma.done.wait (%p3282_p11), %s3029_s15, 128  }
0x1e4b   : > { %3554 = vsyncadd (%p3282_p11), %s3029_s15, 4294967168  ;;  %p23_p12 = scmp.ge.s32.totalorder %s3668_s27, 4   ;;  %s4295_s21 = smov %s3561_s22 }
0x1e4c   : > { %s4296_s22 = smov %s3565_s23  ;;  %s4297_s23 = smov %s3679_s30 }
0x1e4d   : > { %s4298_s24 = smov %s3668_s27  ;;  %25 = sbr.rel (!%p23_p12) target bundleno = 9 (0x9), region = 163 }
0x1e52   :  { %3035 = vsyncpa [#allocation3], 1 }
0x1e53   :  { %3037 = vsyncpa [#allocation3 + $0x1], 1 }
0x1e54   :  { %3038 = vsyncpa [#allocation4], 1 }
0x1e55   :  { %3040 = vsyncpa [#allocation4 + $0x1], 1 }

</bundles_post_ra>
